<compile_context>
chip_gen: v5e
topology: v5e:2x2
jax: 0.10.0
libtpu: 0.0.40
codegen_flags: <defaults>
</compile_context>

<pallas_src>
import jax
import jax.numpy as jnp
from jax import lax
from jax.experimental import pallas as pl
from jax.experimental.pallas import tpu as pltpu

LANE = 128


def _round_up(a, b):
    return (a + b - 1) // b * b


def _mish_f32(y):
    # mish(y) = y * tanh(softplus(y)) = y * t / (t + 2),  t = e*(e+2),
    # e = exp(min(y, 20))   (overflow guard; exact for y <= 20)
    e = jnp.exp(jnp.minimum(y, 20.0))
    t = e * (e + 2.0)
    return y * t * pl.reciprocal(t + 2.0, approx=True)


def _pick_row_tile(h, w, max_rows=None):
    """Largest divisor of h whose tile keeps ~<=2048 flattened (h*w) rows."""
    if max_rows is None:
        max_rows = max(1, 2048 // max(w, 1))
    max_rows = max(1, min(h, int(max_rows)))
    for cand in range(max_rows, 0, -1):
        if h % cand == 0:
            return cand
    return 1


def prepare_bottleneck_params(params):
    """Pad eval-mode-BN-folded weights to lane-dense shapes, cast to bf16."""
    w1, b1 = params["cv1"]              # (c1, c_), (c_,)
    w2, b2 = params["cv2"]              # (3, 3, c_, c2), (c2,)
    c1, c_ = w1.shape
    c2 = w2.shape[3]
    c1p, cp, c2p = _round_up(c1, LANE), _round_up(c_, LANE), _round_up(c2, LANE)

    w1_p = jnp.pad(w1, ((0, c1p - c1), (0, cp - c_))).astype(jnp.bfloat16)
    b1_p = jnp.pad(b1, (0, cp - c_)).reshape(1, cp).astype(jnp.float32)
    w2_p = jnp.pad(w2, ((0, 0), (0, 0), (0, cp - c_), (0, c2p - c2)))
    # K index = kw*cp + c  ->  matches concat([left, center, right], axis=-1)
    w2_p = w2_p.reshape(3, 3 * cp, c2p).astype(jnp.bfloat16)
    b2_p = jnp.pad(b2, (0, c2p - c2)).reshape(1, c2p).astype(jnp.float32)

    dims = dict(c1=c1, c2=c2, c1p=c1p, cp=cp, c2p=c2p)
    return (w1_p, b1_p, w2_p, b2_p), dims


def bottleneck_forward_nhwc(x_p, prep, dims, shortcut=True,
                            max_rows_per_tile=None):
    """Core fused kernel.

    x_p: (n, h, w, c1p) bf16, channel-padded NHWC.  Returns (n, h, w, c2p)
    bf16 in the same padded layout (keep this layout between stacked blocks).
    """
    w1_p, b1_p, w2_p, b2_p = prep
    c1p, cp, c2p = dims["c1p"], dims["cp"], dims["c2p"]
    n, h, w, _ = x_p.shape
    add = bool(shortcut) and (dims["c1"] == dims["c2"])   # c1p == c2p then

    th = _pick_row_tile(h, w, max_rows_per_tile)           # rows per tile
    nr = h // th

    def kernel(xm_ref, xt_ref, xb_ref, w1_ref, b1_ref, w2_ref, b2_ref,
               o_ref, y1_scr):
        r = pl.program_id(1)
        last = pl.num_programs(1) - 1

        w1 = w1_ref[...]                                    # (c1p, cp) bf16
        b1 = b1_ref[...]                                    # (1, cp)  f32

        # ---- cv1 (1x1 conv + folded BN + Mish) on this tile's th rows ------
        xm = xm_ref[...].reshape(th * w, c1p)               # bf16
        y1 = _mish_f32(jnp.dot(xm, w1, preferred_element_type=jnp.float32)
                       + b1)
        y1_scr[1:th + 1] = y1.reshape(th, w, cp).astype(jnp.bfloat16)

        # ---- cv1 recomputed on the two 1-row halos (zero at image edges) ---
        def halo_row(row_ref, is_edge):
            xr = row_ref[...].reshape(w, c1p)
            yr = _mish_f32(jnp.dot(xr, w1, preferred_element_type=jnp.float32)
                           + b1)                            # (w, cp) f32
            return jnp.where(is_edge, 0.0, yr).astype(jnp.bfloat16)

        y1_scr[0] = halo_row(xt_ref, r == 0)
        y1_scr[th + 1] = halo_row(xb_ref, r == last)

        # ---- cv2 (3x3 conv): build the two w-shifted copies once, then
        #      3 MXU matmuls with K = 3*cp (kw taps concatenated on channels).
        full = y1_scr[...]                                  # (th+2, w, cp) bf16
        zcol = jnp.zeros((th + 2, 1, cp), jnp.bfloat16)
        lft = jnp.concatenate([zcol, full[:, :w - 1, :]], axis=1)  # col j -> j-1
        rgt = jnp.concatenate([full[:, 1:, :], zcol], axis=1)      # col j -> j+1

        acc = jnp.zeros((th * w, c2p), jnp.float32)
        for kh in range(3):                                 # static, unrolled
            tap = jnp.concatenate(
                [lft[kh:kh + th], full[kh:kh + th], rgt[kh:kh + th]],
                axis=-1).reshape(th * w, 3 * cp)
            acc = acc + jnp.dot(tap, w2_ref[kh],
                                preferred_element_type=jnp.float32)

        # ---- epilogue: folded-BN shift + Mish + fused residual, bf16 store -
        y2 = _mish_f32(acc + b2_ref[...])
        if add:                                             # c1p == c2p here
            y2 = y2 + xm.astype(jnp.float32)
        o_ref[...] = y2.reshape(th, w, c2p).astype(o_ref.dtype)

    # ---- VMEM budget (explicit limit, review item) --------------------------
    bytes_blk = 2 * 2 * (th * w * c1p + 2 * w * c1p + th * w * c2p)  # bf16, dbl-buf
    bytes_wgt = 2 * (2 * (c1p * cp + 9 * cp * c2p) + 4 * (cp + c2p))
    bytes_scr = (th + 2) * w * cp * 2
    vmem_limit = int(min(max(2 * (bytes_blk + bytes_wgt + bytes_scr) + (4 << 20),
                             16 << 20), 48 << 20))
    # TODO(synk): for c >= 512 on v7x, single-buffer the resident weight specs
    # (pipeline_mode=pl.Buffered(1)) to reclaim VMEM for larger row tiles.

    flops = int(n * (2 * h * w * c1p * cp                 # cv1 main rows
                     + nr * 2 * (2 * w) * c1p * cp        # cv1 halo recompute
                     + 2 * h * w * (9 * cp) * c2p))       # cv2
    trans = int(n * (h * w * (cp + c2p) + nr * 2 * w * cp))
    bytes_accessed = int(2 * n * h * w * c1p              # x (bf16)
                         + 2 * n * nr * 2 * w * c1p       # halo-row re-reads
                         + 2 * (c1p * cp + 9 * cp * c2p) + 4 * (cp + c2p)
                         + 2 * n * h * w * c2p)           # out (bf16)
    cost = pl.CostEstimate(flops=flops, transcendentals=trans,
                           bytes_accessed=bytes_accessed)

    out = pl.pallas_call(
        kernel,
        out_shape=jax.ShapeDtypeStruct((n, h, w, c2p), jnp.bfloat16),
        grid=(n, nr),
        in_specs=[
            # main x rows of this tile (also used for the residual)
            pl.BlockSpec((None, th, w, c1p), lambda b, r: (b, r, 0, 0)),
            # 1-row top / bottom halos (clamped; zeroed in-kernel at edges)
            pl.BlockSpec((None, 1, w, c1p),
                         lambda b, r: (b, jnp.maximum(r * th - 1, 0), 0, 0)),
            pl.BlockSpec((None, 1, w, c1p),
                         lambda b, r: (b, jnp.minimum(r * th + th, h - 1), 0, 0)),
            # resident weights / shifts
            pl.BlockSpec((c1p, cp), lambda b, r: (0, 0)),
            pl.BlockSpec((1, cp), lambda b, r: (0, 0)),
            pl.BlockSpec((3, 3 * cp, c2p), lambda b, r: (0, 0, 0)),
            pl.BlockSpec((1, c2p), lambda b, r: (0, 0)),
        ],
        out_specs=pl.BlockSpec((None, th, w, c2p), lambda b, r: (b, r, 0, 0)),
        scratch_shapes=[pltpu.VMEM((th + 2, w, cp), jnp.bfloat16)],
        compiler_params=pltpu.CompilerParams(
            dimension_semantics=("parallel", "parallel"),
            vmem_limit_bytes=vmem_limit),
        cost_estimate=cost,
    )(x_p, x_p, x_p, w1_p, b1_p, w2_p, b2_p)
    return out


def bottleneck_forward(x_nchw, params, shortcut=True, max_rows_per_tile=None):
    """Spec-faithful wrapper: NCHW f32 in -> NCHW bf16 out (eval-mode BN)."""
    prep, dims = prepare_bottleneck_params(params)
    n, c1, h, w = x_nchw.shape
    assert c1 == dims["c1"]
    x_nhwc = jnp.transpose(x_nchw, (0, 2, 3, 1))
    x_p = jnp.pad(x_nhwc,
                  ((0, 0), (0, 0), (0, 0), (0, dims["c1p"] - c1))
                  ).astype(jnp.bfloat16)
    out = bottleneck_forward_nhwc(x_p, prep, dims, shortcut, max_rows_per_tile)
    out = out[..., :dims["c2"]]
    return jnp.transpose(out, (0, 3, 1, 2))                 # NHWC -> NCHW


# ----------------------------------------------------------------------------
# Synthetic parameters (deterministic) with eval-mode BatchNorm folded in
# ----------------------------------------------------------------------------
def _fold_bn(gamma, beta, mean, var, eps=1e-5):
    scale = gamma / jnp.sqrt(var + eps)
    return scale, beta - mean * scale


def init_bottleneck_params(key, c1, c2, e=0.5):
    c_ = int(c2 * e)
    specs = {"cv1": (1, c1, c_), "cv2": (3, c_, c2)}
    params = {}
    for name, (k, ci, co) in specs.items():
        key, kw_, kg, kb, km, kv = jax.random.split(key, 6)
        wgt = jax.random.normal(kw_, (k, k, ci, co), jnp.float32) / jnp.sqrt(k * k * ci)
        gamma = 0.5 + jax.random.uniform(kg, (co,), jnp.float32)
        beta = 0.1 * jax.random.normal(kb, (co,), jnp.float32)
        mean = 0.1 * jax.random.normal(km, (co,), jnp.float32)
        var = 0.5 + jax.random.uniform(kv, (co,), jnp.float32)
        scale, shift = _fold_bn(gamma, beta, mean, var)
        w_folded = wgt * scale                       # fold BN scale into weights
        if k == 1:
            params[name] = (w_folded[0, 0], shift)   # (ci, co)
        else:
            params[name] = (w_folded, shift)         # (3, 3, ci, co)
    return params


# ----------------------------------------------------------------------------
# Pure-JAX (XLA, f32) reference for correctness checks
# ----------------------------------------------------------------------------
def bottleneck_reference(x_nchw, params, shortcut=True):
    w1, b1 = params["cv1"]
    w2, b2 = params["cv2"]
    c1 = x_nchw.shape[1]
    c2 = w2.shape[3]
    x = jnp.transpose(x_nchw, (0, 2, 3, 1))
    y1 = jnp.einsum("nhwc,cd->nhwd", x, w1) + b1
    y1 = y1 * jnp.tanh(jax.nn.softplus(y1))
    y2 = lax.conv_general_dilated(
        y1, w2, window_strides=(1, 1), padding="SAME",
        dimension_numbers=("NHWC", "HWIO", "NHWC")) + b2
    y2 = y2 * jnp.tanh(jax.nn.softplus(y2))
    out = y2 + x if (shortcut and c1 == c2) else y2
    return jnp.transpose(out, (0, 3, 1, 2))


if __name__ == "__main__":
    key = jax.random.PRNGKey(0)
    k_x, k_p = jax.random.split(key)

    N, C1, C2, H, W = 2, 4, 4, 16, 16
    x = jax.random.normal(k_x, (N, C1, H, W), jnp.float32)
    params = init_bottleneck_params(k_p, C1, C2)

    ref = bottleneck_reference(x, params, shortcut=True)

    # 1) default tiling (single row tile at this size), shortcut=True
    fwd = jax.jit(lambda xx: bottleneck_forward(xx, params, shortcut=True))
    out = fwd(x)
    jax.block_until_ready(out)
    assert out.shape == (N, C2, H, W), out.shape
    d = jnp.abs(out.astype(jnp.float32) - ref)
    err, merr = float(jnp.max(d)), float(jnp.mean(d))
    assert err < 0.25 and merr < 0.03, (err, merr)

    # 2) forced multi-row-tile path (exercises the 1-row-halo recompute)
    fwd_t = jax.jit(lambda xx: bottleneck_forward(xx, params, shortcut=True,
                                                  max_rows_per_tile=4))
    out_t = fwd_t(x)
    jax.block_until_ready(out_t)
    d_t = jnp.abs(out_t.astype(jnp.float32) - ref)
    err_t, merr_t = float(jnp.max(d_t)), float(jnp.mean(d_t))
    assert err_t < 0.25 and merr_t < 0.03, (err_t, merr_t)

    # 3) shortcut=False variant (no residual operand / add at all)
    fwd_ns = jax.jit(lambda xx: bottleneck_forward(xx, params, shortcut=False))
    out_ns = fwd_ns(x)
    jax.block_until_ready(out_ns)
    ref_ns = bottleneck_reference(x, params, shortcut=False)
    d_ns = jnp.abs(out_ns.astype(jnp.float32) - ref_ns)
    err_ns = float(jnp.max(d_ns))
    assert err_ns < 0.25, err_ns

    # TODO(synk): add an interpret-mode f32-operand test with tight tolerance
    # for CI-level verification of the halo indexing.
    print("KERNEL_OK")
</pallas_src>

<mosaic_0001>
module attributes {stable_mosaic.version = 11 : i64} {
  func.func @kernel(%arg0: i32, %arg1: i32, %arg2: memref<1x16x16x128xbf16, #tpu.memory_space<vmem>>, %arg3: memref<1x1x16x128xbf16, #tpu.memory_space<vmem>>, %arg4: memref<1x1x16x128xbf16, #tpu.memory_space<vmem>>, %arg5: memref<128x128xbf16, #tpu.memory_space<vmem>>, %arg6: memref<1x128xf32, #tpu.memory_space<vmem>>, %arg7: memref<3x384x128xbf16, #tpu.memory_space<vmem>>, %arg8: memref<1x128xf32, #tpu.memory_space<vmem>>, %arg9: memref<1x16x16x128xbf16, #tpu.memory_space<vmem>>, %arg10: memref<18x16x128xbf16, #tpu.memory_space<vmem>>) attributes {dimension_semantics = [#tpu.dimension_semantics<parallel>, #tpu.dimension_semantics<parallel>], iteration_bounds = array<i64: 2, 1>, scalar_prefetch = 0 : i64, scratch_operands = 1 : i64, tpu.core_type = #tpu.core_type<tc>, window_params = [{transform_indices = @transform_0, window_bounds = array<i64: 1, 16, 16, 128>}, {transform_indices = @transform_1, window_bounds = array<i64: 1, 1, 16, 128>}, {transform_indices = @transform_2, window_bounds = array<i64: 1, 1, 16, 128>}, {pipeline_mode = #tpu.pipeline_mode<synchronous>, transform_indices = @transform_3, window_bounds = array<i64: 128, 128>}, {pipeline_mode = #tpu.pipeline_mode<synchronous>, transform_indices = @transform_4, window_bounds = array<i64: 1, 128>}, {pipeline_mode = #tpu.pipeline_mode<synchronous>, transform_indices = @transform_5, window_bounds = array<i64: 3, 384, 128>}, {pipeline_mode = #tpu.pipeline_mode<synchronous>, transform_indices = @transform_6, window_bounds = array<i64: 1, 128>}, {transform_indices = @transform_7, window_bounds = array<i64: 1, 16, 16, 128>}]} {
    %c0 = arith.constant 0 : index
    %c0_0 = arith.constant 0 : index
    %0 = vector.load %arg5[%c0, %c0_0] : memref<128x128xbf16, #tpu.memory_space<vmem>>, vector<128x128xbf16>
    %c0_1 = arith.constant 0 : index
    %c0_2 = arith.constant 0 : index
    %1 = vector.load %arg6[%c0_1, %c0_2] : memref<1x128xf32, #tpu.memory_space<vmem>>, vector<1x128xf32>
    %c0_3 = arith.constant 0 : index
    %c0_4 = arith.constant 0 : index
    %c0_5 = arith.constant 0 : index
    %c0_6 = arith.constant 0 : index
    %2 = vector.load %arg2[%c0_3, %c0_4, %c0_5, %c0_6] : memref<1x16x16x128xbf16, #tpu.memory_space<vmem>>, vector<1x16x16x128xbf16>
    %3 = vector.shape_cast %2 : vector<1x16x16x128xbf16> to vector<16x16x128xbf16>
    %4 = vector.shape_cast %3 : vector<16x16x128xbf16> to vector<256x128xbf16>
    %cst = arith.constant dense<0.000000e+00> : vector<256x128xf32>
    %5 = tpu.matmul %4, %0, %cst {dimension_numbers = #tpu.dot_dimension_numbers<[1], [0], [0], [1], [0, 0, 1, 1], [], []>} : vector<256x128xbf16>, vector<128x128xbf16>, vector<256x128xf32> -> vector<256x128xf32>
    %6 = vector.broadcast %1 : vector<1x128xf32> to vector<256x128xf32>
    %7 = arith.addf %5, %6 : vector<256x128xf32>
    %cst_7 = arith.constant 2.000000e+01 : f32
    %8 = vector.broadcast %cst_7 : f32 to vector<256x128xf32>
    %9 = arith.minimumf %7, %8 : vector<256x128xf32>
    %10 = math.exp %9 : vector<256x128xf32>
    %cst_8 = arith.constant 2.000000e+00 : f32
    %11 = vector.broadcast %cst_8 : f32 to vector<256x128xf32>
    %12 = arith.addf %10, %11 : vector<256x128xf32>
    %13 = arith.mulf %10, %12 : vector<256x128xf32>
    %14 = arith.mulf %7, %13 : vector<256x128xf32>
    %cst_9 = arith.constant 2.000000e+00 : f32
    %15 = vector.broadcast %cst_9 : f32 to vector<256x128xf32>
    %16 = arith.addf %13, %15 : vector<256x128xf32>
    %17 = tpu.reciprocal %16 {approx = true} : vector<256x128xf32> -> vector<256x128xf32>
    %18 = arith.mulf %14, %17 : vector<256x128xf32>
    %19 = vector.shape_cast %18 : vector<256x128xf32> to vector<16x16x128xf32>
    %20 = arith.truncf %19 : vector<16x16x128xf32> to vector<16x16x128xbf16>
    %c1 = arith.constant 1 : index
    %c0_10 = arith.constant 0 : index
    %c0_11 = arith.constant 0 : index
    %21 = vector.load %arg10[%c1, %c0_10, %c0_11] : memref<18x16x128xbf16, #tpu.memory_space<vmem>>, vector<16x16x128xbf16>
    tpu.vector_store %arg10[%c1, %c0_10, %c0_11], %20 {strides = array<i32>} : memref<18x16x128xbf16, #tpu.memory_space<vmem>>, vector<16x16x128xbf16>,
    %c0_i32 = arith.constant 0 : i32
    %22 = arith.cmpi eq, %arg1, %c0_i32 : i32
    %c0_12 = arith.constant 0 : index
    %c0_13 = arith.constant 0 : index
    %c0_14 = arith.constant 0 : index
    %c0_15 = arith.constant 0 : index
    %23 = vector.load %arg3[%c0_12, %c0_13, %c0_14, %c0_15] : memref<1x1x16x128xbf16, #tpu.memory_space<vmem>>, vector<1x1x16x128xbf16>
    %24 = vector.shape_cast %23 : vector<1x1x16x128xbf16> to vector<1x16x128xbf16>
    %25 = vector.shape_cast %24 : vector<1x16x128xbf16> to vector<16x128xbf16>
    %cst_16 = arith.constant dense<0.000000e+00> : vector<16x128xf32>
    %26 = tpu.matmul %25, %0, %cst_16 {dimension_numbers = #tpu.dot_dimension_numbers<[1], [0], [0], [1], [0, 0, 1, 1], [], []>} : vector<16x128xbf16>, vector<128x128xbf16>, vector<16x128xf32> -> vector<16x128xf32>
    %27 = vector.broadcast %1 : vector<1x128xf32> to vector<16x128xf32>
    %28 = arith.addf %26, %27 : vector<16x128xf32>
    %cst_17 = arith.constant 2.000000e+01 : f32
    %29 = vector.broadcast %cst_17 : f32 to vector<16x128xf32>
    %30 = arith.minimumf %28, %29 : vector<16x128xf32>
    %31 = math.exp %30 : vector<16x128xf32>
    %cst_18 = arith.constant 2.000000e+00 : f32
    %32 = vector.broadcast %cst_18 : f32 to vector<16x128xf32>
    %33 = arith.addf %31, %32 : vector<16x128xf32>
    %34 = arith.mulf %31, %33 : vector<16x128xf32>
    %35 = arith.mulf %28, %34 : vector<16x128xf32>
    %cst_19 = arith.constant 2.000000e+00 : f32
    %36 = vector.broadcast %cst_19 : f32 to vector<16x128xf32>
    %37 = arith.addf %34, %36 : vector<16x128xf32>
    %38 = tpu.reciprocal %37 {approx = true} : vector<16x128xf32> -> vector<16x128xf32>
    %39 = arith.mulf %35, %38 : vector<16x128xf32>
    %cst_20 = arith.constant 0.000000e+00 : f32
    %40 = vector.broadcast %cst_20 : f32 to vector<16x128xf32>
    %41 = arith.select %22, %40, %39 : vector<16x128xf32>
    %42 = arith.truncf %41 : vector<16x128xf32> to vector<16x128xbf16>
    %c0_21 = arith.constant 0 : index
    %c0_22 = arith.constant 0 : index
    %c0_23 = arith.constant 0 : index
    %43 = vector.load %arg10[%c0_21, %c0_22, %c0_23] : memref<18x16x128xbf16, #tpu.memory_space<vmem>>, vector<1x16x128xbf16>
    %44 = vector.shape_cast %43 : vector<1x16x128xbf16> to vector<16x128xbf16>
    %45 = vector.shape_cast %42 : vector<16x128xbf16> to vector<1x16x128xbf16>
    tpu.vector_store %arg10[%c0_21, %c0_22, %c0_23], %45 {strides = array<i32>} : memref<18x16x128xbf16, #tpu.memory_space<vmem>>, vector<1x16x128xbf16>,
    %c0_i32_24 = arith.constant 0 : i32
    %46 = arith.cmpi eq, %arg1, %c0_i32_24 : i32
    %c0_25 = arith.constant 0 : index
    %c0_26 = arith.constant 0 : index
    %c0_27 = arith.constant 0 : index
    %c0_28 = arith.constant 0 : index
    %47 = vector.load %arg4[%c0_25, %c0_26, %c0_27, %c0_28] : memref<1x1x16x128xbf16, #tpu.memory_space<vmem>>, vector<1x1x16x128xbf16>
    %48 = vector.shape_cast %47 : vector<1x1x16x128xbf16> to vector<1x16x128xbf16>
    %49 = vector.shape_cast %48 : vector<1x16x128xbf16> to vector<16x128xbf16>
    %cst_29 = arith.constant dense<0.000000e+00> : vector<16x128xf32>
    %50 = tpu.matmul %49, %0, %cst_29 {dimension_numbers = #tpu.dot_dimension_numbers<[1], [0], [0], [1], [0, 0, 1, 1], [], []>} : vector<16x128xbf16>, vector<128x128xbf16>, vector<16x128xf32> -> vector<16x128xf32>
    %51 = vector.broadcast %1 : vector<1x128xf32> to vector<16x128xf32>
    %52 = arith.addf %50, %51 : vector<16x128xf32>
    %cst_30 = arith.constant 2.000000e+01 : f32
    %53 = vector.broadcast %cst_30 : f32 to vector<16x128xf32>
    %54 = arith.minimumf %52, %53 : vector<16x128xf32>
    %55 = math.exp %54 : vector<16x128xf32>
    %cst_31 = arith.constant 2.000000e+00 : f32
    %56 = vector.broadcast %cst_31 : f32 to vector<16x128xf32>
    %57 = arith.addf %55, %56 : vector<16x128xf32>
    %58 = arith.mulf %55, %57 : vector<16x128xf32>
    %59 = arith.mulf %52, %58 : vector<16x128xf32>
    %cst_32 = arith.constant 2.000000e+00 : f32
    %60 = vector.broadcast %cst_32 : f32 to vector<16x128xf32>
    %61 = arith.addf %58, %60 : vector<16x128xf32>
    %62 = tpu.reciprocal %61 {approx = true} : vector<16x128xf32> -> vector<16x128xf32>
    %63 = arith.mulf %59, %62 : vector<16x128xf32>
    %cst_33 = arith.constant 0.000000e+00 : f32
    %64 = vector.broadcast %cst_33 : f32 to vector<16x128xf32>
    %65 = arith.select %46, %64, %63 : vector<16x128xf32>
    %66 = arith.truncf %65 : vector<16x128xf32> to vector<16x128xbf16>
    %c17 = arith.constant 17 : index
    %c0_34 = arith.constant 0 : index
    %c0_35 = arith.constant 0 : index
    %67 = vector.load %arg10[%c17, %c0_34, %c0_35] : memref<18x16x128xbf16, #tpu.memory_space<vmem>>, vector<1x16x128xbf16>
    %68 = vector.shape_cast %67 : vector<1x16x128xbf16> to vector<16x128xbf16>
    %69 = vector.shape_cast %66 : vector<16x128xbf16> to vector<1x16x128xbf16>
    tpu.vector_store %arg10[%c17, %c0_34, %c0_35], %69 {strides = array<i32>} : memref<18x16x128xbf16, #tpu.memory_space<vmem>>, vector<1x16x128xbf16>,
    %c0_36 = arith.constant 0 : index
    %c0_37 = arith.constant 0 : index
    %c0_38 = arith.constant 0 : index
    %70 = vector.load %arg10[%c0_36, %c0_37, %c0_38] : memref<18x16x128xbf16, #tpu.memory_space<vmem>>, vector<18x16x128xbf16>
    %cst_39 = arith.constant 0.000000e+00 : bf16
    %71 = vector.broadcast %cst_39 : bf16 to vector<18x1x128xbf16>
    %72 = vector.extract_strided_slice %70 {offsets = [0, 0, 0], sizes = [18, 15, 128], strides = [1, 1, 1]} : vector<18x16x128xbf16> to vector<18x15x128xbf16>
    %73 = tpu.concatenate %71, %72 in 1 : vector<18x1x128xbf16>, vector<18x15x128xbf16> -> vector<18x16x128xbf16>
    %74 = vector.extract_strided_slice %70 {offsets = [0, 1, 0], sizes = [18, 15, 128], strides = [1, 1, 1]} : vector<18x16x128xbf16> to vector<18x15x128xbf16>
    %75 = tpu.concatenate %74, %71 in 1 : vector<18x15x128xbf16>, vector<18x1x128xbf16> -> vector<18x16x128xbf16>
    %cst_40 = arith.constant 0.000000e+00 : f32
    %76 = vector.broadcast %cst_40 : f32 to vector<256x128xf32>
    %77 = vector.extract_strided_slice %73 {offsets = [0, 0, 0], sizes = [16, 16, 128], strides = [1, 1, 1]} : vector<18x16x128xbf16> to vector<16x16x128xbf16>
    %78 = vector.extract_strided_slice %70 {offsets = [0, 0, 0], sizes = [16, 16, 128], strides = [1, 1, 1]} : vector<18x16x128xbf16> to vector<16x16x128xbf16>
    %79 = vector.extract_strided_slice %75 {offsets = [0, 0, 0], sizes = [16, 16, 128], strides = [1, 1, 1]} : vector<18x16x128xbf16> to vector<16x16x128xbf16>
    %80 = tpu.concatenate %77, %78, %79 in 2 : vector<16x16x128xbf16>, vector<16x16x128xbf16>, vector<16x16x128xbf16> -> vector<16x16x384xbf16>
    %81 = vector.shape_cast %80 : vector<16x16x384xbf16> to vector<256x384xbf16>
    %c0_41 = arith.constant 0 : index
    %c0_42 = arith.constant 0 : index
    %c0_43 = arith.constant 0 : index
    %82 = vector.load %arg7[%c0_41, %c0_42, %c0_43] : memref<3x384x128xbf16, #tpu.memory_space<vmem>>, vector<1x384x128xbf16>
    %83 = vector.shape_cast %82 : vector<1x384x128xbf16> to vector<384x128xbf16>
    %cst_44 = arith.constant dense<0.000000e+00> : vector<256x128xf32>
    %84 = tpu.matmul %81, %83, %cst_44 {dimension_numbers = #tpu.dot_dimension_numbers<[1], [0], [0], [1], [0, 0, 1, 1], [], []>} : vector<256x384xbf16>, vector<384x128xbf16>, vector<256x128xf32> -> vector<256x128xf32>
    %85 = arith.addf %76, %84 : vector<256x128xf32>
    %86 = vector.extract_strided_slice %73 {offsets = [1, 0, 0], sizes = [16, 16, 128], strides = [1, 1, 1]} : vector<18x16x128xbf16> to vector<16x16x128xbf16>
    %87 = vector.extract_strided_slice %70 {offsets = [1, 0, 0], sizes = [16, 16, 128], strides = [1, 1, 1]} : vector<18x16x128xbf16> to vector<16x16x128xbf16>
    %88 = vector.extract_strided_slice %75 {offsets = [1, 0, 0], sizes = [16, 16, 128], strides = [1, 1, 1]} : vector<18x16x128xbf16> to vector<16x16x128xbf16>
    %89 = tpu.concatenate %86, %87, %88 in 2 : vector<16x16x128xbf16>, vector<16x16x128xbf16>, vector<16x16x128xbf16> -> vector<16x16x384xbf16>
    %90 = vector.shape_cast %89 : vector<16x16x384xbf16> to vector<256x384xbf16>
    %c1_45 = arith.constant 1 : index
    %c0_46 = arith.constant 0 : index
    %c0_47 = arith.constant 0 : index
    %91 = vector.load %arg7[%c1_45, %c0_46, %c0_47] : memref<3x384x128xbf16, #tpu.memory_space<vmem>>, vector<1x384x128xbf16>
    %92 = vector.shape_cast %91 : vector<1x384x128xbf16> to vector<384x128xbf16>
    %cst_48 = arith.constant dense<0.000000e+00> : vector<256x128xf32>
    %93 = tpu.matmul %90, %92, %cst_48 {dimension_numbers = #tpu.dot_dimension_numbers<[1], [0], [0], [1], [0, 0, 1, 1], [], []>} : vector<256x384xbf16>, vector<384x128xbf16>, vector<256x128xf32> -> vector<256x128xf32>
    %94 = arith.addf %85, %93 : vector<256x128xf32>
    %95 = vector.extract_strided_slice %73 {offsets = [2, 0, 0], sizes = [16, 16, 128], strides = [1, 1, 1]} : vector<18x16x128xbf16> to vector<16x16x128xbf16>
    %96 = vector.extract_strided_slice %70 {offsets = [2, 0, 0], sizes = [16, 16, 128], strides = [1, 1, 1]} : vector<18x16x128xbf16> to vector<16x16x128xbf16>
    %97 = vector.extract_strided_slice %75 {offsets = [2, 0, 0], sizes = [16, 16, 128], strides = [1, 1, 1]} : vector<18x16x128xbf16> to vector<16x16x128xbf16>
    %98 = tpu.concatenate %95, %96, %97 in 2 : vector<16x16x128xbf16>, vector<16x16x128xbf16>, vector<16x16x128xbf16> -> vector<16x16x384xbf16>
    %99 = vector.shape_cast %98 : vector<16x16x384xbf16> to vector<256x384xbf16>
    %c2 = arith.constant 2 : index
    %c0_49 = arith.constant 0 : index
    %c0_50 = arith.constant 0 : index
    %100 = vector.load %arg7[%c2, %c0_49, %c0_50] : memref<3x384x128xbf16, #tpu.memory_space<vmem>>, vector<1x384x128xbf16>
    %101 = vector.shape_cast %100 : vector<1x384x128xbf16> to vector<384x128xbf16>
    %cst_51 = arith.constant dense<0.000000e+00> : vector<256x128xf32>
    %102 = tpu.matmul %99, %101, %cst_51 {dimension_numbers = #tpu.dot_dimension_numbers<[1], [0], [0], [1], [0, 0, 1, 1], [], []>} : vector<256x384xbf16>, vector<384x128xbf16>, vector<256x128xf32> -> vector<256x128xf32>
    %103 = arith.addf %94, %102 : vector<256x128xf32>
    %c0_52 = arith.constant 0 : index
    %c0_53 = arith.constant 0 : index
    %104 = vector.load %arg8[%c0_52, %c0_53] : memref<1x128xf32, #tpu.memory_space<vmem>>, vector<1x128xf32>
    %105 = vector.broadcast %104 : vector<1x128xf32> to vector<256x128xf32>
    %106 = arith.addf %103, %105 : vector<256x128xf32>
    %cst_54 = arith.constant 2.000000e+01 : f32
    %107 = vector.broadcast %cst_54 : f32 to vector<256x128xf32>
    %108 = arith.minimumf %106, %107 : vector<256x128xf32>
    %109 = math.exp %108 : vector<256x128xf32>
    %cst_55 = arith.constant 2.000000e+00 : f32
    %110 = vector.broadcast %cst_55 : f32 to vector<256x128xf32>
    %111 = arith.addf %109, %110 : vector<256x128xf32>
    %112 = arith.mulf %109, %111 : vector<256x128xf32>
    %113 = arith.mulf %106, %112 : vector<256x128xf32>
    %cst_56 = arith.constant 2.000000e+00 : f32
    %114 = vector.broadcast %cst_56 : f32 to vector<256x128xf32>
    %115 = arith.addf %112, %114 : vector<256x128xf32>
    %116 = tpu.reciprocal %115 {approx = true} : vector<256x128xf32> -> vector<256x128xf32>
    %117 = arith.mulf %113, %116 : vector<256x128xf32>
    %118 = arith.extf %4 : vector<256x128xbf16> to vector<256x128xf32>
    %119 = arith.addf %117, %118 : vector<256x128xf32>
    %120 = vector.shape_cast %119 : vector<256x128xf32> to vector<16x16x128xf32>
    %121 = arith.truncf %120 : vector<16x16x128xf32> to vector<16x16x128xbf16>
    %c0_57 = arith.constant 0 : index
    %c0_58 = arith.constant 0 : index
    %c0_59 = arith.constant 0 : index
    %c0_60 = arith.constant 0 : index
    %122 = vector.load %arg9[%c0_57, %c0_58, %c0_59, %c0_60] : memref<1x16x16x128xbf16, #tpu.memory_space<vmem>>, vector<1x16x16x128xbf16>
    %123 = vector.shape_cast %122 : vector<1x16x16x128xbf16> to vector<16x16x128xbf16>
    %124 = vector.shape_cast %121 : vector<16x16x128xbf16> to vector<1x16x16x128xbf16>
    tpu.vector_store %arg9[%c0_57, %c0_58, %c0_59, %c0_60], %124 {strides = array<i32>} : memref<1x16x16x128xbf16, #tpu.memory_space<vmem>>, vector<1x16x16x128xbf16>,
    return
  }
  func.func @transform_0(%arg0: i32, %arg1: i32) -> (i32, i32, i32, i32) {
    %c0_i32 = arith.constant 0 : i32
    %c0_i32_0 = arith.constant 0 : i32
    %c0_i32_1 = arith.constant 0 : i32
    return %arg0, %arg1, %c0_i32, %c0_i32_0 : i32, i32, i32, i32
  }
  func.func @transform_1(%arg0: i32, %arg1: i32) -> (i32, i32, i32, i32) {
    %c16_i32 = arith.constant 16 : i32
    %0 = arith.muli %arg1, %c16_i32 : i32
    %c1_i32 = arith.constant 1 : i32
    %1 = arith.subi %0, %c1_i32 : i32
    %c0_i32 = arith.constant 0 : i32
    %2 = arith.maxsi %1, %c0_i32 : i32
    %c0_i32_0 = arith.constant 0 : i32
    %c0_i32_1 = arith.constant 0 : i32
    %c0_i32_2 = arith.constant 0 : i32
    return %arg0, %2, %c0_i32_0, %c0_i32_1 : i32, i32, i32, i32
  }
  func.func @transform_2(%arg0: i32, %arg1: i32) -> (i32, i32, i32, i32) {
    %c16_i32 = arith.constant 16 : i32
    %0 = arith.muli %arg1, %c16_i32 : i32
    %c16_i32_0 = arith.constant 16 : i32
    %1 = arith.addi %0, %c16_i32_0 : i32
    %c15_i32 = arith.constant 15 : i32
    %2 = arith.minsi %1, %c15_i32 : i32
    %c0_i32 = arith.constant 0 : i32
    %c0_i32_1 = arith.constant 0 : i32
    %c0_i32_2 = arith.constant 0 : i32
    return %arg0, %2, %c0_i32, %c0_i32_1 : i32, i32, i32, i32
  }
  func.func @transform_3(%arg0: i32, %arg1: i32) -> (i32, i32) {
    %c0_i32 = arith.constant 0 : i32
    %c0_i32_0 = arith.constant 0 : i32
    %c0_i32_1 = arith.constant 0 : i32
    return %c0_i32, %c0_i32_0 : i32, i32
  }
  func.func @transform_4(%arg0: i32, %arg1: i32) -> (i32, i32) {
    %c0_i32 = arith.constant 0 : i32
    %c0_i32_0 = arith.constant 0 : i32
    %c0_i32_1 = arith.constant 0 : i32
    return %c0_i32, %c0_i32_0 : i32, i32
  }
  func.func @transform_5(%arg0: i32, %arg1: i32) -> (i32, i32, i32) {
    %c0_i32 = arith.constant 0 : i32
    %c0_i32_0 = arith.constant 0 : i32
    %c0_i32_1 = arith.constant 0 : i32
    %c0_i32_2 = arith.constant 0 : i32
    return %c0_i32, %c0_i32_0, %c0_i32_1 : i32, i32, i32
  }
  func.func @transform_6(%arg0: i32, %arg1: i32) -> (i32, i32) {
    %c0_i32 = arith.constant 0 : i32
    %c0_i32_0 = arith.constant 0 : i32
    %c0_i32_1 = arith.constant 0 : i32
    return %c0_i32, %c0_i32_0 : i32, i32
  }
  func.func @transform_7(%arg0: i32, %arg1: i32) -> (i32, i32, i32, i32) {
    %c0_i32 = arith.constant 0 : i32
    %c0_i32_0 = arith.constant 0 : i32
    %c0_i32_1 = arith.constant 0 : i32
    return %arg0, %arg1, %c0_i32, %c0_i32_0 : i32, i32, i32, i32
  }
}

</mosaic_0001>

<bundles_post_ra>
// kernel: _lambda_.1
= control target key start
LH: loop header
LB: loop body
LE: loop exit
PB: predicated region body
PF: predicated region fallthrough
CT: control target
= control target key end

     0   :  { %s4839_s24 = smov 0   ;;  %s4841_s25 = smov 0   ;;  %s6521_s0 = inlined_call_operand.vmem [shape: bf16[2,16,16,128], index: 0, kind: input, shape index: {}, may-alias: {0,1,2}]   ;;  %s6522_s1 = inlined_call_operand.vmem [shape: bf16[2,16,16,128], index: 1, kind: input, shape index: {}, may-alias: {0,1,2}]   ;;  %s6523_s2 = inlined_call_operand.vmem [shape: bf16[2,16,16,128], index: 2, kind: input, shape index: {}, may-alias: {0,1,2}]   ;;  %s6524_s3 = inlined_call_operand.vmem [shape: bf16[128,128], index: 3, kind: input, shape index: {}]   ;;  %s6525_s4 = inlined_call_operand.vmem [shape: f32[1,128], index: 4, kind: input, shape index: {}]   ;;  %s6526_s5 = inlined_call_operand.vmem [shape: bf16[3,384,128], index: 5, kind: input, shape index: {}]   ;;  %s6527_s6 = inlined_call_operand.vmem [shape: f32[1,128], index: 6, kind: input, shape index: {}]   ;;  %s6528_s7 = inlined_call_operand.vmem [shape: bf16[2,16,16,128], index: 7, kind: output, shape index: {}]  }
   0x1   :  { %s4843_s26 = smov 0  }
   0x2 LB: > { %s29_s27 = sadd.s32 1, %s4792_s25  ;;  %p3572_p0 = scmp.ge.s32.totalorder %s4796_s26, 1  ;;  %s4796_s26 = sphi %s4843_s26, %s17_s26   ;;  %s4792_s25 = sphi %s4841_s25, %s6696_s25   ;;  %s4788_s24 = sphi %s4839_s24, %s6695_s24  }
   0x3   : > { %p31_p1 = scmp.ge.s32.totalorder %s29_s27, 2  ;;  %p323_p2 = scmp.lt.s32.totalorder %s4796_s26, 3 }
   0x5   : > { %s6698_s27 = smov (%p31_p1, %s29_s27), 0  ;;  %p324_p3 = pnand %p3572_p0, %p323_p2 }
   0x7   : > { %327 = sbr.rel (%p324_p3) target bundleno = 1152 (0x480), region = 48 }
   0xc   : > { %v4155_v0 = vld [vmem:[%s6524_s3 + $0x38] sm:$0xff]  ;;  %v4154_v1 = vld [vmem:[%s6524_s3 + $0x30] sm:$0xff]  ;;  %v4153_v2 = vld [vmem:[%s6524_s3 + $0x28] sm:$0xff]  ;;  %p392_p4 = scmp.lt.s32.totalorder %s4788_s24, 1  ;;  %v4798_v29 = vmov 0.0|0.0   ;;  %vm1453_vm0 = vcmask 1040384  }
   0xd   : > { %644 = vmatpush.bf16.msra.mxu0 %v4155_v0  ;;  %4465 = vmatpush.bf16.msra.mxu1 %v4155_v0  ;;  %v4152_v3 = vld [vmem:[%s6524_s3 + $0x20] sm:$0xff]  ;;  %v4151_v4 = vld [vmem:[%s6524_s3 + $0x18] sm:$0xff]  ;;  %v4150_v5 = vld [vmem:[%s6524_s3 + $0x10] sm:$0xff]  ;;  %v4345_v30 = vunpack.c.l.bf16 %v4798_v29  ;;  %vm1454_vm1 = vsmask.f32 256  ;;  %vm1528_vm3 = vcmask 1047552  }
   0xe   : > { %1144 = vmatpush.bf16.msra.mxu2 %v4155_v0  ;;  %s6700_s24 = smov (!%p392_p4, %s4788_s24), 1  ;;  %v4149_v6 = vld [vmem:[%s6524_s3 + $0x8] sm:$0xff]  ;;  %v4148_v7 = vld [vmem:[%s6524_s3] sm:$0xff]  ;;  %v4199_v21 = vld [vmem:[%s6526_s5 + $0x38] sm:$0xff]  ;;  %vm1529_vm4 = vsmask.f32 7424 }
   0xf   : > { %s4882_s19 = sshll.u32 %s6700_s24, 7  ;;  %v4198_v22 = vld [vmem:[%s6526_s5 + $0x30] sm:$0xff]  ;;  %v4197_v24 = vld [vmem:[%s6526_s5 + $0x28] sm:$0xff]  ;;  %v4231_v26 = vld [vmem:[%s6526_s5 + $0x138] sm:$0xff]  ;;  %v4347_v31 = vpack.c.bf16 %v4345_v30, %v4345_v30 }
  0x10   : > { %s4891_s28 = scalar_lea.vmem %s6521_s0, %s4882_s19  ;;  %v4196_v27 = vld [vmem:[%s6526_s5 + $0x20] sm:$0xff]  ;;  %v4230_v28 = vld [vmem:[%s6526_s5 + $0x130] sm:$0xff]  ;;  %v4223_v32 = vld [vmem:[%s6526_s5 + $0xf8] sm:$0xff]  ;;  %s414_s13 = scalar_lea.vmem %s6522_s1, %s4882_s19 }
  0x11   : > { %645 = vmatpush.bf16.msra.mxu0 %v4154_v1  ;;  %4466 = vmatpush.bf16.msra.mxu1 %v4154_v1  ;;  %v4156_v8 = vld [vmem:[%s4891_s28] sm:$0xff]  ;;  %v4165_v9 = vld [vmem:[%s4891_s28 + $0x48] sm:$0xff]  ;;  %v4166_v11 = vld [vmem:[%s4891_s28 + $0x50] sm:$0xff]  ;;  %4348 = vst [vmem:[#allocation2 + $0x70] sm:$0xff] %v4347_v31   ;;  %s4146_s23 = sadd.s32 120, %s4882_s19  ;;  %s6194_s21 = scalar_lea.vmem %s6528_s7, %s4882_s19 }
  0x12   : > { %1145 = vmatpush.bf16.msra.mxu2 %v4154_v1  ;;  %v4157_v10 = vld [vmem:[%s4891_s28 + $0x8] sm:$0xff]  ;;  %v4158_v12 = vld [vmem:[%s4891_s28 + $0x10] sm:$0xff]  ;;  %v4167_v13 = vld [vmem:[%s4891_s28 + $0x58] sm:$0xff]  ;;  %4353 = vst [vmem:[#allocation2 + $0x68] sm:$0xff] %v4347_v31   ;;  %4473 = vmatpush.bf16.msra.mxu3 %v4223_v32  ;;  %s431_s11 = scalar_lea.vmem %s6523_s2, %s4146_s23 }
  0x13   : > { %v4159_v14 = vld [vmem:[%s4891_s28 + $0x18] sm:$0xff]  ;;  %v4168_v15 = vld [vmem:[%s4891_s28 + $0x60] sm:$0xff]  ;;  %v4169_v17 = vld [vmem:[%s4891_s28 + $0x68] sm:$0xff] }
  0x14   : > { %v4160_v16 = vld [vmem:[%s4891_s28 + $0x20] sm:$0xff]  ;;  %v4161_v18 = vld [vmem:[%s4891_s28 + $0x28] sm:$0xff]  ;;  %v4170_v19 = vld [vmem:[%s4891_s28 + $0x70] sm:$0xff] }
  0x15   : > { %646 = vmatpush.bf16.msra.mxu0 %v4153_v2  ;;  %4467 = vmatpush.bf16.msra.mxu1 %v4153_v2  ;;  %v4162_v20 = vld [vmem:[%s4891_s28 + $0x30] sm:$0xff]  ;;  %v4171_v23 = vld [vmem:[%s4891_s28 + $0x78] sm:$0xff]  ;;  %v4229_v34 = vld [vmem:[%s6526_s5 + $0x128] sm:$0xff] }
  0x16   : > { %1146 = vmatpush.bf16.msra.mxu2 %v4153_v2  ;;  %v4163_v25 = vld [vmem:[%s4891_s28 + $0x38] sm:$0xff]  ;;  %v4222_v35 = vld [vmem:[%s6526_s5 + $0xf0] sm:$0xff]  ;;  %v4228_v37 = vld [vmem:[%s6526_s5 + $0x120] sm:$0xff] }
  0x17   : > { %v4195_v33 = vld [vmem:[%s6526_s5 + $0x18] sm:$0xff]  ;;  %v4194_v36 = vld [vmem:[%s6526_s5 + $0x10] sm:$0xff]  ;;  %v4951_v38 = vld [vmem:[%s6525_s4] ss:$0 sm:$0xff]  ;;  %4474 = vmatpush.bf16.msra.mxu3 %v4222_v35 }
  0x18   : > { %v4172_v39 = vld [vmem:[%s414_s13] sm:$0xff]  ;;  %v4221_v40 = vld [vmem:[%s6526_s5 + $0xe8] sm:$0xff]  ;;  %v4227_v43 = vld [vmem:[%s6526_s5 + $0x118] sm:$0xff] }
  0x19   : > { %647 = vmatpush.bf16.msra.mxu0 %v4152_v3  ;;  %4468 = vmatpush.bf16.msra.mxu1 %v4152_v3  ;;  %v4193_v41 = vld [vmem:[%s6526_s5 + $0x8] sm:$0xff]  ;;  %v4164_v42 = vld [vmem:[%s4891_s28 + $0x40] sm:$0xff]  ;;  %v4964_v45 = vld [vmem:[#allocation2 + $0x70] sm:$0xff] }
  0x1a   : > { %1147 = vmatpush.bf16.msra.mxu2 %v4152_v3  ;;  %v4220_v47 = vld [vmem:[%s6526_s5 + $0xe0] sm:$0xff]  ;;  %v4226_v50 = vld [vmem:[%s6526_s5 + $0x110] sm:$0xff]  ;;  %v6529_v51 = vshrl.u32 %v4964_v45, 16  ;;  %v4219_v54 = vld [vmem:[%s6526_s5 + $0xd8] sm:$0xff]  ;;  %v6530_v58 = vshll.u32 %v4964_v45, 16 }
  0x1b   : > { %v4192_v48 = vld [vmem:[%s6526_s5] sm:$0xff]  ;;  %4475 = vmatpush.bf16.msra.mxu3 %v4221_v40  ;;  %v4225_v55 = vld [vmem:[%s6526_s5 + $0x108] sm:$0xff]  ;;  %v4218_v60 = vld [vmem:[%s6526_s5 + $0xd0] sm:$0xff] }
  0x1c   : > { %v4173_v53 = vld [vmem:[%s431_s11] sm:$0xff]  ;;  %v1312_v57 = vrot.slane %v6529_v51, 7  ;;  %vm5001_vm2 = vmand %vm1453_vm0, %vm1454_vm1 }
  0x1d   : > { %648 = vmatpush.bf16.msra.mxu0 %v4151_v4  ;;  %4469 = vmatpush.bf16.msra.mxu1 %v4151_v4  ;;  %v4224_v62 = vld [vmem:[%s6526_s5 + $0x100] sm:$0xff]  ;;  %vm5337_vm5 = vmand %vm1528_vm3, %vm1529_vm4 }
  0x1e   : > { %1148 = vmatpush.bf16.msra.mxu2 %v4151_v4  ;;  %v1315_v63 = vor.u32 %v6530_v58, %v1312_v57 }
  0x1f   : > { %4476 = vmatpush.bf16.msra.mxu3 %v4220_v47 }
  0x21   : > { %649 = vmatpush.bf16.msra.mxu0 %v4150_v5  ;;  %4470 = vmatpush.bf16.msra.mxu1 %v4150_v5 }
  0x22   : > { %1149 = vmatpush.bf16.msra.mxu2 %v4150_v5 }
  0x23   : > { %4477 = vmatpush.bf16.msra.mxu3 %v4219_v54 }
  0x25   : > { %650 = vmatpush.bf16.msra.mxu0 %v4149_v6  ;;  %4471 = vmatpush.bf16.msra.mxu1 %v4149_v6 }
  0x26   : > { %1150 = vmatpush.bf16.msra.mxu2 %v4149_v6 }
  0x27   : > { %4478 = vmatpush.bf16.msra.mxu3 %v4218_v60 }
  0x29   : > { %651 = vmatpush.bf16.msra.mxu0 %v4148_v7  ;;  %4472 = vmatpush.bf16.msra.mxu1 %v4148_v7 }
  0x2a   : > { %1151 = vmatpush.bf16.msra.mxu2 %v4148_v7 }
  0x2c   : > { %652 = vmatmul.bf16.vlgmr.msra.gmra.mxu0 %v4156_v8  ;;  %697 = vmatmul.bf16.vlgmr.msra.gmra.mxu1 %v4165_v9 }
  0x2d   : > { %1095 = vmatpush.bf16.msrb.mxu1 %v4155_v0  ;;  %2218 = vmatpush.bf16.msrb.mxu0 %v4199_v21 }
  0x2e   : > { %1807 = vmatpush.bf16.msrb.mxu2 %v4223_v32 }
  0x2f   : > { %1152 = vmatmul.bf16.vlgmr.msra.gmra.mxu2 %v4173_v53 }
  0x31   : > { %1096 = vmatpush.bf16.msrb.mxu1 %v4154_v1  ;;  %2219 = vmatpush.bf16.msrb.mxu0 %v4198_v22 }
  0x32   : > { %1808 = vmatpush.bf16.msrb.mxu2 %v4222_v35 }
  0x35   : > { %1097 = vmatpush.bf16.msrb.mxu1 %v4153_v2  ;;  %2220 = vmatpush.bf16.msrb.mxu0 %v4197_v24  ;;  %v6567_v2 = vmov 0 }
  0x36   : > { %1809 = vmatpush.bf16.msrb.mxu2 %v4221_v40  ;;  %v6568_v2 = vsel %vm5001_vm2, 4294967295, %v6567_v2 }
  0x37   : > { %6569 = vst [vmem:[#allocation3_spill] sm:$0xff] %v6568_v2 }
  0x39   : > { %1098 = vmatpush.bf16.msrb.mxu1 %v4152_v3  ;;  %2221 = vmatpush.bf16.msrb.mxu0 %v4196_v27 }
  0x3a   : > { %1810 = vmatpush.bf16.msrb.mxu2 %v4220_v47 }
  0x3c   : > { %657 = vmatmul.bf16.gmra.mxu0 %v4157_v10  ;;  %702 = vmatmul.bf16.gmra.mxu1 %v4166_v11  ;;  %v4216_v10 = vld [vmem:[%s6526_s5 + $0xc0] sm:$0xff] }
  0x3d   : > { %1099 = vmatpush.bf16.msrb.mxu1 %v4151_v4  ;;  %2222 = vmatpush.bf16.msrb.mxu0 %v4195_v33 }
  0x3e   : > { %1811 = vmatpush.bf16.msrb.mxu2 %v4219_v54 }
  0x41   : > { %1100 = vmatpush.bf16.msrb.mxu1 %v4150_v5  ;;  %2223 = vmatpush.bf16.msrb.mxu0 %v4194_v36  ;;  %v4217_v5 = vld [vmem:[%s6526_s5 + $0xc8] sm:$0xff] }
  0x42   : > { %1812 = vmatpush.bf16.msrb.mxu2 %v4218_v60  ;;  %4479 = vmatpush.bf16.msra.mxu3 %v4217_v5 }
  0x45   : > { %1101 = vmatpush.bf16.msrb.mxu1 %v4149_v6  ;;  %2224 = vmatpush.bf16.msrb.mxu0 %v4193_v41 }
  0x46   : > { %1813 = vmatpush.bf16.msrb.mxu2 %v4217_v5  ;;  %4480 = vmatpush.bf16.msra.mxu3 %v4216_v10 }
  0x49   : > { %1102 = vmatpush.bf16.msrb.mxu1 %v4148_v7  ;;  %2225 = vmatpush.bf16.msrb.mxu0 %v4192_v48  ;;  %v1456_v7 = vsel %vm5001_vm2, 0, %v1315_v63 }
  0x4a   : > { %1814 = vmatpush.bf16.msrb.mxu2 %v4216_v10 }
  0x4c   : > { %662 = vmatmul.bf16.gmra.mxu0 %v4158_v12  ;;  %707 = vmatmul.bf16.gmra.mxu1 %v4167_v13 }
  0x4d   : > { %1896 = vmatpush.bf16.msra.mxu1 %v4231_v26 }
  0x51   : > { %1897 = vmatpush.bf16.msra.mxu1 %v4230_v28 }
  0x55   : > { %1898 = vmatpush.bf16.msra.mxu1 %v4229_v34 }
  0x59   : > { %1899 = vmatpush.bf16.msra.mxu1 %v4228_v37 }
  0x5c   : > { %667 = vmatmul.bf16.gmra.mxu0 %v4159_v14  ;;  %712 = vmatmul.bf16.gmra.mxu1 %v4168_v15 }
  0x5d   : > { %1900 = vmatpush.bf16.msra.mxu1 %v4227_v43 }
  0x61   : > { %1901 = vmatpush.bf16.msra.mxu1 %v4226_v50 }
  0x65   : > { %1902 = vmatpush.bf16.msra.mxu1 %v4225_v55 }
  0x69   : > { %1903 = vmatpush.bf16.msra.mxu1 %v4224_v62 }
  0x6c   : > { %672 = vmatmul.bf16.gmra.mxu0 %v4160_v16  ;;  %717 = vmatmul.bf16.gmra.mxu1 %v4169_v17 }
  0x7c   : > { %677 = vmatmul.bf16.gmra.mxu0 %v4161_v18  ;;  %722 = vmatmul.bf16.gmra.mxu1 %v4170_v19 }
  0x8c   : > { %682 = vmatmul.bf16.gmra.mxu0 %v4162_v20  ;;  %727 = vmatmul.bf16.gmra.mxu1 %v4171_v23 }
  0x9c   : > { %687 = vmatmul.bf16.gmra.mxu0 %v4163_v25  ;;  %1103 = vmatmul.bf16.vlgmr.msrb.gmra.mxu1 %v4172_v39 }
  0xa9   : > { %v653_v44 = vpop.f32.mrf.mxu0  ;;  %v698_v3 = vpop.f32.mrf.mxu1 }
  0xaa   : > { %v4967_v46 = vadd.f32 %v4951_v38, %v653_v44  ;;  %v5028_v43 = vadd.f32 %v4951_v38, %v698_v3 }
  0xac   : > { %v733_v49 = vmin.f32 %v4967_v46, 20.0  ;;  %692 = vmatmul.bf16.gmra.mxu0 %v4164_v42  ;;  %v751_v48 = vmin.f32 %v5028_v43, 20.0 }
  0xae   : > { %v765_v52 = vmul.f32 1.442695, %v733_v49 }
  0xb0   : > { %4508 = vpow2.f32 %v765_v52  ;;  %v801_v52 = vmul.f32 1.442695, %v751_v48 }
  0xb1   : > { %v655_v56 = vpop.f32.mrf.mxu0  ;;  %v700_v14 = vpop.f32.mrf.mxu1 }
  0xb2   : > { %v656_v59 = vadd.f32 %v4951_v38, %v655_v56  ;;  %v5036_v53 = vadd.f32 %v4951_v38, %v700_v14 }
  0xb4   : > { %v734_v61 = vmin.f32 %v656_v59, 20.0  ;;  %v752_v56 = vmin.f32 %v5036_v53, 20.0 }
  0xb6   : > { %v4509_v0 = vpop.eup %4508  ;;  %v767_v1 = vmul.f32 1.442695, %v734_v61  ;;  %v803_v61 = vmul.f32 1.442695, %v752_v56 }
  0xb7   : > { %v829_v4 = vadd.f32 2.0, %v4509_v0 }
  0xb8   : > { %4510 = vpow2.f32 %v767_v1 }
  0xb9   : > { %v658_v6 = vpop.f32.mrf.mxu0  ;;  %v861_v9 = vmul.f32 %v4509_v0, %v829_v4  ;;  %v5018_v24 = vpop.f32.mrf.mxu1 }
  0xba   : > { %v5011_v8 = vadd.f32 %v4951_v38, %v658_v6 }
  0xbb   : > { %v925_v15 = vadd.f32 2.0, %v861_v9  ;;  %v893_v28 = vmul.f32 %v861_v9, %v4967_v46 }
  0xbc   : > { %v735_v11 = vmin.f32 %v5011_v8, 20.0  ;;  %2226 = vmatmul.bf16.vlgmr.msrb.gmra.mxu0 %v1456_v7 }
  0xbe   : > { %v4511_v12 = vpop.eup %4510  ;;  %v769_v13 = vmul.f32 1.442695, %v735_v11 }
  0xbf   : > { %v830_v16 = vadd.f32 2.0, %v4511_v12 }
  0xc0   : > { %4512 = vpow2.f32 %v769_v13 }
  0xc1   : > { %v862_v17 = vmul.f32 %v4511_v12, %v830_v16  ;;  %v660_v18 = vpop.f32.mrf.mxu0  ;;  %4514 = vrcp.f32 %v925_v15  ;;  %v5025_v40 = vpop.f32.mrf.mxu1 }
  0xc2   : > { %v661_v19 = vadd.f32 %v4951_v38, %v660_v18 }
  0xc3   : > { %v926_v20 = vadd.f32 2.0, %v862_v17  ;;  %v894_v29 = vmul.f32 %v862_v17, %v656_v59 }
  0xc4   : > { %v736_v21 = vmin.f32 %v661_v19, 20.0 }
  0xc5   : > { %4516 = vrcp.f32 %v926_v20 }
  0xc6   : > { %v4513_v22 = vpop.eup %4512  ;;  %v771_v23 = vmul.f32 1.442695, %v736_v21 }
  0xc7   : > { %v831_v25 = vadd.f32 2.0, %v4513_v22  ;;  %v4515_v26 = vpop.eup %4514 }
  0xc8   : > { %4518 = vpow2.f32 %v771_v23  ;;  %v989_v33 = vmul.f32 %v4515_v26, %v893_v28 }
  0xc9   : > { %v663_v27 = vpop.f32.mrf.mxu0  ;;  %v863_v32 = vmul.f32 %v4513_v22, %v831_v25  ;;  %v5039_v57 = vpop.f32.mrf.mxu1 }
  0xca   : > { %v5022_v30 = vadd.f32 %v4951_v38, %v663_v27  ;;  %v5054_v27 = vadd.f32 %v4951_v38, %v5018_v24  ;;  %v5063_v24 = vadd.f32 %v4951_v38, %v5025_v40 }
  0xcb   : > { %v4517_v31 = vpop.eup %4516  ;;  %v927_v41 = vadd.f32 2.0, %v863_v32  ;;  %v895_v63 = vmul.f32 %v863_v32, %v5011_v8 }
  0xcc   : > { %v990_v34 = vmul.f32 %v4517_v31, %v894_v29  ;;  %v737_v35 = vmin.f32 %v5022_v30, 20.0 }
  0xce   : > { %v4519_v36 = vpop.eup %4518  ;;  %v4267_v37 = vpack.c.bf16 %v990_v34, %v989_v33  ;;  %v773_v39 = vmul.f32 1.442695, %v737_v35  ;;  %v753_v34 = vmin.f32 %v5054_v27, 20.0 }
  0xcf   : > { %v832_v42 = vadd.f32 2.0, %v4519_v36 }
  0xd0   : > { %4268 = vst [vmem:[#allocation2 + $0x8] sm:$0xff] %v4267_v37   ;;  %4520 = vpow2.f32 %v773_v39  ;;  %v805_v39 = vmul.f32 1.442695, %v753_v34 }
  0xd1   : > { %v864_v44 = vmul.f32 %v4519_v36, %v832_v42  ;;  %v665_v46 = vpop.f32.mrf.mxu0  ;;  %4522 = vrcp.f32 %v927_v41  ;;  %v5048_v21 = vpop.f32.mrf.mxu1 }
  0xd2   : > { %v5031_v47 = vadd.f32 %v4951_v38, %v665_v46  ;;  %v754_v46 = vmin.f32 %v5063_v24, 20.0 }
  0xd3   : > { %v928_v49 = vadd.f32 2.0, %v864_v44  ;;  %v896_v4 = vmul.f32 %v864_v44, %v661_v19 }
  0xd4   : > { %v738_v50 = vmin.f32 %v5031_v47, 20.0 }
  0xd5   : > { %4524 = vrcp.f32 %v928_v49 }
  0xd6   : > { %v4521_v54 = vpop.eup %4520  ;;  %v775_v55 = vmul.f32 1.442695, %v738_v50  ;;  %4526 = vpow2.f32 %v801_v52 }
  0xd7   : > { %v833_v59 = vadd.f32 2.0, %v4521_v54  ;;  %v4175_v60 = vld [vmem:[#allocation2 + $0x8] sm:$0xff]  ;;  %v4523_v62 = vpop.eup %4522 }
  0xd8   : > { %4528 = vpow2.f32 %v775_v55  ;;  %1904 = vmatmul.bf16.vlgmr.msra.gmra.mxu1 %v4175_v60  ;;  %v1317_v1 = vshrl.u32 %v4175_v60, 16  ;;  %v1320_v3 = vshll.u32 %v4175_v60, 16  ;;  %v991_v12 = vmul.f32 %v4523_v62, %v895_v63 }
  0xd9   : > { %v668_v0 = vpop.f32.mrf.mxu0  ;;  %v865_v5 = vmul.f32 %v4521_v54, %v833_v59  ;;  %4530 = vpow2.f32 %v803_v61  ;;  %v5066_v48 = vpop.f32.mrf.mxu1  ;;  %v807_v55 = vmul.f32 1.442695, %v754_v46 }
  0xda   : > { %v5043_v6 = vadd.f32 %v4951_v38, %v668_v0  ;;  %v1319_v9 = vrot.slane %v1317_v1, 7  ;;  %v1476_v10 = vrot.slane %v1320_v3, 1 }
  0xdb   : > { %v4525_v7 = vpop.eup %4524  ;;  %v929_v19 = vadd.f32 2.0, %v865_v5  ;;  %v897_v40 = vmul.f32 %v865_v5, %v5022_v30 }
  0xdc   : > { %v4527_v11 = vpop.eup %4526  ;;  %v992_v13 = vmul.f32 %v4525_v7, %v896_v4  ;;  %v739_v14 = vmin.f32 %v5043_v6, 20.0  ;;  %v1322_v8 = vor.u32 %v1320_v3, %v1319_v9  ;;  %v5046_v16 = vor.u32 %v1476_v10, %v1317_v1 }
  0xdd   : > { %v847_v15 = vadd.f32 2.0, %v4527_v11 }
  0xde   : > { %v4529_v17 = vpop.eup %4528  ;;  %v4272_v18 = vpack.c.bf16 %v992_v13, %v991_v12  ;;  %v777_v20 = vmul.f32 1.442695, %v739_v14  ;;  %v1457_v25 = vsel %vm5001_vm2, 0, %v1322_v8 }
  0xdf   : > { %v834_v22 = vadd.f32 2.0, %v4529_v17  ;;  %v879_v23 = vmul.f32 %v4527_v11, %v847_v15  ;;  %v4531_v26 = vpop.eup %4530  ;;  %1815 = vmatmul.bf16.vlgmr.msrb.gmra.mxu2 %v1457_v25  ;;  %2231 = vmatmul.bf16.gmra.mxu0 %v1457_v25 }
  0xe0   : > { %4435 = vst [vmem:[#allocation2 + $0x40] sm:$0xff] %v4272_v18   ;;  %4532 = vpow2.f32 %v777_v20  ;;  %v848_v31 = vadd.f32 2.0, %v4531_v26 }
  0xe1   : > { %v866_v28 = vmul.f32 %v4529_v17, %v834_v22  ;;  %v943_v29 = vadd.f32 2.0, %v879_v23  ;;  %v670_v32 = vpop.f32.mrf.mxu0  ;;  %4534 = vrcp.f32 %v929_v19  ;;  %v911_v54 = vmul.f32 %v879_v23, %v5028_v43  ;;  %v5078_v18 = vpop.f32.mrf.mxu1 }
  0xe2   : > { %v5057_v33 = vadd.f32 %v4951_v38, %v670_v32  ;;  %v880_v36 = vmul.f32 %v4531_v26, %v848_v31  ;;  %v5088_v26 = vadd.f32 %v4951_v38, %v5039_v57  ;;  %v5097_v57 = vadd.f32 %v4951_v38, %v5048_v21 }
  0xe3   : > { %v930_v35 = vadd.f32 2.0, %v866_v28  ;;  %4536 = vrcp.f32 %v943_v29  ;;  %v898_v59 = vmul.f32 %v866_v28, %v5031_v47 }
  0xe4   : > { %v740_v37 = vmin.f32 %v5057_v33, 20.0  ;;  %v944_v41 = vadd.f32 2.0, %v880_v36  ;;  %v912_v0 = vmul.f32 %v880_v36, %v5036_v53 }
  0xe5   : > { %4538 = vrcp.f32 %v930_v35  ;;  %v755_v35 = vmin.f32 %v5088_v26, 20.0 }
  0xe6   : > { %v4533_v42 = vpop.eup %4532  ;;  %v779_v44 = vmul.f32 1.442695, %v740_v37  ;;  %4540 = vpow2.f32 %v805_v39 }
  0xe7   : > { %v835_v49 = vadd.f32 2.0, %v4533_v42  ;;  %4542 = vrcp.f32 %v944_v41  ;;  %v4176_v50 = vld [vmem:[#allocation2 + $0x40] sm:$0xff]  ;;  %v4535_v52 = vpop.eup %4534  ;;  %v809_v41 = vmul.f32 1.442695, %v755_v35 }
  0xe8   : > { %4544 = vpow2.f32 %v779_v44  ;;  %1909 = vmatmul.bf16.gmra.mxu1 %v4176_v50  ;;  %v1324_v61 = vshrl.u32 %v4176_v50, 16  ;;  %v1327_v62 = vshll.u32 %v4176_v50, 16  ;;  %v993_v9 = vmul.f32 %v4535_v52, %v897_v40 }
  0xe9   : > { %v4537_v56 = vpop.eup %4536  ;;  %v673_v60 = vpop.f32.mrf.mxu0  ;;  %v867_v63 = vmul.f32 %v4533_v42, %v835_v49  ;;  %4546 = vpow2.f32 %v807_v55  ;;  %v756_v49 = vmin.f32 %v5097_v57, 20.0 }
  0xea   : > { %v5073_v1 = vadd.f32 %v4951_v38, %v673_v60  ;;  %v1326_v43 = vrot.slane %v1324_v61, 7  ;;  %v1478_v4 = vrot.slane %v1327_v62, 1  ;;  %v1007_v30 = vmul.f32 %v4537_v56, %v911_v54  ;;  %v5100_v50 = vpop.f32.mrf.mxu1 }
  0xeb   : > { %v4539_v3 = vpop.eup %4538  ;;  %v931_v15 = vadd.f32 2.0, %v867_v63  ;;  %v811_v40 = vmul.f32 1.442695, %v756_v49  ;;  %v899_v21 = vmul.f32 %v867_v63, %v5043_v6 }
  0xec   : > { %v4541_v7 = vpop.eup %4540  ;;  %v994_v10 = vmul.f32 %v4539_v3, %v898_v59  ;;  %v741_v47 = vmin.f32 %v5073_v1, 20.0  ;;  %v1329_v12 = vor.u32 %v1327_v62, %v1326_v43  ;;  %v5076_v13 = vor.u32 %v1478_v4, %v1324_v61 }
  0xed   : > { %v4543_v5 = vpop.eup %4542  ;;  %v849_v11 = vadd.f32 2.0, %v4541_v7 }
  0xee   : > { %v4545_v14 = vpop.eup %4544  ;;  %v4277_v53 = vpack.c.bf16 %v994_v10, %v993_v9  ;;  %v1008_v8 = vmul.f32 %v4543_v5, %v912_v0  ;;  %v781_v17 = vmul.f32 1.442695, %v741_v47  ;;  %v5082_v22 = vsel %vm5001_vm2, 0, %v1329_v12 }
  0xef   : > { %v836_v19 = vadd.f32 2.0, %v4545_v14  ;;  %v881_v20 = vmul.f32 %v4541_v7, %v849_v11  ;;  %v4547_v23 = vpop.eup %4546  ;;  %1820 = vmatmul.bf16.gmra.mxu2 %v5082_v22  ;;  %2236 = vmatmul.bf16.gmra.mxu0 %v5082_v22 }
  0xf0   : > { %4436 = vst [vmem:[#allocation2 + $0x80] sm:$0xff] %v4277_v53   ;;  %v4312_v25 = vpack.c.bf16 %v1008_v8, %v1007_v30  ;;  %4548 = vpow2.f32 %v781_v17  ;;  %v850_v31 = vadd.f32 2.0, %v4547_v23 }
  0xf1   : > { %v868_v28 = vmul.f32 %v4545_v14, %v836_v19  ;;  %v945_v29 = vadd.f32 2.0, %v881_v20  ;;  %v675_v32 = vpop.f32.mrf.mxu0  ;;  %4550 = vrcp.f32 %v931_v15  ;;  %v913_v56 = vmul.f32 %v881_v20, %v5054_v27 }
  0xf2   : > { %4443 = vst [vmem:[#allocation2 + $0x48] sm:$0xff] %v4312_v25   ;;  %v5091_v34 = vadd.f32 %v4951_v38, %v675_v32  ;;  %v882_v37 = vmul.f32 %v4547_v23, %v850_v31  ;;  %v5112_v17 = vpop.f32.mrf.mxu1 }
  0xf3   : > { %v932_v36 = vadd.f32 2.0, %v868_v28  ;;  %4552 = vrcp.f32 %v945_v29  ;;  %v900_v60 = vmul.f32 %v868_v28, %v5057_v33  ;;  %v5122_v29 = vadd.f32 %v4951_v38, %v5066_v48 }
  0xf4   : > { %v742_v39 = vmin.f32 %v5091_v34, 20.0  ;;  %v946_v42 = vadd.f32 2.0, %v882_v37  ;;  %v914_v43 = vmul.f32 %v882_v37, %v5063_v24  ;;  %v5131_v48 = vadd.f32 %v4951_v38, %v5078_v18 }
  0xf5   : > { %4554 = vrcp.f32 %v932_v36 }
  0xf6   : > { %v4549_v44 = vpop.eup %4548  ;;  %v783_v46 = vmul.f32 1.442695, %v742_v39  ;;  %4556 = vpow2.f32 %v809_v41  ;;  %v757_v39 = vmin.f32 %v5122_v29, 20.0 }
  0xf7   : > { %v837_v52 = vadd.f32 2.0, %v4549_v44  ;;  %4558 = vrcp.f32 %v946_v42  ;;  %v4177_v54 = vld [vmem:[#allocation2 + $0x80] sm:$0xff]  ;;  %v4551_v55 = vpop.eup %4550 }
  0xf8   : > { %4560 = vpow2.f32 %v783_v46  ;;  %1914 = vmatmul.bf16.gmra.mxu1 %v4177_v54  ;;  %v1331_v62 = vshrl.u32 %v4177_v54, 16  ;;  %v1334_v0 = vshll.u32 %v4177_v54, 16  ;;  %v995_v30 = vmul.f32 %v4551_v55, %v899_v21 }
  0xf9   : > { %v4553_v59 = vpop.eup %4552  ;;  %v678_v61 = vpop.f32.mrf.mxu0  ;;  %v869_v3 = vmul.f32 %v4549_v44, %v837_v52  ;;  %4562 = vpow2.f32 %v811_v40  ;;  %v813_v46 = vmul.f32 1.442695, %v757_v39  ;;  %v758_v55 = vmin.f32 %v5131_v48, 20.0 }
  0xfa   : > { %v5107_v4 = vadd.f32 %v4951_v38, %v678_v61  ;;  %v1333_v27 = vrot.slane %v1331_v62, 7  ;;  %v1480_v9 = vrot.slane %v1334_v0, 1  ;;  %v1009_v6 = vmul.f32 %v4553_v59, %v913_v56  ;;  %v5134_v56 = vpop.f32.mrf.mxu1 }
  0xfb   : > { %v4555_v7 = vpop.eup %4554  ;;  %v933_v53 = vadd.f32 2.0, %v869_v3  ;;  %v815_v61 = vmul.f32 1.442695, %v758_v55  ;;  %v901_v18 = vmul.f32 %v869_v3, %v5073_v1  ;;  %v5162_v39 = vadd.f32 %v4951_v38, %v5100_v50  ;;  %v4238_v50 = vld [vmem:[%s6526_s5 + $0x170] sm:$0xff] }
  0xfc   : > { %v4557_v10 = vpop.eup %4556  ;;  %v996_v47 = vmul.f32 %v4555_v7, %v900_v60  ;;  %v743_v33 = vmin.f32 %v5107_v4, 20.0  ;;  %v1336_v11 = vor.u32 %v1334_v0, %v1333_v27  ;;  %v5110_v12 = vor.u32 %v1480_v9, %v1331_v62 }
  0xfd   : > { %v4559_v63 = vpop.eup %4558  ;;  %v851_v5 = vadd.f32 2.0, %v4557_v10 }
  0xfe   : > { %v4561_v14 = vpop.eup %4560  ;;  %v4282_v24 = vpack.c.bf16 %v996_v47, %v995_v30  ;;  %v1010_v15 = vmul.f32 %v4559_v63, %v914_v43  ;;  %v785_v8 = vmul.f32 1.442695, %v743_v33  ;;  %v5116_v23 = vsel %vm5001_vm2, 0, %v1336_v11 }
  0xff   : > { %v838_v19 = vadd.f32 2.0, %v4561_v14  ;;  %v883_v20 = vmul.f32 %v4557_v10, %v851_v5  ;;  %v4563_v25 = vpop.eup %4562  ;;  %1825 = vmatmul.bf16.gmra.mxu2 %v5116_v23  ;;  %2241 = vmatmul.bf16.gmra.mxu0 %v5116_v23 }
 0x100   : > { %4437 = vst [vmem:[#allocation2 + $0x60] sm:$0xff] %v4282_v24   ;;  %v4317_v28 = vpack.c.bf16 %v1010_v15, %v1009_v6  ;;  %4564 = vpow2.f32 %v785_v8  ;;  %v852_v35 = vadd.f32 2.0, %v4563_v25 }
 0x101   : > { %v870_v31 = vmul.f32 %v4561_v14, %v838_v19  ;;  %v947_v32 = vadd.f32 2.0, %v883_v20  ;;  %v680_v36 = vpop.f32.mrf.mxu0  ;;  %4566 = vrcp.f32 %v933_v53  ;;  %v915_v60 = vmul.f32 %v883_v20, %v5088_v26 }
 0x102   : > { %4444 = vst [vmem:[#allocation2 + $0x58] sm:$0xff] %v4317_v28   ;;  %v5125_v37 = vadd.f32 %v4951_v38, %v680_v36  ;;  %v884_v42 = vmul.f32 %v4563_v25, %v852_v35  ;;  %v5149_v20 = vpop.f32.mrf.mxu1 }
 0x103   : > { %v934_v41 = vadd.f32 2.0, %v870_v31  ;;  %4568 = vrcp.f32 %v947_v32  ;;  %v902_v0 = vmul.f32 %v870_v31, %v5091_v34  ;;  %v4239_v32 = vld [vmem:[%s6526_s5 + $0x178] sm:$0xff] }
 0x104   : > { %v744_v44 = vmin.f32 %v5125_v37, 20.0  ;;  %v948_v49 = vadd.f32 2.0, %v884_v42  ;;  %v916_v10 = vmul.f32 %v884_v42, %v5097_v57  ;;  %1985 = vmatpush.bf16.msra.mxu2 %v4239_v32 }
 0x105   : > { %4570 = vrcp.f32 %v934_v41 }
 0x106   : > { %v4565_v52 = vpop.eup %4564  ;;  %v787_v54 = vmul.f32 1.442695, %v744_v44  ;;  %4572 = vpow2.f32 %v813_v46 }
 0x107   : > { %v839_v40 = vadd.f32 2.0, %v4565_v52  ;;  %4574 = vrcp.f32 %v948_v49  ;;  %v4178_v59 = vld [vmem:[#allocation2 + $0x60] sm:$0xff]  ;;  %v4567_v21 = vpop.eup %4566 }
 0x108   : > { %4576 = vpow2.f32 %v787_v54  ;;  %1919 = vmatmul.bf16.gmra.mxu1 %v4178_v59  ;;  %v1338_v7 = vshrl.u32 %v4178_v59, 16  ;;  %v1341_v27 = vshll.u32 %v4178_v59, 16  ;;  %v997_v63 = vmul.f32 %v4567_v21, %v901_v18  ;;  %1986 = vmatpush.bf16.msra.mxu2 %v4238_v50 }
 0x109   : > { %v4569_v62 = vpop.eup %4568  ;;  %v683_v43 = vpop.f32.mrf.mxu0  ;;  %v5139_v9 = vmul.f32 %v4565_v52, %v839_v40  ;;  %4578 = vpow2.f32 %v815_v61  ;;  %v759_v52 = vmin.f32 %v5162_v39, 20.0  ;;  %v5174_v21 = vadd.f32 %v4951_v38, %v5112_v17 }
 0x10a   : > { %v5143_v30 = vadd.f32 %v4951_v38, %v683_v43  ;;  %v1340_v47 = vrot.slane %v1338_v7, 7  ;;  %v1482_v6 = vrot.slane %v1341_v27, 1  ;;  %v1011_v3 = vmul.f32 %v4569_v62, %v915_v60 }
 0x10b   : > { %v4571_v26 = vpop.eup %4570  ;;  %v935_v15 = vadd.f32 2.0, %v5139_v9  ;;  %v817_v59 = vmul.f32 1.442695, %v759_v52  ;;  %v760_v18 = vmin.f32 %v5174_v21, 20.0 }
 0x10c   : > { %v4573_v33 = vpop.eup %4572  ;;  %v998_v1 = vmul.f32 %v4571_v26, %v902_v0  ;;  %v745_v34 = vmin.f32 %v5143_v30, 20.0  ;;  %v1343_v14 = vor.u32 %v1341_v27, %v1340_v47  ;;  %v5146_v24 = vor.u32 %v1482_v6, %v1338_v7  ;;  %v5177_v0 = vpop.f32.mrf.mxu1  ;;  %v4237_v27 = vld [vmem:[%s6526_s5 + $0x168] sm:$0xff] }
 0x10d   : > { %v4575_v5 = vpop.eup %4574  ;;  %v853_v11 = vadd.f32 2.0, %v4573_v33  ;;  %v819_v26 = vmul.f32 1.442695, %v760_v18  ;;  %v903_v6 = vmul.f32 %v5139_v9, %v5107_v4  ;;  %1987 = vmatpush.bf16.msra.mxu2 %v4237_v27 }
 0x10e   : > { %v4577_v53 = vpop.eup %4576  ;;  %v4287_v57 = vpack.c.bf16 %v998_v1, %v997_v63  ;;  %v1012_v8 = vmul.f32 %v4575_v5, %v916_v10  ;;  %v789_v19 = vmul.f32 1.442695, %v745_v34  ;;  %v5153_v31 = vsel %vm5001_vm2, 0, %v1343_v14 }
 0x10f   : > { %v840_v25 = vadd.f32 2.0, %v4577_v53  ;;  %v885_v28 = vmul.f32 %v4573_v33, %v853_v11  ;;  %v4579_v35 = vpop.eup %4578  ;;  %1830 = vmatmul.bf16.gmra.mxu2 %v5153_v31  ;;  %2246 = vmatmul.bf16.gmra.mxu0 %v5153_v31 }
 0x110   : > { %4438 = vst [vmem:[#allocation2 + $0x28] sm:$0xff] %v4287_v57   ;;  %v4322_v36 = vpack.c.bf16 %v1012_v8, %v1011_v3  ;;  %4580 = vpow2.f32 %v789_v19  ;;  %v854_v44 = vadd.f32 2.0, %v4579_v35 }
 0x111   : > { %v872_v41 = vmul.f32 %v4577_v53, %v840_v25  ;;  %v949_v42 = vadd.f32 2.0, %v885_v28  ;;  %v685_v46 = vpop.f32.mrf.mxu0  ;;  %4582 = vrcp.f32 %v935_v15  ;;  %v917_v10 = vmul.f32 %v885_v28, %v5122_v29 }
 0x112   : > { %4445 = vst [vmem:[#allocation2 + $0x30] sm:$0xff] %v4322_v36   ;;  %v5165_v49 = vadd.f32 %v4951_v38, %v685_v46  ;;  %v886_v55 = vmul.f32 %v4579_v35, %v854_v44 }
 0x113   : > { %v936_v54 = vadd.f32 2.0, %v872_v41  ;;  %4584 = vrcp.f32 %v949_v42  ;;  %v904_v33 = vmul.f32 %v872_v41, %v5125_v37  ;;  %v4236_v37 = vld [vmem:[%s6526_s5 + $0x160] sm:$0xff] }
 0x114   : > { %v746_v40 = vmin.f32 %v5165_v49, 20.0  ;;  %v950_v60 = vadd.f32 2.0, %v886_v55  ;;  %v918_v29 = vmul.f32 %v886_v55, %v5131_v48  ;;  %1988 = vmatpush.bf16.msra.mxu2 %v4236_v37  ;;  %v5204_v44 = vpop.f32.mrf.mxu1  ;;  %v4235_v55 = vld [vmem:[%s6526_s5 + $0x158] sm:$0xff]  ;;  %v4233_v37 = vld [vmem:[%s6526_s5 + $0x148] sm:$0xff] }
 0x115   : > { %4586 = vrcp.f32 %v936_v54 }
 0x116   : > { %v4581_v61 = vpop.eup %4580  ;;  %v791_v62 = vmul.f32 1.442695, %v746_v40  ;;  %4588 = vpow2.f32 %v817_v59  ;;  %v5217_v59 = vadd.f32 %v4951_v38, %v5134_v56  ;;  %v4234_v56 = vld [vmem:[%s6526_s5 + $0x150] sm:$0xff] }
 0x117   : > { %v841_v43 = vadd.f32 2.0, %v4581_v61  ;;  %4590 = vrcp.f32 %v950_v60  ;;  %v5179_v7 = vld [vmem:[#allocation2 + $0x28] sm:$0xff]  ;;  %v4583_v17 = vpop.eup %4582 }
 0x118   : > { %4592 = vpow2.f32 %v791_v62  ;;  %1924 = vmatmul.bf16.gmra.mxu1 %v5179_v7  ;;  %v1345_v1 = vshrl.u32 %v5179_v7, 16  ;;  %v1348_v3 = vshll.u32 %v5179_v7, 16  ;;  %v999_v53 = vmul.f32 %v4583_v17, %v903_v6  ;;  %1989 = vmatpush.bf16.msra.mxu2 %v4235_v55 }
 0x119   : > { %v4585_v47 = vpop.eup %4584  ;;  %v688_v63 = vpop.f32.mrf.mxu0  ;;  %v5191_v34 = vmul.f32 %v4581_v61, %v841_v43  ;;  %4594 = vpow2.f32 %v819_v26  ;;  %v761_v27 = vmin.f32 %v5217_v59, 20.0  ;;  %v5229_v6 = vadd.f32 %v4951_v38, %v5149_v20 }
 0x11a   : > { %v5195_v5 = vadd.f32 %v4951_v38, %v688_v63  ;;  %v1347_v4 = vrot.slane %v1345_v1, 7  ;;  %v1484_v9 = vrot.slane %v1348_v3, 1  ;;  %v1013_v15 = vmul.f32 %v4585_v47, %v917_v10 }
 0x11b   : > { %v4587_v11 = vpop.eup %4586  ;;  %v937_v36 = vadd.f32 2.0, %v5191_v34  ;;  %v821_v47 = vmul.f32 1.442695, %v761_v27 }
 0x11c   : > { %v4589_v14 = vpop.eup %4588  ;;  %v1000_v57 = vmul.f32 %v4587_v11, %v904_v33  ;;  %v747_v8 = vmin.f32 %v5195_v5, 20.0  ;;  %v1350_v48 = vor.u32 %v1348_v3, %v1347_v4  ;;  %v5201_v28 = vor.u32 %v1484_v9, %v1345_v1  ;;  %1990 = vmatpush.bf16.msra.mxu2 %v4234_v56 }
 0x11d   : > { %v4591_v19 = vpop.eup %4590  ;;  %v855_v25 = vadd.f32 2.0, %v4589_v14  ;;  %v762_v3 = vmin.f32 %v5229_v6, 20.0 }
 0x11e   : > { %v4593_v32 = vpop.eup %4592  ;;  %v4292_v35 = vpack.c.bf16 %v1000_v57, %v999_v53  ;;  %v1014_v41 = vmul.f32 %v4591_v19, %v918_v29  ;;  %v793_v42 = vmul.f32 1.442695, %v747_v8  ;;  %v5208_v54 = vsel %vm5001_vm2, 0, %v1350_v48  ;;  %v1104_v29 = vpop.f32.mrf.mxu1 }
 0x11f   : > { %v842_v46 = vadd.f32 2.0, %v4593_v32  ;;  %v887_v52 = vmul.f32 %v4589_v14, %v855_v25  ;;  %6570 = vst [vmem:[#allocation4_spill] sm:$0xff] %v5208_v54  ;;  %v4595_v50 = vpop.eup %4594  ;;  %1835 = vmatmul.bf16.gmra.mxu2 %v5208_v54  ;;  %2251 = vmatmul.bf16.gmra.mxu0 %v5208_v54  ;;  %v823_v14 = vmul.f32 1.442695, %v762_v3  ;;  %v905_v57 = vmul.f32 %v5191_v34, %v5143_v30 }
 0x120   : > { %4439 = vst [vmem:[#allocation2 + $0x10] sm:$0xff] %v4292_v35   ;;  %v4327_v40 = vpack.c.bf16 %v1014_v41, %v1013_v15  ;;  %4596 = vpow2.f32 %v793_v42  ;;  %v856_v62 = vadd.f32 2.0, %v4595_v50  ;;  %1991 = vmatpush.bf16.msra.mxu2 %v4233_v37 }
 0x121   : > { %v874_v60 = vmul.f32 %v4593_v32, %v842_v46  ;;  %v951_v61 = vadd.f32 2.0, %v887_v52  ;;  %v690_v18 = vpop.f32.mrf.mxu0  ;;  %4598 = vrcp.f32 %v937_v36  ;;  %v919_v20 = vmul.f32 %v887_v52, %v5162_v39 }
 0x122   : > { %4446 = vst [vmem:[#allocation2 + $0x18] sm:$0xff] %v4327_v40   ;;  %v5220_v43 = vadd.f32 %v4951_v38, %v690_v18  ;;  %v888_v10 = vmul.f32 %v4595_v50, %v856_v62  ;;  %v5254_v40 = vld [vmem:[#allocation2 + $0x48] sm:$0xff] }
 0x123   : > { %v938_v17 = vadd.f32 2.0, %v874_v60  ;;  %4600 = vrcp.f32 %v951_v61  ;;  %v906_v15 = vmul.f32 %v874_v60, %v5165_v49  ;;  %v4232_v49 = vld [vmem:[%s6526_s5 + $0x140] sm:$0xff] }
 0x124   : > { %v748_v26 = vmin.f32 %v5220_v43, 20.0  ;;  %v952_v33 = vadd.f32 2.0, %v888_v10  ;;  %v920_v39 = vmul.f32 %v888_v10, %v5174_v21  ;;  %1992 = vmatpush.bf16.msra.mxu2 %v4232_v49 }
 0x125   : > { %4602 = vrcp.f32 %v938_v17 }
 0x126   : > { %v4597_v63 = vpop.eup %4596  ;;  %v795_v1 = vmul.f32 1.442695, %v748_v26  ;;  %4604 = vpow2.f32 %v821_v47  ;;  %v1106_v17 = vpop.f32.mrf.mxu1 }
 0x127   : > { %v843_v11 = vadd.f32 2.0, %v4597_v63  ;;  %4606 = vrcp.f32 %v952_v33  ;;  %v5232_v4 = vld [vmem:[#allocation2 + $0x10] sm:$0xff]  ;;  %v4599_v9 = vpop.eup %4598 }
 0x128   : > { %4608 = vpow2.f32 %v795_v1  ;;  %1929 = vmatmul.bf16.gmra.mxu1 %v5232_v4  ;;  %v1352_v19 = vshrl.u32 %v5232_v4, 16  ;;  %v1355_v25 = vshll.u32 %v5232_v4, 16  ;;  %v1001_v30 = vmul.f32 %v4599_v9, %v905_v57  ;;  %v4207_v9 = vld [vmem:[%s6526_s5 + $0x78] sm:$0xff] }
 0x129   : > { %v4601_v53 = vpop.eup %4600  ;;  %v693_v8 = vpop.f32.mrf.mxu0  ;;  %v5244_v48 = vmul.f32 %v4597_v63, %v843_v11  ;;  %4610 = vpow2.f32 %v823_v14  ;;  %v5267_v1 = vadd.f32 %v4951_v38, %v5177_v0  ;;  %v4764_v14 = vld [vmem:[%s6525_s4] ss:$0 sm:$0xff]  ;;  %2307 = vmatpush.bf16.msrb.mxu3 %v4207_v9 }
 0x12a   : > { %v5248_v32 = vadd.f32 %v4951_v38, %v693_v8  ;;  %v1354_v34 = vrot.slane %v1352_v19, 7  ;;  %v1015_v42 = vmul.f32 %v4601_v53, %v919_v20  ;;  %v1486_v52 = vrot.slane %v1355_v25, 1  ;;  %v1153_v8 = vpop.f32.mrf.mxu2 }
 0x12b   : > { %v4603_v35 = vpop.eup %4602  ;;  %v939_v62 = vadd.f32 2.0, %v5244_v48  ;;  %v1383_v20 = vshll.u32 %v5254_v40, 16  ;;  %v763_v38 = vmin.f32 %v5267_v1, 20.0  ;;  %v5280_v0 = vadd.f32 %v4764_v14, %v5204_v44 }
 0x12c   : > { %v4605_v36 = vpop.eup %4604  ;;  %v1002_v41 = vmul.f32 %v4603_v35, %v906_v15  ;;  %v749_v46 = vmin.f32 %v5248_v32, 20.0  ;;  %v1357_v21 = vor.u32 %v1355_v25, %v1354_v34  ;;  %v5261_v47 = vor.u32 %v1486_v52, %v1352_v19 }
 0x12d   : > { %v4607_v55 = vpop.eup %4606  ;;  %v857_v50 = vadd.f32 2.0, %v4605_v36  ;;  %v825_v25 = vmul.f32 1.442695, %v763_v38  ;;  %v1494_v34 = vrot.slane %v1383_v20, 1 }
 0x12e   : > { %v4609_v60 = vpop.eup %4608  ;;  %v4297_v61 = vpack.c.bf16 %v1002_v41, %v1001_v30  ;;  %v1016_v18 = vmul.f32 %v4607_v55, %v920_v39  ;;  %v797_v27 = vmul.f32 1.442695, %v749_v46  ;;  %v5259_v26 = vsel %vm5001_vm2, 0, %v1357_v21 }
 0x12f   : > { %v844_v10 = vadd.f32 2.0, %v4609_v60  ;;  %v889_v56 = vmul.f32 %v4605_v36, %v857_v50  ;;  %6571 = vst [vmem:[#allocation5_spill] sm:$0xff] %v5259_v26  ;;  %v4611_v33 = vpop.eup %4610  ;;  %1840 = vmatmul.bf16.gmra.mxu2 %v5259_v26  ;;  %2256 = vmatmul.bf16.gmra.mxu0 %v5259_v26  ;;  %v764_v39 = vmin.f32 %v5280_v0, 20.0  ;;  %v1380_v30 = vshrl.u32 %v5254_v40, 16  ;;  %v5294_v50 = vld [vmem:[#allocation2 + $0x58] sm:$0xff] }
 0x130   : > { %4440 = vst [vmem:[#allocation2 + $0x78] sm:$0xff] %v4297_v61   ;;  %v4332_v63 = vpack.c.bf16 %v1016_v18, %v1015_v42  ;;  %4612 = vpow2.f32 %v797_v27  ;;  %v858_v11 = vadd.f32 2.0, %v4611_v33  ;;  %v1387_v38 = vshrl.u32 %v5294_v50, 16 }
 0x131   : > { %v876_v3 = vmul.f32 %v4609_v60, %v844_v10  ;;  %v953_v29 = vadd.f32 2.0, %v889_v56  ;;  %v695_v37 = vpop.f32.mrf.mxu0  ;;  %4614 = vrcp.f32 %v939_v62  ;;  %v827_v36 = vmul.f32 1.442695, %v764_v39 }
 0x132   : > { %4447 = vst [vmem:[#allocation2 + $0x50] sm:$0xff] %v4332_v63   ;;  %v5276_v53 = vadd.f32 %v4764_v14, %v695_v37  ;;  %v890_v15 = vmul.f32 %v4611_v33, %v858_v11  ;;  %v5291_v46 = vor.u32 %v1494_v34, %v1380_v30  ;;  %v921_v55 = vmul.f32 %v889_v56, %v5217_v59  ;;  %v1155_v33 = vpop.f32.mrf.mxu2 }
 0x133   : > { %v940_v57 = vadd.f32 2.0, %v876_v3  ;;  %4616 = vrcp.f32 %v953_v29  ;;  %v907_v60 = vmul.f32 %v5244_v48, %v5195_v5  ;;  %v908_v18 = vmul.f32 %v876_v3, %v5220_v43 }
 0x134   : > { %v750_v19 = vmin.f32 %v5276_v53, 20.0  ;;  %v954_v35 = vadd.f32 2.0, %v890_v15  ;;  %v922_v17 = vmul.f32 %v890_v15, %v5229_v6  ;;  %v1390_v59 = vshll.u32 %v5294_v50, 16 }
 0x135   : > { %4618 = vrcp.f32 %v940_v57 }
 0x136   : > { %v4613_v49 = vpop.eup %4612  ;;  %v799_v44 = vmul.f32 1.442695, %v750_v19  ;;  %4620 = vpow2.f32 %v825_v25  ;;  %v1496_v8 = vrot.slane %v1390_v59, 1 }
 0x137   : > { %v845_v41 = vadd.f32 2.0, %v4613_v49  ;;  %4622 = vrcp.f32 %v954_v35  ;;  %v5287_v42 = vld [vmem:[#allocation2 + $0x78] sm:$0xff]  ;;  %v4615_v52 = vpop.eup %4614 }
 0x138   : > { %4624 = vpow2.f32 %v799_v44  ;;  %1934 = vmatmul.bf16.gmra.mxu1 %v5287_v42  ;;  %v1359_v61 = vshrl.u32 %v5287_v42, 16  ;;  %v1362_v62 = vshll.u32 %v5287_v42, 16  ;;  %v1003_v5 = vmul.f32 %v4615_v52, %v907_v60  ;;  %v4206_v52 = vld [vmem:[%s6526_s5 + $0x70] sm:$0xff] }
 0x139   : > { %v4617_v21 = vpop.eup %4616  ;;  %4626 = vpow2.f32 %v827_v36  ;;  %v877_v27 = vmul.f32 %v4613_v49, %v845_v41  ;;  %v5317_v44 = vor.u32 %v1496_v8, %v1387_v38  ;;  %2308 = vmatpush.bf16.msrb.mxu3 %v4206_v52  ;;  %v5329_v33 = vpop.f32.mrf.mxu0 }
 0x13a   : > { %v1361_v56 = vrot.slane %v1359_v61, 7  ;;  %v1488_v63 = vrot.slane %v1362_v62, 1  ;;  %v1017_v11 = vmul.f32 %v4617_v21, %v921_v55 }
 0x13b   : > { %v4619_v10 = vpop.eup %4618  ;;  %v941_v6 = vadd.f32 2.0, %v877_v27 }
 0x13c   : > { %v4621_v29 = vpop.eup %4620  ;;  %v1004_v48 = vmul.f32 %v4619_v10, %v908_v18  ;;  %v1364_v14 = vor.u32 %v1362_v62, %v1361_v56  ;;  %v5305_v57 = vor.u32 %v1488_v63, %v1359_v61 }
 0x13d   : > { %v4623_v37 = vpop.eup %4622  ;;  %v859_v9 = vadd.f32 2.0, %v4621_v29  ;;  %4628 = vrcp.f32 %v941_v6  ;;  %v6573_v6 = vmov 0 }
 0x13e   : > { %v4625_v43 = vpop.eup %4624  ;;  %v4302_v3 = vpack.c.bf16 %v1004_v48, %v1003_v5  ;;  %v1018_v15 = vmul.f32 %v4623_v37, %v922_v17  ;;  %v5311_v35 = vsel %vm5001_vm2, 0, %v1364_v14  ;;  %v5325_v17 = vld [vmem:[#allocation2 + $0x30] sm:$0xff]  ;;  %v6574_v6 = vsel %vm5337_vm5, 4294967295, %v6573_v6 }
 0x13f   : > { %v4627_v19 = vpop.eup %4626  ;;  %v846_v25 = vadd.f32 2.0, %v4625_v43  ;;  %v891_v39 = vmul.f32 %v4621_v29, %v859_v9  ;;  %6572 = vst [vmem:[#allocation6_spill] sm:$0xff] %v5311_v35  ;;  %1845 = vmatmul.bf16.gmra.mxu2 %v5311_v35  ;;  %2261 = vmatmul.bf16.gmra.mxu0 %v5311_v35  ;;  %v1397_v48 = vshll.u32 %v5325_v17, 16  ;;  %v4214_v35 = vld [vmem:[%s6526_s5 + $0xb0] sm:$0xff] }
 0x140   : > { %4441 = vst [vmem:[#allocation2] sm:$0xff] %v4302_v3   ;;  %v4337_v34 = vpack.c.bf16 %v1018_v15, %v1017_v11  ;;  %v860_v49 = vadd.f32 2.0, %v4627_v19 }
 0x141   : > { %v878_v36 = vmul.f32 %v4625_v43, %v846_v25  ;;  %v955_v41 = vadd.f32 2.0, %v891_v39  ;;  %v923_v61 = vmul.f32 %v891_v39, %v5267_v1  ;;  %v909_v1 = vmul.f32 %v877_v27, %v5248_v32  ;;  %6575 = vst [vmem:[#allocation7_spill] sm:$0xff] %v6574_v6 }
 0x142   : > { %4448 = vst [vmem:[#allocation2 + $0x38] sm:$0xff] %v4337_v34   ;;  %v892_v55 = vmul.f32 %v4627_v19, %v860_v49  ;;  %v1498_v27 = vrot.slane %v1397_v48, 1  ;;  %v5353_v34 = vsel %vm5337_vm5, %v5046_v16, 0 }
 0x143   : > { %v942_v21 = vadd.f32 2.0, %v878_v36  ;;  %4630 = vrcp.f32 %v955_v41  ;;  %v4629_v18 = vpop.eup %4628  ;;  %v910_v5 = vmul.f32 %v878_v36, %v5276_v53  ;;  %v1394_v53 = vshrl.u32 %v5325_v17, 16  ;;  %v5362_v36 = vpop.f32.mrf.mxu0  ;;  %v4205_v41 = vld [vmem:[%s6526_s5 + $0x68] sm:$0xff] }
 0x144   : > { %v956_v60 = vadd.f32 2.0, %v892_v55  ;;  %v924_v56 = vmul.f32 %v892_v55, %v5280_v0  ;;  %v1005_v43 = vmul.f32 %v4629_v18, %v909_v1  ;;  %2309 = vmatpush.bf16.msrb.mxu3 %v4205_v41  ;;  %v5369_v55 = vld [vmem:[#allocation2 + $0x18] sm:$0xff] }
 0x145   : > { %4632 = vrcp.f32 %v942_v21  ;;  %v5359_v49 = vor.u32 %v1498_v27, %v1394_v53  ;;  %6577 = vst [vmem:[#allocation9_spill] sm:$0xff] %v5369_v55 }
 0x146   : > { %4634 = vrcp.f32 %v956_v60 }
 0x147   : > { %v5323_v62 = vld [vmem:[#allocation2] sm:$0xff] }
 0x148   : > { %1939 = vmatmul.bf16.gmra.mxu1 %v5323_v62  ;;  %v1366_v63 = vshrl.u32 %v5323_v62, 16  ;;  %v1369_v29 = vshll.u32 %v5323_v62, 16 }
 0x149   : > { %v4631_v10 = vpop.eup %4630 }
 0x14a   : > { %v1019_v37 = vmul.f32 %v4631_v10, %v923_v61  ;;  %v1368_v9 = vrot.slane %v1366_v63, 7  ;;  %v1490_v14 = vrot.slane %v1369_v29, 1  ;;  %v6534_v61 = vshll.u32 %v5369_v55, 16 }
 0x14b   : > { %v4633_v11 = vpop.eup %4632 }
 0x14c   : > { %v4635_v0 = vpop.eup %4634  ;;  %v1006_v3 = vmul.f32 %v4633_v11, %v910_v5  ;;  %v1371_v8 = vor.u32 %v1369_v29, %v1368_v9  ;;  %v5341_v19 = vor.u32 %v1490_v14, %v1366_v63  ;;  %v6536_v5 = vshrl.u32 %v5369_v55, 16 }
 0x14d   : > { %v1020_v15 = vmul.f32 %v4635_v0, %v924_v56  ;;  %v1500_v11 = vrot.slane %v6534_v61, 1  ;;  %v5389_v9 = vsel %vm5337_vm5, %v5076_v13, 0  ;;  %v4204_v13 = vld [vmem:[%s6526_s5 + $0x60] sm:$0xff] }
 0x14e   : > { %v4307_v32 = vpack.c.bf16 %v1006_v3, %v1005_v43  ;;  %v5348_v39 = vsel %vm5001_vm2, 0, %v1371_v8  ;;  %6579 = vst [vmem:[#allocation11_spill] sm:$0xff] %v5389_v9  ;;  %v1382_v8 = vrot.slane %v1380_v30, 7  ;;  %2310 = vmatpush.bf16.msrb.mxu3 %v4204_v13 }
 0x14f   : > { %v4342_v25 = vpack.c.bf16 %v1020_v15, %v1019_v37  ;;  %6576 = vst [vmem:[#allocation8_spill] sm:$0xff] %v5348_v39  ;;  %1850 = vmatmul.bf16.vlgmr.msra.gmra.mxu3 %v5348_v39  ;;  %1993 = vmatmul.bf16.vlgmr.msra.gmra.mxu2 %v5353_v34  ;;  %v5395_v14 = vor.u32 %v1500_v11, %v6536_v5 }
 0x150   : > { %4442 = vst [vmem:[#allocation2 + $0x88] sm:$0xff] %v4307_v32   ;;  %2266 = vmatmul.bf16.gmra.mxu0 %v5348_v39  ;;  %v5408_v32 = vld [vmem:[#allocation2 + $0x50] sm:$0xff] }
 0x151   : > { %4449 = vst [vmem:[#allocation2 + $0x20] sm:$0xff] %v4342_v25   ;;  %v1385_v25 = vor.u32 %v1383_v20, %v1382_v8  ;;  %v5427_v20 = vsel %vm5337_vm5, %v5110_v12, 0  ;;  %v4203_v12 = vld [vmem:[%s6526_s5 + $0x58] sm:$0xff]  ;;  %v1389_v8 = vrot.slane %v1387_v38, 7 }
 0x152   : > { %6580 = vst [vmem:[#allocation12_spill] sm:$0xff] %v5408_v32  ;;  %2311 = vmatpush.bf16.msrb.mxu3 %v4203_v12 }
 0x153   : > { %6583 = vst [vmem:[#allocation15_spill] sm:$0xff] %v5427_v20 }
 0x155   : > { %v1905_v16 = vpop.f32.mrf.mxu1 }
 0x157   : > { %v5367_v52 = vld [vmem:[#allocation2 + $0x88] sm:$0xff] }
 0x158   : > { %1944 = vmatmul.bf16.gmra.mxu1 %v5367_v52  ;;  %v1373_v21 = vshrl.u32 %v5367_v52, 16  ;;  %v1376_v60 = vshll.u32 %v5367_v52, 16  ;;  %v5484_v61 = vld [vmem:[#allocation2 + $0x20] sm:$0xff] }
 0x159   : > { %6590 = vst [vmem:[#allocation22_spill] sm:$0xff] %v5484_v61 }
 0x15a   : > { %v1375_v18 = vrot.slane %v1373_v21, 7  ;;  %v1492_v10 = vrot.slane %v1376_v60, 1 }
 0x15c   : > { %v5375_v56 = vpop.f32.mrf.mxu0  ;;  %v1378_v63 = vor.u32 %v1376_v60, %v1375_v18  ;;  %v5377_v29 = vor.u32 %v1492_v10, %v1373_v21  ;;  %v6533_v18 = vshrl.u32 %v5408_v32, 16  ;;  %v5422_v10 = vsel %vm5001_vm2, 0, %v1385_v25 }
 0x15d   : > { %v1907_v1 = vpop.f32.mrf.mxu1  ;;  %6582 = vst [vmem:[#allocation14_spill] sm:$0xff] %v5422_v10 }
 0x15e   : > { %v5384_v37 = vsel %vm5001_vm2, 0, %v1378_v63 }
 0x15f   : > { %6578 = vst [vmem:[#allocation10_spill] sm:$0xff] %v5384_v37  ;;  %1855 = vmatmul.bf16.gmra.mxu3 %v5384_v37  ;;  %1998 = vmatmul.bf16.gmra.mxu2 %v5389_v9 }
 0x160   : > { %2271 = vmatmul.bf16.gmra.mxu0 %v5384_v37 }
 0x162   : > { %v1816_v0 = vpop.f32.mrf.mxu2 }
 0x163   : > { %v5398_v43 = vadd.f32 %v1905_v16, %v1816_v0  ;;  %v6531_v16 = vshll.u32 %v5408_v32, 16 }
 0x164   : > { %v5400_v3 = vpop.f32.mrf.mxu0 }
 0x165   : > { %v1910_v15 = vpop.f32.mrf.mxu1  ;;  %v1502_v30 = vrot.slane %v6531_v16, 1 }
 0x167   : > { %v5433_v63 = vor.u32 %v1502_v30, %v6533_v18  ;;  %v4202_v18 = vld [vmem:[%s6526_s5 + $0x50] sm:$0xff] }
 0x168   : > { %1949 = vmatmul.bf16.gmra.mxu1 %v5254_v40  ;;  %2312 = vmatpush.bf16.msrb.mxu3 %v4202_v18 }
 0x16a   : > { %v1818_v27 = vpop.f32.mrf.mxu2 }
 0x16b   : > { %v5412_v41 = vadd.f32 %v1907_v1, %v1818_v27  ;;  %v5446_v27 = vld [vmem:[#allocation2 + $0x38] sm:$0xff] }
 0x16c   : > { %v5415_v21 = vpop.f32.mrf.mxu0  ;;  %6585 = vst [vmem:[#allocation17_spill] sm:$0xff] %v5446_v27  ;;  %v6535_v16 = vshrl.u32 %v5446_v27, 16 }
 0x16d   : > { %6581 = vst [vmem:[#allocation13_spill] sm:$0xff] %v5415_v21  ;;  %v1912_v60 = vpop.f32.mrf.mxu1 }
 0x16f   : > { %1860 = vmatmul.bf16.gmra.mxu3 %v5422_v10  ;;  %2003 = vmatmul.bf16.gmra.mxu2 %v5427_v20 }
 0x170   : > { %2276 = vmatmul.bf16.gmra.mxu0 %v5422_v10 }
 0x172   : > { %v1821_v1 = vpop.f32.mrf.mxu2 }
 0x173   : > { %v5436_v11 = vadd.f32 %v1910_v15, %v1821_v1  ;;  %v1392_v15 = vor.u32 %v1390_v59, %v1389_v8  ;;  %v6532_v1 = vshll.u32 %v5446_v27, 16  ;;  %v5465_v59 = vsel %vm5337_vm5, %v5146_v24, 0 }
 0x174   : > { %v5438_v0 = vpop.f32.mrf.mxu0  ;;  %6588 = vst [vmem:[#allocation20_spill] sm:$0xff] %v5465_v59  ;;  %v1396_v24 = vrot.slane %v1394_v53, 7 }
 0x175   : > { %6584 = vst [vmem:[#allocation16_spill] sm:$0xff] %v5438_v0  ;;  %v1915_v13 = vpop.f32.mrf.mxu1  ;;  %v1504_v38 = vrot.slane %v6532_v1, 1  ;;  %v5460_v12 = vsel %vm5001_vm2, 0, %v1392_v15  ;;  %v6611_v0 = vshll.u32 %v4964_v45, 16 }
 0x176   : > { %6587 = vst [vmem:[#allocation19_spill] sm:$0xff] %v5460_v12 }
 0x177   : > { %v1474_v21 = vrot.slane %v6611_v0, 1 }
 0x178   : > { %1954 = vmatmul.bf16.gmra.mxu1 %v5294_v50 }
 0x17a   : > { %v1823_v25 = vpop.f32.mrf.mxu2 }
 0x17b   : > { %v5450_v30 = vadd.f32 %v1912_v60, %v1823_v25  ;;  %v5471_v60 = vor.u32 %v1504_v38, %v6535_v16  ;;  %v1399_v16 = vor.u32 %v1397_v48, %v1396_v24  ;;  %v5503_v48 = vsel %vm5337_vm5, %v5201_v28, 0  ;;  %v4254_v28 = vld [vmem:[%s6526_s5 + $0x1f0] sm:$0xff] }
 0x17c   : > { %v5453_v51 = vpop.f32.mrf.mxu0  ;;  %6593 = vst [vmem:[#allocation25_spill] sm:$0xff] %v5503_v48 }
 0x17d   : > { %6586 = vst [vmem:[#allocation18_spill] sm:$0xff] %v5453_v51  ;;  %v1917_v58 = vpop.f32.mrf.mxu1  ;;  %v5498_v37 = vsel %vm5001_vm2, 0, %v1399_v16  ;;  %v4255_v16 = vld [vmem:[%s6526_s5 + $0x1f8] sm:$0xff]  ;;  %v4248_v51 = vld [vmem:[%s6526_s5 + $0x1c0] sm:$0xff] }
 0x17e   : > { %6592 = vst [vmem:[#allocation24_spill] sm:$0xff] %v5498_v37  ;;  %2768 = vmatpush.bf16.msra.mxu0 %v4255_v16 }
 0x17f   : > { %1865 = vmatmul.bf16.gmra.mxu3 %v5460_v12  ;;  %2008 = vmatmul.bf16.gmra.mxu2 %v5465_v59 }
 0x180   : > { %2281 = vmatmul.bf16.gmra.mxu0 %v5460_v12  ;;  %v6542_v12 = vshrl.u32 %v5484_v61, 16 }
 0x182   : > { %v1826_v8 = vpop.f32.mrf.mxu2  ;;  %2769 = vmatpush.bf16.msra.mxu0 %v4254_v28  ;;  %v4201_v28 = vld [vmem:[%s6526_s5 + $0x48] sm:$0xff] }
 0x183   : > { %v5474_v25 = vadd.f32 %v1915_v13, %v1826_v8  ;;  %v6540_v8 = vshll.u32 %v5484_v61, 16  ;;  %2313 = vmatpush.bf16.msrb.mxu3 %v4201_v28  ;;  %v6599_v28 = vshrl.u32 %v5408_v32, 16 }
 0x184   : > { %v5476_v15 = vpop.f32.mrf.mxu0 }
 0x185   : > { %6589 = vst [vmem:[#allocation21_spill] sm:$0xff] %v5476_v15  ;;  %v1920_v1 = vpop.f32.mrf.mxu1  ;;  %v1506_v10 = vrot.slane %v6540_v8, 1  ;;  %v6594_v8 = vshrl.u32 %v5369_v55, 16 }
 0x187   : > { %v1403_v39 = vrot.slane %v6594_v8, 7 }
 0x188   : > { %1959 = vmatmul.bf16.gmra.mxu1 %v5325_v17 }
 0x18a   : > { %v1828_v38 = vpop.f32.mrf.mxu2 }
 0x18b   : > { %v5488_v13 = vadd.f32 %v1917_v58, %v1828_v38  ;;  %v5509_v58 = vor.u32 %v1506_v10, %v6542_v12  ;;  %v4253_v12 = vld [vmem:[%s6526_s5 + $0x1e8] sm:$0xff] }
 0x18c   : > { %v5491_v5 = vpop.f32.mrf.mxu0  ;;  %2770 = vmatpush.bf16.msra.mxu0 %v4253_v12  ;;  %v5551_v12 = vsel %vm5337_vm5, %v5261_v47, 0 }
 0x18d   : > { %6591 = vst [vmem:[#allocation23_spill] sm:$0xff] %v5491_v5  ;;  %v1922_v53 = vpop.f32.mrf.mxu1 }
 0x18f   : > { %1870 = vmatmul.bf16.gmra.mxu3 %v5498_v37  ;;  %2013 = vmatmul.bf16.gmra.mxu2 %v5503_v48 }
 0x190   : > { %2286 = vmatmul.bf16.gmra.mxu0 %v5498_v37 }
 0x192   : > { %v1831_v18 = vpop.f32.mrf.mxu2 }
 0x193   : > { %v5515_v24 = vadd.f32 %v1920_v1, %v1831_v18  ;;  %v4215_v1 = vld [vmem:[%s6526_s5 + $0xb8] sm:$0xff]  ;;  %v6596_v18 = vshll.u32 %v5369_v55, 16 }
 0x194   : > { %v5522_v10 = vpop.f32.mrf.mxu0  ;;  %2396 = vmatpush.bf16.msrb.mxu1 %v4215_v1 }
 0x195   : > { %v1925_v38 = vpop.f32.mrf.mxu1  ;;  %6595 = vst [vmem:[#allocation26_spill] sm:$0xff] %v5522_v10  ;;  %v1406_v37 = vor.u32 %v6596_v18, %v1403_v39  ;;  %v4252_v10 = vld [vmem:[%s6526_s5 + $0x1e0] sm:$0xff] }
 0x196   : > { %2771 = vmatpush.bf16.msra.mxu0 %v4252_v10  ;;  %v4212_v18 = vld [vmem:[%s6526_s5 + $0xa0] sm:$0xff] }
 0x197   : > { %v5546_v39 = vsel %vm5001_vm2, 0, %v1406_v37  ;;  %v4213_v37 = vld [vmem:[%s6526_s5 + $0xa8] sm:$0xff] }
 0x198   : > { %1964 = vmatmul.bf16.gmra.mxu1 %v5369_v55  ;;  %6597 = vst [vmem:[#allocation27_spill] sm:$0xff] %v5546_v39 }
 0x199   : > { %2397 = vmatpush.bf16.msrb.mxu1 %v4214_v35 }
 0x19a   : > { %v1833_v16 = vpop.f32.mrf.mxu2 }
 0x19b   : > { %v5533_v8 = vadd.f32 %v1922_v53, %v1833_v16  ;;  %v4251_v53 = vld [vmem:[%s6526_s5 + $0x1d8] sm:$0xff]  ;;  %v4250_v16 = vld [vmem:[%s6526_s5 + $0x1d0] sm:$0xff] }
 0x19c   : > { %v5562_v1 = vpop.f32.mrf.mxu0  ;;  %2772 = vmatpush.bf16.msra.mxu0 %v4251_v53  ;;  %v4211_v53 = vld [vmem:[%s6526_s5 + $0x98] sm:$0xff] }
 0x19d   : > { %v1927_v5 = vpop.f32.mrf.mxu1  ;;  %6598 = vst [vmem:[#allocation28_spill] sm:$0xff] %v5562_v1  ;;  %2398 = vmatpush.bf16.msrb.mxu1 %v4213_v37 }
 0x19f   : > { %1875 = vmatmul.bf16.gmra.mxu3 %v5546_v39  ;;  %2018 = vmatmul.bf16.gmra.mxu2 %v5551_v12 }
 0x1a0   : > { %2291 = vmatmul.bf16.gmra.mxu0 %v5546_v39  ;;  %v1410_v39 = vrot.slane %v6599_v28, 7 }
 0x1a1   : > { %2773 = vmatpush.bf16.msra.mxu0 %v4250_v16  ;;  %2399 = vmatpush.bf16.msrb.mxu1 %v4212_v18  ;;  %v4200_v18 = vld [vmem:[%s6526_s5 + $0x40] sm:$0xff] }
 0x1a2   : > { %v1836_v47 = vpop.f32.mrf.mxu2  ;;  %2314 = vmatpush.bf16.msrb.mxu3 %v4200_v18 }
 0x1a3   : > { %v5564_v10 = vadd.f32 %v1925_v38, %v1836_v47  ;;  %v4249_v38 = vld [vmem:[%s6526_s5 + $0x1c8] sm:$0xff]  ;;  %v6600_v47 = vshll.u32 %v5408_v32, 16 }
 0x1a4   : > { %v5583_v15 = vpop.f32.mrf.mxu0 }
 0x1a5   : > { %v1930_v35 = vpop.f32.mrf.mxu1  ;;  %v1413_v1 = vor.u32 %v6600_v47, %v1410_v39  ;;  %2774 = vmatpush.bf16.msra.mxu0 %v4249_v38  ;;  %6601 = vst [vmem:[#allocation29_spill] sm:$0xff] %v5583_v15  ;;  %2400 = vmatpush.bf16.msrb.mxu1 %v4211_v53  ;;  %v4209_v38 = vld [vmem:[%s6526_s5 + $0x88] sm:$0xff]  ;;  %v4208_v47 = vld [vmem:[%s6526_s5 + $0x80] sm:$0xff] }
 0x1a7   : > { %v5598_v39 = vsel %vm5001_vm2, 0, %v1413_v1 }
 0x1a8   : > { %1969 = vmatmul.bf16.gmra.mxu1 %v5408_v32  ;;  %v4210_v32 = vld [vmem:[%s6526_s5 + $0x90] sm:$0xff]  ;;  %6602 = vst [vmem:[#allocation30_spill] sm:$0xff] %v5598_v39 }
 0x1a9   : > { %2775 = vmatpush.bf16.msra.mxu0 %v4248_v51  ;;  %2401 = vmatpush.bf16.msrb.mxu1 %v4210_v32  ;;  %v6605_v32 = vshll.u32 %v5446_v27, 16 }
 0x1aa   : > { %v1838_v37 = vpop.f32.mrf.mxu2 }
 0x1ab   : > { %v5585_v28 = vadd.f32 %v1927_v5, %v1838_v37  ;;  %v5603_v5 = vsel %vm5337_vm5, %v5305_v57, 0 }
 0x1ac   : > { %v5613_v37 = vpop.f32.mrf.mxu0 }
 0x1ad   : > { %v1932_v16 = vpop.f32.mrf.mxu1  ;;  %6603 = vst [vmem:[#allocation31_spill] sm:$0xff] %v5613_v37  ;;  %2402 = vmatpush.bf16.msrb.mxu1 %v4209_v38  ;;  %v4247_v38 = vld [vmem:[%s6526_s5 + $0x1b8] sm:$0xff] }
 0x1ae   : > { %2679 = vmatpush.bf16.msrb.mxu2 %v4247_v38 }
 0x1af   : > { %1880 = vmatmul.bf16.gmra.mxu3 %v5598_v39  ;;  %2023 = vmatmul.bf16.gmra.mxu2 %v5603_v5 }
 0x1b0   : > { %2296 = vmatmul.bf16.gmra.mxu0 %v5598_v39  ;;  %v6604_v39 = vshrl.u32 %v5446_v27, 16 }
 0x1b1   : > { %2403 = vmatpush.bf16.msrb.mxu1 %v4208_v47 }
 0x1b2   : > { %v1841_v1 = vpop.f32.mrf.mxu2  ;;  %v1417_v18 = vrot.slane %v6604_v39, 7  ;;  %v5635_v39 = vsel %vm5337_vm5, %v5341_v19, 0  ;;  %v6608_v19 = vshrl.u32 %v5484_v61, 16 }
 0x1b3   : > { %v5611_v53 = vadd.f32 %v1930_v35, %v1841_v1 }
 0x1b4   : > { %v1420_v15 = vor.u32 %v6605_v32, %v1417_v18  ;;  %v5637_v47 = vpop.f32.mrf.mxu0  ;;  %v1424_v32 = vrot.slane %v6608_v19, 7 }
 0x1b5   : > { %v1935_v57 = vpop.f32.mrf.mxu1  ;;  %6607 = vst [vmem:[#allocation33_spill] sm:$0xff] %v5637_v47 }
 0x1b6   : > { %v5630_v37 = vsel %vm5001_vm2, 0, %v1420_v15 }
 0x1b7   : > { %6606 = vst [vmem:[#allocation32_spill] sm:$0xff] %v5630_v37 }
 0x1b8   : > { %1974 = vmatmul.bf16.gmra.mxu1 %v5446_v27 }
 0x1ba   : > { %v1843_v51 = vpop.f32.mrf.mxu2 }
 0x1bb   : > { %v5623_v35 = vadd.f32 %v1932_v16, %v1843_v51  ;;  %v4263_v16 = vld [vmem:[%s6526_s5 + $0x238] sm:$0xff] }
 0x1bc   : > { %2857 = vmatpush.bf16.msra.mxu3 %v4263_v16  ;;  %v5650_v47 = vpop.f32.mrf.mxu0 }
 0x1bd   : > { %v1937_v1 = vpop.f32.mrf.mxu1  ;;  %6609 = vst [vmem:[#allocation34_spill] sm:$0xff] %v5650_v47 }
 0x1bf   : > { %1885 = vmatmul.bf16.gmra.mxu3 %v5630_v37  ;;  %2028 = vmatmul.bf16.gmra.mxu2 %v5635_v39 }
 0x1c0   : > { %2301 = vmatmul.bf16.gmra.mxu0 %v5630_v37  ;;  %v6610_v37 = vshll.u32 %v5484_v61, 16 }
 0x1c2   : > { %v1846_v15 = vpop.f32.mrf.mxu2  ;;  %v1427_v38 = vor.u32 %v6610_v37, %v1424_v32  ;;  %v4765_v37 = vld [vmem:[#allocation2 + $0x40] sm:$0xff] }
 0x1c3   : > { %v5645_v18 = vadd.f32 %v1935_v57, %v1846_v15  ;;  %v5665_v15 = vsel %vm5337_vm5, %v5377_v29, 0 }
 0x1c4   : > { %v5660_v57 = vsel %vm5001_vm2, 0, %v1427_v38  ;;  %v5671_v32 = vpop.f32.mrf.mxu0 }
 0x1c5   : > { %v1940_v51 = vpop.f32.mrf.mxu1  ;;  %6612 = vst [vmem:[#allocation35_spill] sm:$0xff] %v5660_v57 }
 0x1c6   : > { %6614 = vst [vmem:[#allocation36_spill] sm:$0xff] %v5671_v32 }
 0x1c8   : > { %1979 = vmatmul.bf16.gmra.mxu1 %v5484_v61 }
 0x1ca   : > { %v1848_v27 = vpop.f32.mrf.mxu2 }
 0x1cb   : > { %v5654_v26 = vadd.f32 %v1937_v1, %v1848_v27  ;;  %v6613_v27 = vshrl.u32 %v4964_v45, 16 }
 0x1cd   : > { %v1942_v16 = vpop.f32.mrf.mxu1  ;;  %v1475_v1 = vor.u32 %v1474_v21, %v6613_v27  ;;  %v5685_v21 = vpop.f32.mrf.mxu0 }
 0x1ce   : > { %6615 = vst [vmem:[#allocation37_spill] sm:$0xff] %v5685_v21 }
 0x1cf   : > { %1890 = vmatmul.bf16.gmra.mxu3 %v5660_v57  ;;  %2033 = vmatmul.bf16.gmra.mxu2 %v5665_v15  ;;  %v1531_v57 = vsel %vm5337_vm5, %v1475_v1, 0 }
 0x1d0   : > { %2776 = vmatmul.bf16.vlgmr.msra.gmra.mxu0 %v4765_v37 }
 0x1d2   : > { %v1851_v0 = vpop.f32.mrf.mxu3  ;;  %v1994_v19 = vpop.f32.mrf.mxu2 }
 0x1d3   : > { %v5673_v38 = vadd.f32 %v1940_v51, %v1851_v0  ;;  %v5676_v2 = vadd.f32 %v1994_v19, %v5398_v43  ;;  %v4246_v43 = vld [vmem:[%s6526_s5 + $0x1b0] sm:$0xff]  ;;  %v5693_v51 = vsel %vm5337_vm5, %v5291_v46, 0 }
 0x1d4   : > { %2680 = vmatpush.bf16.msrb.mxu2 %v4246_v43 }
 0x1d5   : > { %v1945_v29 = vpop.f32.mrf.mxu1  ;;  %v5704_v19 = vpop.f32.mrf.mxu0 }
 0x1d6   : > { %6616 = vst [vmem:[#allocation38_spill] sm:$0xff] %v5704_v19 }
 0x1d8   : > { %2404 = vmatmul.bf16.vlgmr.msrb.gmra.mxu1 %v1531_v57  ;;  %v4766_v57 = vld [vmem:[#allocation2 + $0x70] sm:$0xff] }
 0x1da   : > { %v1853_v47 = vpop.f32.mrf.mxu3  ;;  %v1996_v61 = vpop.f32.mrf.mxu2 }
 0x1db   : > { %v5680_v55 = vadd.f32 %v1942_v16, %v1853_v47  ;;  %v5683_v45 = vadd.f32 %v1996_v61, %v5412_v41  ;;  %v4767_v47 = vld [vmem:[#allocation2 + $0x80] sm:$0xff]  ;;  %v4262_v61 = vld [vmem:[%s6526_s5 + $0x230] sm:$0xff] }
 0x1dc   : > { %2858 = vmatpush.bf16.msra.mxu3 %v4262_v61  ;;  %v4769_v61 = vld [vmem:[#allocation2 + $0x60] sm:$0xff] }
 0x1dd   : > { %v1947_v27 = vpop.f32.mrf.mxu1 }
 0x1df   : > { %2038 = vmatmul.bf16.gmra.mxu2 %v5693_v51  ;;  %2315 = vmatmul.bf16.vlgmr.msrb.gmra.mxu3 %v4766_v57 }
 0x1e0   : > { %2781 = vmatmul.bf16.gmra.mxu0 %v4767_v47 }
 0x1e2   : > { %v1856_v41 = vpop.f32.mrf.mxu3  ;;  %v1999_v16 = vpop.f32.mrf.mxu2 }
 0x1e3   : > { %v5699_v1 = vadd.f32 %v1945_v29, %v1856_v41  ;;  %v5702_v0 = vadd.f32 %v1999_v16, %v5436_v11  ;;  %v5715_v29 = vsel %vm5337_vm5, %v5317_v44, 0  ;;  %v4768_v11 = vld [vmem:[#allocation2 + $0x8] sm:$0xff] }
 0x1e4   : > { %6617 = vst [vmem:[#allocation39_spill] sm:$0xff] %v5715_v29 }
 0x1e5   : > { %v1950_v46 = vpop.f32.mrf.mxu1 }
 0x1e8   : > { %2409 = vmatmul.bf16.gmra.mxu1 %v5353_v34  ;;  %v5718_v34 = vpop.f32.mrf.mxu0 }
 0x1e9   : > { %6618 = vst [vmem:[#allocation40_spill] sm:$0xff] %v5718_v34 }
 0x1ea   : > { %v1858_v57 = vpop.f32.mrf.mxu3  ;;  %v2001_v21 = vpop.f32.mrf.mxu2 }
 0x1eb   : > { %v5707_v43 = vadd.f32 %v1947_v27, %v1858_v57  ;;  %v5710_v32 = vadd.f32 %v2001_v21, %v5450_v30 }
 0x1ed   : > { %v1952_v54 = vpop.f32.mrf.mxu1 }
 0x1ef   : > { %2043 = vmatmul.bf16.gmra.mxu2 %v5715_v29  ;;  %2320 = vmatmul.bf16.gmra.mxu3 %v4768_v11 }
 0x1f0   : > { %2786 = vmatmul.bf16.gmra.mxu0 %v4769_v61  ;;  %v5726_v19 = vpop.f32.mrf.mxu0 }
 0x1f1   : > { %6619 = vst [vmem:[#allocation41_spill] sm:$0xff] %v5726_v19 }
 0x1f2   : > { %v1861_v41 = vpop.f32.mrf.mxu3  ;;  %v2004_v27 = vpop.f32.mrf.mxu2 }
 0x1f3   : > { %v5720_v16 = vadd.f32 %v1950_v46, %v1861_v41  ;;  %v5723_v30 = vadd.f32 %v2004_v27, %v5474_v25  ;;  %v4245_v46 = vld [vmem:[%s6526_s5 + $0x1a8] sm:$0xff]  ;;  %v5739_v25 = vsel %vm5337_vm5, %v5359_v49, 0 }
 0x1f4   : > { %2681 = vmatpush.bf16.msrb.mxu2 %v4245_v46 }
 0x1f5   : > { %v1955_v21 = vpop.f32.mrf.mxu1 }
 0x1f8   : > { %2414 = vmatmul.bf16.gmra.mxu1 %v5389_v9  ;;  %v5751_v49 = vpop.f32.mrf.mxu0 }
 0x1f9   : > { %6620 = vst [vmem:[#allocation42_spill] sm:$0xff] %v5751_v49 }
 0x1fa   : > { %v1863_v44 = vpop.f32.mrf.mxu3  ;;  %v2006_v57 = vpop.f32.mrf.mxu2 }
 0x1fb   : > { %v5728_v29 = vadd.f32 %v1952_v54, %v1863_v44  ;;  %v5731_v11 = vadd.f32 %v2006_v57, %v5488_v13  ;;  %v4261_v54 = vld [vmem:[%s6526_s5 + $0x228] sm:$0xff] }
 0x1fc   : > { %2859 = vmatpush.bf16.msra.mxu3 %v4261_v54 }
 0x1fd   : > { %v1957_v34 = vpop.f32.mrf.mxu1 }
 0x1ff   : > { %2048 = vmatmul.bf16.gmra.mxu2 %v5739_v25  ;;  %2325 = vmatmul.bf16.gmra.mxu3 %v4765_v37 }
 0x200   : > { %2791 = vmatmul.bf16.gmra.mxu0 %v5179_v7 }
 0x202   : > { %v1866_v13 = vpop.f32.mrf.mxu3  ;;  %v2009_v41 = vpop.f32.mrf.mxu2 }
 0x203   : > { %v5746_v27 = vadd.f32 %v1955_v21, %v1866_v13  ;;  %v5749_v44 = vadd.f32 %v2009_v41, %v5515_v24  ;;  %v5762_v21 = vsel %vm5337_vm5, %v5395_v14, 0  ;;  %v5764_v24 = vpop.f32.mrf.mxu0 }
 0x204   : > { %6621 = vst [vmem:[#allocation43_spill] sm:$0xff] %v5764_v24 }
 0x205   : > { %v1960_v57 = vpop.f32.mrf.mxu1 }
 0x208   : > { %2419 = vmatmul.bf16.gmra.mxu1 %v5427_v20 }
 0x20a   : > { %v1868_v37 = vpop.f32.mrf.mxu3  ;;  %v2011_v7 = vpop.f32.mrf.mxu2 }
 0x20b   : > { %v5754_v46 = vadd.f32 %v1957_v34, %v1868_v37  ;;  %v5757_v19 = vadd.f32 %v2011_v7, %v5533_v8  ;;  %v5774_v37 = vpop.f32.mrf.mxu0 }
 0x20c   : > { %6622 = vst [vmem:[#allocation44_spill] sm:$0xff] %v5774_v37 }
 0x20d   : > { %v1962_v9 = vpop.f32.mrf.mxu1 }
 0x20f   : > { %2053 = vmatmul.bf16.gmra.mxu2 %v5762_v21  ;;  %2330 = vmatmul.bf16.gmra.mxu3 %v4767_v47 }
 0x210   : > { %2796 = vmatmul.bf16.gmra.mxu0 %v5232_v4 }
 0x212   : > { %v1871_v54 = vpop.f32.mrf.mxu3  ;;  %v2014_v13 = vpop.f32.mrf.mxu2 }
 0x213   : > { %v5768_v34 = vadd.f32 %v1960_v57, %v1871_v54  ;;  %v5771_v8 = vadd.f32 %v2014_v13, %v5564_v10  ;;  %v4244_v57 = vld [vmem:[%s6526_s5 + $0x1a0] sm:$0xff]  ;;  %v5787_v10 = vsel %vm5337_vm5, %v5433_v63, 0 }
 0x214   : > { %2682 = vmatpush.bf16.msrb.mxu2 %v4244_v57  ;;  %v4242_v57 = vld [vmem:[%s6526_s5 + $0x190] sm:$0xff] }
 0x215   : > { %v1965_v41 = vpop.f32.mrf.mxu1 }
 0x218   : > { %2424 = vmatmul.bf16.gmra.mxu1 %v5465_v59 }
 0x21a   : > { %v1873_v14 = vpop.f32.mrf.mxu3  ;;  %v2016_v7 = vpop.f32.mrf.mxu2 }
 0x21b   : > { %v5776_v24 = vadd.f32 %v1962_v9, %v1873_v14  ;;  %v5779_v47 = vadd.f32 %v2016_v7, %v5585_v28  ;;  %v4260_v9 = vld [vmem:[%s6526_s5 + $0x220] sm:$0xff]  ;;  %v4243_v28 = vld [vmem:[%s6526_s5 + $0x198] sm:$0xff]  ;;  %v5797_v14 = vpop.f32.mrf.mxu0 }
 0x21c   : > { %2860 = vmatpush.bf16.msra.mxu3 %v4260_v9  ;;  %6623 = vst [vmem:[#allocation45_spill] sm:$0xff] %v5797_v14  ;;  %2683 = vmatpush.bf16.msrb.mxu2 %v4243_v28  ;;  %v4241_v9 = vld [vmem:[%s6526_s5 + $0x188] sm:$0xff]  ;;  %v4240_v28 = vld [vmem:[%s6526_s5 + $0x180] sm:$0xff] }
 0x21d   : > { %v1967_v49 = vpop.f32.mrf.mxu1 }
 0x21f   : > { %2058 = vmatmul.bf16.gmra.mxu2 %v5787_v10  ;;  %2335 = vmatmul.bf16.gmra.mxu3 %v4769_v61 }
 0x220   : > { %2801 = vmatmul.bf16.gmra.mxu0 %v5287_v42  ;;  %2684 = vmatpush.bf16.msrb.mxu2 %v4242_v57  ;;  %v5824_v57 = vsel %vm5337_vm5, %v5471_v60, 0 }
 0x222   : > { %v1876_v54 = vpop.f32.mrf.mxu3  ;;  %v2019_v13 = vpop.f32.mrf.mxu2 }
 0x223   : > { %v5799_v63 = vadd.f32 %v1965_v41, %v1876_v54  ;;  %v5802_v61 = vadd.f32 %v2019_v13, %v5611_v53  ;;  %v5819_v54 = vpop.f32.mrf.mxu0 }
 0x224   : > { %2685 = vmatpush.bf16.msrb.mxu2 %v4241_v9  ;;  %6624 = vst [vmem:[#allocation46_spill] sm:$0xff] %v5819_v54 }
 0x225   : > { %v1970_v7 = vpop.f32.mrf.mxu1 }
 0x228   : > { %2429 = vmatmul.bf16.gmra.mxu1 %v5503_v48  ;;  %2686 = vmatpush.bf16.msrb.mxu2 %v4240_v28 }
 0x22a   : > { %v1878_v37 = vpop.f32.mrf.mxu3  ;;  %v2021_v14 = vpop.f32.mrf.mxu2 }
 0x22b   : > { %v5811_v41 = vadd.f32 %v1967_v49, %v1878_v37  ;;  %v5814_v53 = vadd.f32 %v2021_v14, %v5623_v35  ;;  %v4770_v49 = vld [vmem:[#allocation2 + $0x28] sm:$0xff]  ;;  %v5833_v48 = vpop.f32.mrf.mxu0 }
 0x22c   : > { %6625 = vst [vmem:[#allocation47_spill] sm:$0xff] %v5833_v48 }
 0x22d   : > { %v1972_v13 = vpop.f32.mrf.mxu1 }
 0x22f   : > { %2063 = vmatmul.bf16.gmra.mxu2 %v5824_v57  ;;  %2340 = vmatmul.bf16.gmra.mxu3 %v4770_v49 }
 0x230   : > { %2806 = vmatmul.bf16.gmra.mxu0 %v5323_v62 }
 0x232   : > { %v1881_v35 = vpop.f32.mrf.mxu3  ;;  %v2024_v37 = vpop.f32.mrf.mxu2 }
 0x233   : > { %v5828_v14 = vadd.f32 %v1970_v7, %v1881_v35  ;;  %v5831_v9 = vadd.f32 %v2024_v37, %v5645_v18  ;;  %v5844_v7 = vsel %vm5337_vm5, %v5509_v58, 0  ;;  %v4259_v18 = vld [vmem:[%s6526_s5 + $0x218] sm:$0xff] }
 0x234   : > { %6626 = vst [vmem:[#allocation48_spill] sm:$0xff] %v5844_v7  ;;  %2861 = vmatpush.bf16.msra.mxu3 %v4259_v18 }
 0x235   : > { %v1975_v54 = vpop.f32.mrf.mxu1 }
 0x238   : > { %2434 = vmatmul.bf16.gmra.mxu1 %v5551_v12 }
 0x23a   : > { %v1883_v60 = vpop.f32.mrf.mxu3  ;;  %v2026_v59 = vpop.f32.mrf.mxu2 }
 0x23b   : > { %v5836_v20 = vadd.f32 %v1972_v13, %v1883_v60  ;;  %v5839_v49 = vadd.f32 %v2026_v59, %v5654_v26  ;;  %v5852_v13 = vpop.f32.mrf.mxu0 }
 0x23c   : > { %6627 = vst [vmem:[#allocation49_spill] sm:$0xff] %v5852_v13 }
 0x23d   : > { %v1977_v28 = vpop.f32.mrf.mxu1 }
 0x23f   : > { %2068 = vmatmul.bf16.gmra.mxu2 %v5844_v7  ;;  %2345 = vmatmul.bf16.gmra.mxu3 %v5232_v4 }
 0x240   : > { %2811 = vmatmul.bf16.gmra.mxu0 %v5367_v52 }
 0x242   : > { %v1886_v26 = vpop.f32.mrf.mxu3  ;;  %v2029_v59 = vpop.f32.mrf.mxu2 }
 0x243   : > { %v5854_v35 = vadd.f32 %v1975_v54, %v1886_v26  ;;  %v5857_v58 = vadd.f32 %v2029_v59, %v5673_v38  ;;  %v5860_v6 = vpop.f32.mrf.mxu0 }
 0x245   : > { %v1980_v37 = vpop.f32.mrf.mxu1 }
 0x248   : > { %2439 = vmatmul.bf16.gmra.mxu1 %v5603_v5 }
 0x24a   : > { %v1888_v4 = vpop.f32.mrf.mxu3  ;;  %v2031_v60 = vpop.f32.mrf.mxu2 }
 0x24b   : > { %v5862_v7 = vadd.f32 %v1977_v28, %v1888_v4  ;;  %v5865_v48 = vadd.f32 %v2031_v60, %v5680_v55  ;;  %v5875_v59 = vpop.f32.mrf.mxu0 }
 0x24d   : > { %v1982_v13 = vpop.f32.mrf.mxu1 }
 0x24f   : > { %2350 = vmatmul.bf16.gmra.mxu3 %v5287_v42  ;;  %2687 = vmatmul.bf16.vlgmr.msrb.gmra.mxu2 %v5082_v22 }
 0x250   : > { %2816 = vmatmul.bf16.gmra.mxu0 %v5254_v40 }
 0x252   : > { %v1891_v38 = vpop.f32.mrf.mxu3  ;;  %v2034_v54 = vpop.f32.mrf.mxu2 }
 0x253   : > { %v5870_v18 = vadd.f32 %v1980_v37, %v1891_v38  ;;  %v5873_v26 = vadd.f32 %v2034_v54, %v5699_v1  ;;  %v5883_v40 = vpop.f32.mrf.mxu0  ;;  %v4258_v1 = vld [vmem:[%s6526_s5 + $0x210] sm:$0xff] }
 0x254   : > { %6628 = vst [vmem:[#allocation50_spill] sm:$0xff] %v5883_v40  ;;  %2862 = vmatpush.bf16.msra.mxu3 %v4258_v1 }
 0x255   : > { %v2405_v28 = vpop.f32.mrf.mxu1 }
 0x258   : > { %2444 = vmatmul.bf16.gmra.mxu1 %v5635_v39 }
 0x25a   : > { %v1893_v55 = vpop.f32.mrf.mxu3  ;;  %v2036_v4 = vpop.f32.mrf.mxu2 }
 0x25b   : > { %v5878_v60 = vadd.f32 %v1982_v13, %v1893_v55  ;;  %v5881_v22 = vadd.f32 %v2036_v4, %v5707_v43  ;;  %v2228_v13 = vadd.f32 %v5329_v33, %v5676_v2 }
 0x25d   : > { %v2407_v42 = vpop.f32.mrf.mxu1 }
 0x25f   : > { %2355 = vmatmul.bf16.gmra.mxu3 %v5323_v62  ;;  %2692 = vmatmul.bf16.gmra.mxu2 %v5116_v23  ;;  %v5899_v23 = vpop.f32.mrf.mxu0  ;;  %v2230_v62 = vadd.f32 %v5362_v36, %v5683_v45 }
 0x260   : > { %2821 = vmatmul.bf16.gmra.mxu0 %v5294_v50 }
 0x262   : > { %v2039_v37 = vpop.f32.mrf.mxu2  ;;  %v2316_v38 = vpop.f32.mrf.mxu3 }
 0x263   : > { %v5894_v43 = vadd.f32 %v2039_v37, %v5720_v16  ;;  %v2317_v54 = vadd.f32 %v2316_v38, %v2228_v13  ;;  %v2233_v16 = vadd.f32 %v5375_v56, %v5702_v0 }
 0x265   : > { %v5896_v55 = vadd.f32 %v2405_v28, %v2317_v54  ;;  %v2410_v50 = vpop.f32.mrf.mxu1 }
 0x267   : > { %v5913_v36 = vpop.f32.mrf.mxu0 }
 0x268   : > { %2449 = vmatmul.bf16.gmra.mxu1 %v5665_v15 }
 0x26a   : > { %v2041_v4 = vpop.f32.mrf.mxu2  ;;  %v2318_v40 = vpop.f32.mrf.mxu3 }
 0x26b   : > { %v5904_v2 = vadd.f32 %v2041_v4, %v5728_v29  ;;  %v2319_v33 = vadd.f32 %v2318_v40, %v2230_v62  ;;  %v6631_v4 = vld [vmem:[#allocation9_spill] sm:$0xff] }
 0x26d   : > { %v5906_v1 = vadd.f32 %v2407_v42, %v2319_v33  ;;  %v2412_v45 = vpop.f32.mrf.mxu1 }
 0x26f   : > { %2360 = vmatmul.bf16.gmra.mxu3 %v5367_v52  ;;  %2697 = vmatmul.bf16.gmra.mxu2 %v5153_v31  ;;  %v2235_v31 = vadd.f32 %v5400_v3, %v5710_v32  ;;  %v5926_v38 = vpop.f32.mrf.mxu0  ;;  %v4257_v3 = vld [vmem:[%s6526_s5 + $0x208] sm:$0xff]  ;;  %v6632_v32 = vld [vmem:[#allocation13_spill] sm:$0xff] }
 0x270   : > { %2826 = vmatmul.bf16.gmra.mxu0 %v5325_v17  ;;  %2863 = vmatpush.bf16.msra.mxu3 %v4257_v3 }
 0x272   : > { %v2044_v28 = vpop.f32.mrf.mxu2  ;;  %v2321_v13 = vpop.f32.mrf.mxu3 }
 0x273   : > { %v5916_v29 = vadd.f32 %v2044_v28, %v5746_v27  ;;  %v2322_v40 = vadd.f32 %v2321_v13, %v2233_v16  ;;  %v4771_v27 = vld [vmem:[#allocation2 + $0x48] sm:$0xff] }
 0x275   : > { %v5918_v42 = vadd.f32 %v2410_v50, %v2322_v40  ;;  %v2415_v54 = vpop.f32.mrf.mxu1  ;;  %v6630_v50 = vld [vmem:[#allocation4_spill] sm:$0xff] }
 0x277   : > { %v5942_v40 = vpop.f32.mrf.mxu0 }
 0x278   : > { %2454 = vmatmul.bf16.gmra.mxu1 %v5693_v51 }
 0x27a   : > { %v2046_v52 = vpop.f32.mrf.mxu2  ;;  %v2323_v37 = vpop.f32.mrf.mxu3 }
 0x27b   : > { %v5924_v56 = vadd.f32 %v2046_v52, %v5754_v46  ;;  %v2324_v0 = vadd.f32 %v2323_v37, %v2235_v31  ;;  %v2238_v46 = vadd.f32 %v6632_v32, %v5723_v30  ;;  %v6634_v52 = vld [vmem:[#allocation39_spill] sm:$0xff]  ;;  %v6635_v37 = vld [vmem:[#allocation16_spill] sm:$0xff] }
 0x27d   : > { %v5928_v62 = vadd.f32 %v2412_v45, %v2324_v0  ;;  %v2417_v31 = vpop.f32.mrf.mxu1  ;;  %v2240_v0 = vadd.f32 %v6635_v37, %v5731_v11 }
 0x27f   : > { %6629 = vst [vmem:[#allocation51_spill] sm:$0xff] %v5928_v62  ;;  %2365 = vmatmul.bf16.gmra.mxu3 %v4771_v27  ;;  %2702 = vmatmul.bf16.gmra.mxu2 %v6630_v50 }
 0x280   : > { %2831 = vmatmul.bf16.gmra.mxu0 %v6631_v4 }
 0x282   : > { %v2049_v33 = vpop.f32.mrf.mxu2  ;;  %v2326_v16 = vpop.f32.mrf.mxu3 }
 0x283   : > { %v5938_v28 = vadd.f32 %v2049_v33, %v5768_v34  ;;  %v2327_v13 = vadd.f32 %v2326_v16, %v2238_v46  ;;  %v4772_v34 = vld [vmem:[#allocation2 + $0x58] sm:$0xff]  ;;  %v5954_v33 = vpop.f32.mrf.mxu0 }
 0x284   : > { %v6638_v46 = vld [vmem:[#allocation12_spill] sm:$0xff] }
 0x285   : > { %v5940_v45 = vadd.f32 %v2415_v54, %v2327_v13  ;;  %v6637_v54 = vld [vmem:[#allocation5_spill] sm:$0xff]  ;;  %v2420_v16 = vpop.f32.mrf.mxu1  ;;  %v6639_v13 = vld [vmem:[#allocation18_spill] sm:$0xff] }
 0x286   : > { %v2243_v11 = vadd.f32 %v6639_v13, %v5749_v44 }
 0x287   : > { %6633 = vst [vmem:[#allocation4_spill] sm:$0xff] %v5940_v45 }
 0x288   : > { %2459 = vmatmul.bf16.gmra.mxu1 %v6634_v52 }
 0x28a   : > { %v2051_v27 = vpop.f32.mrf.mxu2  ;;  %v2328_v50 = vpop.f32.mrf.mxu3 }
 0x28b   : > { %v5948_v30 = vadd.f32 %v2051_v27, %v5776_v24  ;;  %v2329_v3 = vadd.f32 %v2328_v50, %v2240_v0  ;;  %v6640_v27 = vld [vmem:[#allocation21_spill] sm:$0xff]  ;;  %v5969_v44 = vpop.f32.mrf.mxu0 }
 0x28c   : > { %v2245_v50 = vadd.f32 %v6640_v27, %v5757_v19  ;;  %v6642_v19 = vld [vmem:[#allocation17_spill] sm:$0xff]  ;;  %v6644_v27 = vld [vmem:[#allocation26_spill] sm:$0xff] }
 0x28d   : > { %v5950_v32 = vadd.f32 %v2417_v31, %v2329_v3  ;;  %v2422_v13 = vpop.f32.mrf.mxu1 }
 0x28f   : > { %6636 = vst [vmem:[#allocation9_spill] sm:$0xff] %v5950_v32  ;;  %2370 = vmatmul.bf16.gmra.mxu3 %v4772_v34  ;;  %2707 = vmatmul.bf16.gmra.mxu2 %v6637_v54 }
 0x290   : > { %2836 = vmatmul.bf16.gmra.mxu0 %v6638_v46 }
 0x292   : > { %v2054_v37 = vpop.f32.mrf.mxu2  ;;  %v2331_v45 = vpop.f32.mrf.mxu3 }
 0x293   : > { %v5959_v24 = vadd.f32 %v2054_v37, %v5799_v63  ;;  %v2332_v0 = vadd.f32 %v2331_v45, %v2243_v11  ;;  %v6641_v63 = vld [vmem:[#allocation6_spill] sm:$0xff]  ;;  %v4256_v45 = vld [vmem:[%s6526_s5 + $0x200] sm:$0xff] }
 0x294   : > { %2864 = vmatpush.bf16.msra.mxu3 %v4256_v45  ;;  %v6646_v45 = vld [vmem:[#allocation22_spill] sm:$0xff] }
 0x295   : > { %v5961_v31 = vadd.f32 %v2420_v16, %v2332_v0  ;;  %v6643_v16 = vld [vmem:[#allocation23_spill] sm:$0xff] }
 0x298   : > { %2464 = vmatmul.bf16.gmra.mxu1 %v5739_v25 }
 0x29a   : > { %v2056_v3 = vpop.f32.mrf.mxu2  ;;  %v2333_v34 = vpop.f32.mrf.mxu3 }
 0x29b   : > { %v5967_v54 = vadd.f32 %v2056_v3, %v5811_v41  ;;  %v2334_v32 = vadd.f32 %v2333_v34, %v2245_v50  ;;  %v2248_v41 = vadd.f32 %v6643_v16, %v5771_v8  ;;  %v2250_v50 = vadd.f32 %v6644_v27, %v5779_v47  ;;  %v6647_v16 = vld [vmem:[#allocation28_spill] sm:$0xff] }
 0x29d   : > { %v5971_v62 = vadd.f32 %v2422_v13, %v2334_v32 }
 0x29f   : > { %2375 = vmatmul.bf16.gmra.mxu3 %v5325_v17  ;;  %2712 = vmatmul.bf16.gmra.mxu2 %v6641_v63  ;;  %v5986_v17 = vpop.f32.mrf.mxu0 }
 0x2a0   : > { %2841 = vmatmul.bf16.gmra.mxu0 %v6642_v19 }
 0x2a2   : > { %v2059_v11 = vpop.f32.mrf.mxu2  ;;  %v2336_v37 = vpop.f32.mrf.mxu3 }
 0x2a3   : > { %v5982_v0 = vadd.f32 %v2059_v11, %v5828_v14  ;;  %v5984_v32 = vadd.f32 %v2336_v37, %v2248_v41  ;;  %v6645_v14 = vld [vmem:[#allocation8_spill] sm:$0xff]  ;;  %v2253_v41 = vadd.f32 %v6647_v16, %v5802_v61  ;;  %v6649_v61 = vld [vmem:[#allocation10_spill] sm:$0xff] }
 0x2a7   : > { %v5998_v63 = vpop.f32.mrf.mxu0 }
 0x2a8   : > { %2469 = vmatmul.bf16.gmra.mxu1 %v5762_v21 }
 0x2aa   : > { %v2061_v3 = vpop.f32.mrf.mxu2  ;;  %v2338_v34 = vpop.f32.mrf.mxu3 }
 0x2ab   : > { %v5992_v13 = vadd.f32 %v2061_v3, %v5836_v20  ;;  %v5994_v8 = vadd.f32 %v2338_v34, %v2250_v50 }
 0x2af   : > { %2380 = vmatmul.bf16.gmra.mxu3 %v6631_v4  ;;  %2717 = vmatmul.bf16.gmra.mxu2 %v6645_v14  ;;  %v6648_v4 = vld [vmem:[#allocation29_spill] sm:$0xff] }
 0x2b0   : > { %2846 = vmatmul.bf16.gmra.mxu0 %v6646_v45  ;;  %v2255_v27 = vadd.f32 %v6648_v4, %v5814_v53 }
 0x2b2   : > { %v2064_v11 = vpop.f32.mrf.mxu2  ;;  %v2341_v47 = vpop.f32.mrf.mxu3 }
 0x2b3   : > { %v6004_v37 = vadd.f32 %v2064_v11, %v5854_v35  ;;  %v6006_v20 = vadd.f32 %v2341_v47, %v2253_v41  ;;  %v6650_v35 = vld [vmem:[#allocation31_spill] sm:$0xff] }
 0x2b4   : > { %v2258_v45 = vadd.f32 %v6650_v35, %v5831_v9  ;;  %v6652_v9 = vld [vmem:[#allocation14_spill] sm:$0xff] }
 0x2b8   : > { %2474 = vmatmul.bf16.gmra.mxu1 %v5787_v10 }
 0x2ba   : > { %v2066_v50 = vpop.f32.mrf.mxu2  ;;  %v2343_v3 = vpop.f32.mrf.mxu3 }
 0x2bb   : > { %v6012_v34 = vadd.f32 %v2066_v50, %v5862_v7  ;;  %v6014_v14 = vadd.f32 %v2343_v3, %v2255_v27  ;;  %v6651_v7 = vld [vmem:[#allocation33_spill] sm:$0xff] }
 0x2bc   : > { %v2260_v47 = vadd.f32 %v6651_v7, %v5839_v49  ;;  %v6656_v7 = vld [vmem:[#allocation11_spill] sm:$0xff] }
 0x2bf   : > { %2385 = vmatmul.bf16.gmra.mxu3 %v6638_v46  ;;  %2722 = vmatmul.bf16.gmra.mxu2 %v6649_v61 }
 0x2c2   : > { %v2069_v16 = vpop.f32.mrf.mxu2  ;;  %v2346_v41 = vpop.f32.mrf.mxu3 }
 0x2c3   : > { %v6021_v11 = vadd.f32 %v2069_v16, %v5870_v18  ;;  %v6023_v53 = vadd.f32 %v2346_v41, %v2258_v45  ;;  %v6653_v18 = vld [vmem:[#allocation34_spill] sm:$0xff]  ;;  %v6654_v45 = vld [vmem:[#allocation36_spill] sm:$0xff] }
 0x2c4   : > { %v2263_v3 = vadd.f32 %v6653_v18, %v5857_v58  ;;  %v2265_v49 = vadd.f32 %v6654_v45, %v5865_v48  ;;  %v6658_v58 = vld [vmem:[#allocation38_spill] sm:$0xff]  ;;  %v6659_v48 = vld [vmem:[#allocation24_spill] sm:$0xff] }
 0x2c5   : > { %v6661_v45 = vld [vmem:[#allocation40_spill] sm:$0xff] }
 0x2c8   : > { %2479 = vmatmul.bf16.gmra.mxu1 %v5824_v57 }
 0x2ca   : > { %v2071_v4 = vpop.f32.mrf.mxu2  ;;  %v2348_v27 = vpop.f32.mrf.mxu3 }
 0x2cb   : > { %v6029_v46 = vadd.f32 %v2071_v4, %v5878_v60  ;;  %v6031_v50 = vadd.f32 %v2348_v27, %v2260_v47  ;;  %v6655_v60 = vld [vmem:[#allocation19_spill] sm:$0xff] }
 0x2cf   : > { %2390 = vmatmul.bf16.gmra.mxu3 %v6642_v19  ;;  %2727 = vmatmul.bf16.gmra.mxu2 %v6652_v9  ;;  %v6657_v19 = vld [vmem:[#allocation37_spill] sm:$0xff]  ;;  %v2270_v9 = vadd.f32 %v6658_v58, %v5881_v22  ;;  %v6665_v58 = vld [vmem:[#allocation20_spill] sm:$0xff] }
 0x2d0   : > { %v2268_v47 = vadd.f32 %v6657_v19, %v5873_v26  ;;  %v6662_v26 = vld [vmem:[#allocation41_spill] sm:$0xff] }
 0x2d2   : > { %v2351_v61 = vpop.f32.mrf.mxu3  ;;  %v2688_v22 = vpop.f32.mrf.mxu2 }
 0x2d3   : > { %v6037_v35 = vadd.f32 %v2351_v61, %v2263_v3  ;;  %v6660_v61 = vld [vmem:[#allocation15_spill] sm:$0xff] }
 0x2da   : > { %v2353_v16 = vpop.f32.mrf.mxu3 }
 0x2db   : > { %v6041_v41 = vadd.f32 %v2353_v16, %v2265_v49  ;;  %v2273_v49 = vadd.f32 %v6661_v45, %v5894_v43  ;;  %v2690_v43 = vpop.f32.mrf.mxu2  ;;  %v6668_v45 = vld [vmem:[#allocation43_spill] sm:$0xff] }
 0x2df   : > { %2732 = vmatmul.bf16.gmra.mxu2 %v6655_v60  ;;  %2865 = vmatmul.bf16.vlgmr.msra.gmra.mxu3 %v6656_v7  ;;  %v2275_v7 = vadd.f32 %v6662_v26, %v5904_v2  ;;  %v6669_v26 = vld [vmem:[#allocation30_spill] sm:$0xff] }
 0x2e2   : > { %v2356_v4 = vpop.f32.mrf.mxu3 }
 0x2e3   : > { %v6047_v27 = vadd.f32 %v2356_v4, %v2268_v47  ;;  %v6664_v4 = vld [vmem:[#allocation27_spill] sm:$0xff] }
 0x2ea   : > { %v2358_v18 = vpop.f32.mrf.mxu3 }
 0x2eb   : > { %v6051_v3 = vadd.f32 %v2358_v18, %v2270_v9  ;;  %v6666_v9 = vld [vmem:[#allocation42_spill] sm:$0xff] }
 0x2ec   : > { %v2278_v18 = vadd.f32 %v6666_v9, %v5916_v29  ;;  %v6672_v9 = vld [vmem:[#allocation45_spill] sm:$0xff] }
 0x2ef   : > { %2737 = vmatmul.bf16.gmra.mxu2 %v6659_v48  ;;  %2870 = vmatmul.bf16.gmra.mxu3 %v6660_v61 }
 0x2f2   : > { %v2361_v16 = vpop.f32.mrf.mxu3 }
 0x2f3   : > { %v6057_v60 = vadd.f32 %v2361_v16, %v2273_v49  ;;  %v2280_v49 = vadd.f32 %v6668_v45, %v5924_v56  ;;  %v6673_v45 = vld [vmem:[#allocation32_spill] sm:$0xff] }
 0x2fa   : > { %v2363_v19 = vpop.f32.mrf.mxu3 }
 0x2fb   : > { %v6061_v47 = vadd.f32 %v2363_v19, %v2275_v7  ;;  %v6670_v7 = vld [vmem:[#allocation25_spill] sm:$0xff]  ;;  %v2693_v19 = vpop.f32.mrf.mxu2 }
 0x2fd   : > { %6663 = vst [vmem:[#allocation13_spill] sm:$0xff] %v6061_v47 }
 0x2ff   : > { %2742 = vmatmul.bf16.gmra.mxu2 %v6664_v4  ;;  %2875 = vmatmul.bf16.gmra.mxu3 %v6665_v58  ;;  %v6671_v4 = vld [vmem:[#allocation44_spill] sm:$0xff] }
 0x300   : > { %v2283_v58 = vadd.f32 %v6671_v4, %v5938_v28 }
 0x302   : > { %v2366_v48 = vpop.f32.mrf.mxu3 }
 0x303   : > { %v6067_v61 = vadd.f32 %v2366_v48, %v2278_v18  ;;  %v2285_v18 = vadd.f32 %v6672_v9, %v5948_v30 }
 0x305   : > { %6667 = vst [vmem:[#allocation39_spill] sm:$0xff] %v6067_v61  ;;  %v6081_v61 = vpop.f32.mrf.mxu2 }
 0x30a   : > { %v2368_v16 = vpop.f32.mrf.mxu3 }
 0x30b   : > { %v6071_v2 = vadd.f32 %v2368_v16, %v2280_v49  ;;  %v6674_v49 = vld [vmem:[#allocation46_spill] sm:$0xff] }
 0x30c   : > { %v2288_v16 = vadd.f32 %v6674_v49, %v5959_v24  ;;  %v2295_v49 = vadd.f32 %v5860_v6, %v5992_v13  ;;  %v2303_v6 = vadd.f32 %v5899_v23, %v6021_v11  ;;  %v6136_v23 = vld [vmem:[%s6527_s6] ss:$0 sm:$0xff] }
 0x30f   : > { %2747 = vmatmul.bf16.gmra.mxu2 %v6669_v26  ;;  %2880 = vmatmul.bf16.gmra.mxu3 %v6670_v7  ;;  %v6675_v7 = vld [vmem:[#allocation47_spill] sm:$0xff] }
 0x310   : > { %v2290_v30 = vadd.f32 %v6675_v7, %v5967_v54 }
 0x312   : > { %v2371_v47 = vpop.f32.mrf.mxu3 }
 0x313   : > { %v6077_v29 = vadd.f32 %v2371_v47, %v2283_v58  ;;  %v6091_v47 = vpop.f32.mrf.mxu2 }
 0x31a   : > { %v2373_v48 = vpop.f32.mrf.mxu3 }
 0x31b   : > { %v6083_v56 = vadd.f32 %v2373_v48, %v2285_v18  ;;  %v6097_v9 = vpop.f32.mrf.mxu2  ;;  %v6676_v18 = vld [vmem:[#allocation35_spill] sm:$0xff] }
 0x31f   : > { %2752 = vmatmul.bf16.gmra.mxu2 %v6673_v45  ;;  %2885 = vmatmul.bf16.gmra.mxu3 %v5551_v12  ;;  %v6677_v12 = vld [vmem:[#allocation49_spill] sm:$0xff] }
 0x320   : > { %v2293_v24 = vadd.f32 %v6677_v12, %v5982_v0 }
 0x322   : > { %v2376_v26 = vpop.f32.mrf.mxu3 }
 0x323   : > { %v6089_v28 = vadd.f32 %v2376_v26, %v2288_v16  ;;  %v2298_v26 = vadd.f32 %v5875_v59, %v6004_v37 }
 0x32a   : > { %v2378_v4 = vpop.f32.mrf.mxu3 }
 0x32b   : > { %v6095_v58 = vadd.f32 %v2378_v4, %v2290_v30 }
 0x32f   : > { %2757 = vmatmul.bf16.gmra.mxu2 %v6676_v18  ;;  %2890 = vmatmul.bf16.gmra.mxu3 %v5603_v5  ;;  %v6679_v5 = vld [vmem:[#allocation50_spill] sm:$0xff] }
 0x330   : > { %v2300_v0 = vadd.f32 %v6679_v5, %v6012_v34  ;;  %v6129_v34 = vpop.f32.mrf.mxu2 }
 0x332   : > { %v2381_v48 = vpop.f32.mrf.mxu3 }
 0x333   : > { %v6103_v45 = vadd.f32 %v2381_v48, %v2293_v24  ;;  %v6127_v24 = vpop.f32.mrf.mxu0 }
 0x33a   : > { %v2383_v16 = vpop.f32.mrf.mxu3 }
 0x33b   : > { %v6107_v54 = vadd.f32 %v2383_v16, %v2295_v49  ;;  %v6139_v11 = vpop.f32.mrf.mxu0  ;;  %v6142_v16 = vpop.f32.mrf.mxu2 }
 0x33f   : > { %2895 = vmatmul.bf16.gmra.mxu3 %v5635_v39  ;;  %v2305_v39 = vadd.f32 %v5913_v36, %v6029_v46 }
 0x342   : > { %v2386_v7 = vpop.f32.mrf.mxu3 }
 0x343   : > { %v6112_v30 = vadd.f32 %v2386_v7, %v2298_v26  ;;  %v2780_v26 = vadd.f32 %v5942_v40, %v2690_v43  ;;  %v6153_v43 = vpop.f32.mrf.mxu1 }
 0x345   : > { %6678 = vst [vmem:[#allocation16_spill] sm:$0xff] %v6112_v30 }
 0x34a   : > { %v2388_v4 = vpop.f32.mrf.mxu3 }
 0x34b   : > { %v6116_v18 = vadd.f32 %v2388_v4, %v2300_v0  ;;  %v2783_v4 = vadd.f32 %v5954_v33, %v2693_v19  ;;  %v2785_v33 = vadd.f32 %v5969_v44, %v6081_v61 }
 0x34d   : > { %6680 = vst [vmem:[#allocation5_spill] sm:$0xff] %v6116_v18 }
 0x34f   : > { %2900 = vmatmul.bf16.gmra.mxu3 %v5665_v15  ;;  %v2778_v15 = vadd.f32 %v5926_v38, %v2688_v22 }
 0x352   : > { %v2391_v13 = vpop.f32.mrf.mxu3 }
 0x353   : > { %v6121_v12 = vadd.f32 %v2391_v13, %v2303_v6  ;;  %v6151_v13 = vpop.f32.mrf.mxu2 }
 0x355   : > { %6681 = vst [vmem:[#allocation12_spill] sm:$0xff] %v6121_v12 }
 0x35a   : > { %v2393_v59 = vpop.f32.mrf.mxu3 }
 0x35b   : > { %v6125_v37 = vadd.f32 %v2393_v59, %v2305_v39 }
 0x35d   : > { %6682 = vst [vmem:[#allocation18_spill] sm:$0xff] %v6125_v37 }
 0x35f   : > { %2905 = vmatmul.bf16.gmra.mxu3 %v5693_v51 }
 0x362   : > { %v2866_v48 = vpop.f32.mrf.mxu3 }
 0x363   : > { %v2867_v49 = vadd.f32 %v2866_v48, %v2778_v15 }
 0x365   : > { %v2946_v36 = vadd.f32 %v2867_v49, %v5896_v55  ;;  %v6148_v55 = vpop.f32.mrf.mxu0 }
 0x367   : > { %v2982_v46 = vadd.f32 %v6136_v23, %v2946_v36 }
 0x369   : > { %v3014_v51 = vmin.f32 %v2982_v46, 20.0 }
 0x36a   : > { %v2868_v7 = vpop.f32.mrf.mxu3 }
 0x36b   : > { %v3046_v38 = vmul.f32 1.442695, %v3014_v51  ;;  %v2869_v22 = vadd.f32 %v2868_v7, %v2780_v26 }
 0x36d   : > { %4636 = vpow2.f32 %v3046_v38  ;;  %v2947_v5 = vadd.f32 %v2869_v22, %v5906_v1  ;;  %v6162_v7 = vpop.f32.mrf.mxu0 }
 0x36f   : > { %v2983_v0 = vadd.f32 %v6136_v23, %v2947_v5  ;;  %2910 = vmatmul.bf16.gmra.mxu3 %v6634_v52  ;;  %v6164_v5 = vpop.f32.mrf.mxu2 }
 0x371   : > { %v3015_v6 = vmin.f32 %v2983_v0, 20.0 }
 0x372   : > { %v2871_v39 = vpop.f32.mrf.mxu3 }
 0x373   : > { %v4637_v40 = vpop.eup %4636  ;;  %v3048_v59 = vmul.f32 1.442695, %v3015_v6  ;;  %v2872_v15 = vadd.f32 %v2871_v39, %v2783_v4  ;;  %v6166_v4 = vpop.f32.mrf.mxu1  ;;  %v6683_v6 = vld [vmem:[#allocation51_spill] sm:$0xff] }
 0x374   : > { %v3110_v48 = vadd.f32 2.0, %v4637_v40 }
 0x375   : > { %4638 = vpow2.f32 %v3048_v59  ;;  %v2948_v1 = vadd.f32 %v2872_v15, %v5918_v42  ;;  %v2788_v59 = vadd.f32 %v5986_v17, %v6091_v47 }
 0x376   : > { %v3142_v49 = vmul.f32 %v4637_v40, %v3110_v48 }
 0x377   : > { %v6157_v52 = vadd.f32 %v6136_v23, %v2948_v1 }
 0x378   : > { %v3206_v36 = vadd.f32 2.0, %v3142_v49 }
 0x379   : > { %v3016_v19 = vmin.f32 %v6157_v52, 20.0 }
 0x37a   : > { %v2873_v26 = vpop.f32.mrf.mxu3 }
 0x37b   : > { %v4639_v51 = vpop.eup %4638  ;;  %v3050_v38 = vmul.f32 1.442695, %v3016_v19  ;;  %v2874_v22 = vadd.f32 %v2873_v26, %v2785_v33  ;;  %v465_v33 = vld [vmem:[%s4891_s28] sm:$0xff]   ;;  %v6182_v47 = vpop.f32.mrf.mxu1 }
 0x37c   : > { %v3111_v42 = vadd.f32 2.0, %v4639_v51  ;;  %v3303_v12 = vunpack.c.h.bf16 %v465_v33 }
 0x37d   : > { %4640 = vpow2.f32 %v3050_v38  ;;  %v2949_v39 = vadd.f32 %v2874_v22, %v6683_v6  ;;  %v3174_v22 = vmul.f32 %v3142_v49, %v2982_v46  ;;  %v6180_v6 = vpop.f32.mrf.mxu2  ;;  %v2790_v46 = vadd.f32 %v5998_v63, %v6097_v9  ;;  %v6685_v63 = vld [vmem:[#allocation9_spill] sm:$0xff] }
 0x37e   : > { %4642 = vrcp.f32 %v3206_v36  ;;  %v3143_v44 = vmul.f32 %v4639_v51, %v3111_v42  ;;  %v6177_v51 = vpop.f32.mrf.mxu0  ;;  %v6684_v42 = vld [vmem:[#allocation4_spill] sm:$0xff] }
 0x37f   : > { %v6170_v61 = vadd.f32 %v6136_v23, %v2949_v39  ;;  %2915 = vmatmul.bf16.gmra.mxu3 %v5739_v25  ;;  %v3302_v39 = vunpack.c.l.bf16 %v465_v33 }
 0x380   : > { %v3207_v40 = vadd.f32 2.0, %v3143_v44  ;;  %v3175_v37 = vmul.f32 %v3143_v44, %v2983_v0 }
 0x381   : > { %v3017_v15 = vmin.f32 %v6170_v61, 20.0 }
 0x382   : > { %4644 = vrcp.f32 %v3207_v40  ;;  %v2876_v48 = vpop.f32.mrf.mxu3 }
 0x383   : > { %v4641_v1 = vpop.eup %4640  ;;  %v3052_v19 = vmul.f32 1.442695, %v3017_v15  ;;  %v2877_v26 = vadd.f32 %v2876_v48, %v2788_v59 }
 0x384   : > { %v4643_v38 = vpop.eup %4642  ;;  %v3112_v36 = vadd.f32 2.0, %v4641_v1 }
 0x385   : > { %4646 = vpow2.f32 %v3052_v19  ;;  %v2950_v25 = vadd.f32 %v2877_v26, %v6684_v42  ;;  %v3270_v40 = vmul.f32 %v4643_v38, %v3174_v22  ;;  %v6204_v38 = vpop.f32.mrf.mxu2 }
 0x386   : > { %v3144_v17 = vmul.f32 %v4641_v1, %v3112_v36  ;;  %v6197_v33 = vpop.f32.mrf.mxu0 }
 0x387   : > { %v6185_v59 = vadd.f32 %v6136_v23, %v2950_v25  ;;  %v3334_v1 = vadd.f32 %v3302_v39, %v3270_v40  ;;  %v6206_v25 = vpop.f32.mrf.mxu1 }
 0x388   : > { %v4645_v15 = vpop.eup %4644  ;;  %v3208_v19 = vadd.f32 2.0, %v3144_v17 }
 0x389   : > { %v3271_v49 = vmul.f32 %v4645_v15, %v3175_v37  ;;  %v3018_v48 = vmin.f32 %v6185_v59, 20.0  ;;  %v467_v15 = vld [vmem:[%s4891_s28 + $0x8] sm:$0xff]  }
 0x38a   : > { %v2878_v26 = vpop.f32.mrf.mxu3 }
 0x38b   : > { %v4647_v42 = vpop.eup %4646  ;;  %v3335_v36 = vadd.f32 %v3303_v12, %v3271_v49  ;;  %v3054_v18 = vmul.f32 1.442695, %v3018_v48  ;;  %v2879_v30 = vadd.f32 %v2878_v26, %v2790_v46 }
 0x38c   : > { %v3113_v0 = vadd.f32 2.0, %v4647_v42 }
 0x38d   : > { %v4357_v44 = vpack.c.bf16 %v3335_v36, %v3334_v1  ;;  %4648 = vpow2.f32 %v3054_v18  ;;  %v2951_v9 = vadd.f32 %v2879_v30, %v6685_v63  ;;  %v2793_v18 = vadd.f32 %v6127_v24, %v6129_v34 }
 0x38e   : > { %4650 = vrcp.f32 %v3208_v19  ;;  %v3145_v37 = vmul.f32 %v4647_v42, %v3113_v0  ;;  %v3304_v42 = vunpack.c.l.bf16 %v467_v15  ;;  %v3305_v34 = vunpack.c.h.bf16 %v467_v15  ;;  %v6218_v63 = vpop.f32.mrf.mxu0 }
 0x38f   : > { %4358 = vst [vmem:[%s6194_s21] sm:$0xff] %v4357_v44   ;;  %v6201_v12 = vadd.f32 %v6136_v23, %v2951_v9  ;;  %2920 = vmatmul.bf16.gmra.mxu3 %v5762_v21  ;;  %v3176_v21 = vmul.f32 %v3144_v17, %v6157_v52  ;;  %v2795_v9 = vadd.f32 %v6139_v11, %v6142_v16 }
 0x390   : > { %v3209_v22 = vadd.f32 2.0, %v3145_v37  ;;  %v3177_v24 = vmul.f32 %v3145_v37, %v6170_v61  ;;  %v6225_v61 = vpop.f32.mrf.mxu1 }
 0x391   : > { %v3019_v30 = vmin.f32 %v6201_v12, 20.0 }
 0x392   : > { %4652 = vrcp.f32 %v3209_v22  ;;  %v2881_v39 = vpop.f32.mrf.mxu3 }
 0x393   : > { %v4649_v40 = vpop.eup %4648  ;;  %v3056_v46 = vmul.f32 1.442695, %v3019_v30  ;;  %v2882_v49 = vadd.f32 %v2881_v39, %v2793_v18 }
 0x394   : > { %v4651_v48 = vpop.eup %4650  ;;  %v3114_v19 = vadd.f32 2.0, %v4649_v40 }
 0x395   : > { %4654 = vpow2.f32 %v3056_v46  ;;  %v2952_v26 = vadd.f32 %v2882_v49, %v5961_v31  ;;  %v3272_v36 = vmul.f32 %v4651_v48, %v3176_v21  ;;  %v6223_v31 = vpop.f32.mrf.mxu2 }
 0x396   : > { %v3146_v1 = vmul.f32 %v4649_v40, %v3114_v19  ;;  %v6233_v19 = vld [vmem:[#allocation2 + $0x68] sm:$0xff] }
 0x397   : > { %v6216_v0 = vadd.f32 %v6136_v23, %v2952_v26  ;;  %v3336_v37 = vadd.f32 %v3304_v42, %v3272_v36  ;;  %v2798_v26 = vadd.f32 %v6148_v55, %v6151_v13  ;;  %v1429_v36 = vshrl.u32 %v6233_v19, 16  ;;  %2851 = vmatmul.bf16.gmra.mxu0 %v6233_v19 }
 0x398   : > { %v4653_v44 = vpop.eup %4652  ;;  %v3210_v17 = vadd.f32 2.0, %v3146_v1 }
 0x399   : > { %v3273_v22 = vmul.f32 %v4653_v44, %v3177_v24  ;;  %v3020_v52 = vmin.f32 %v6216_v0, 20.0  ;;  %v6242_v44 = vpop.f32.mrf.mxu0  ;;  %v1431_v13 = vrot.slane %v1429_v36, 7 }
 0x39a   : > { %v2883_v18 = vpop.f32.mrf.mxu3 }
 0x39b   : > { %v4655_v30 = vpop.eup %4654  ;;  %v3337_v39 = vadd.f32 %v3305_v34, %v3273_v22  ;;  %v3058_v40 = vmul.f32 1.442695, %v3020_v52  ;;  %v2884_v15 = vadd.f32 %v2883_v18, %v2795_v9  ;;  %v2426_v34 = vadd.f32 %v6153_v43, %v5984_v32 }
 0x39c   : > { %v3115_v46 = vadd.f32 2.0, %v4655_v30  ;;  %v1432_v18 = vshll.u32 %v6233_v19, 16 }
 0x39d   : > { %v4362_v49 = vpack.c.bf16 %v3337_v39, %v3336_v37  ;;  %4656 = vpow2.f32 %v3058_v40  ;;  %v2953_v11 = vadd.f32 %v2884_v15, %v5971_v62  ;;  %v3178_v37 = vmul.f32 %v3146_v1, %v6185_v59 }
 0x39e   : > { %4658 = vrcp.f32 %v3210_v17  ;;  %v3147_v16 = vmul.f32 %v4655_v30, %v3115_v46  ;;  %v6245_v17 = vpop.f32.mrf.mxu2  ;;  %v6250_v30 = vpop.f32.mrf.mxu1  ;;  %v1434_v40 = vor.u32 %v1432_v18, %v1431_v13  ;;  %v2800_v59 = vadd.f32 %v6162_v7, %v6164_v5 }
 0x39f   : > { %4450 = vst [vmem:[%s6194_s21 + $0x8] sm:$0xff] %v4362_v49   ;;  %v6230_v48 = vadd.f32 %v6136_v23, %v2953_v11  ;;  %2925 = vmatmul.bf16.gmra.mxu3 %v5787_v10  ;;  %v469_v10 = vld [vmem:[%s4891_s28 + $0x10] sm:$0xff]  }
 0x3a0   : > { %v3211_v21 = vadd.f32 2.0, %v3147_v16  ;;  %v3306_v43 = vunpack.c.l.bf16 %v469_v10  ;;  %v3179_v46 = vmul.f32 %v3147_v16, %v6201_v12  ;;  %v3307_v49 = vunpack.c.h.bf16 %v469_v10 }
 0x3a1   : > { %v3021_v42 = vmin.f32 %v6230_v48, 20.0  ;;  %v6266_v13 = vpop.f32.mrf.mxu0 }
 0x3a2   : > { %4660 = vrcp.f32 %v3211_v21  ;;  %v2886_v62 = vpop.f32.mrf.mxu3 }
 0x3a3   : > { %v4657_v24 = vpop.eup %4656  ;;  %v3060_v9 = vmul.f32 1.442695, %v3021_v42  ;;  %v2887_v22 = vadd.f32 %v2886_v62, %v2798_v26  ;;  %v1473_v42 = vsel %vm5001_vm2, 0, %v1434_v40  ;;  %v2803_v40 = vadd.f32 %v6177_v51, %v6180_v6  ;;  %v471_v26 = vld [vmem:[%s4891_s28 + $0x18] sm:$0xff]  }
 0x3a4   : > { %v4659_v52 = vpop.eup %4658  ;;  %v3116_v55 = vadd.f32 2.0, %v4657_v24  ;;  %2762 = vmatmul.bf16.gmra.mxu2 %v1473_v42 }
 0x3a5   : > { %4662 = vpow2.f32 %v3060_v9  ;;  %v2954_v32 = vadd.f32 %v2887_v22, %v2426_v34  ;;  %v3274_v15 = vmul.f32 %v4659_v52, %v3178_v37 }
 0x3a6   : > { %v3148_v39 = vmul.f32 %v4657_v24, %v3116_v55  ;;  %v2428_v24 = vadd.f32 %v6166_v4, %v5994_v8  ;;  %v6268_v5 = vpop.f32.mrf.mxu2  ;;  %v6270_v8 = vpop.f32.mrf.mxu1 }
 0x3a7   : > { %v6257_v11 = vadd.f32 %v6136_v23, %v2954_v32  ;;  %v3338_v10 = vadd.f32 %v3306_v43, %v3274_v15 }
 0x3a8   : > { %v4661_v21 = vpop.eup %4660  ;;  %v3212_v34 = vadd.f32 2.0, %v3148_v39 }
 0x3a9   : > { %v3275_v1 = vmul.f32 %v4661_v21, %v3179_v46  ;;  %v3022_v62 = vmin.f32 %v6257_v11, 20.0  ;;  %v2431_v21 = vadd.f32 %v6182_v47, %v6006_v20  ;;  %v6284_v51 = vpop.f32.mrf.mxu0 }
 0x3aa   : > { %v2888_v12 = vpop.f32.mrf.mxu3 }
 0x3ab   : > { %v4663_v16 = vpop.eup %4662  ;;  %v3339_v9 = vadd.f32 %v3307_v49, %v3275_v1  ;;  %v3062_v22 = vmul.f32 1.442695, %v3022_v62  ;;  %v2889_v52 = vadd.f32 %v2888_v12, %v2800_v59 }
 0x3ac   : > { %v3117_v55 = vadd.f32 2.0, %v4663_v16 }
 0x3ad   : > { %v4367_v37 = vpack.c.bf16 %v3339_v9, %v3338_v10  ;;  %4664 = vpow2.f32 %v3062_v22  ;;  %v2955_v7 = vadd.f32 %v2889_v52, %v2428_v24  ;;  %v3180_v24 = vmul.f32 %v3148_v39, %v6216_v0 }
 0x3ae   : > { %4666 = vrcp.f32 %v3212_v34  ;;  %v3149_v32 = vmul.f32 %v4663_v16, %v3117_v55  ;;  %v3308_v34 = vunpack.c.l.bf16 %v471_v26  ;;  %v3309_v10 = vunpack.c.h.bf16 %v471_v26  ;;  %v6290_v47 = vpop.f32.mrf.mxu2  ;;  %v6292_v22 = vpop.f32.mrf.mxu1  ;;  %v6687_v26 = vld [vmem:[#allocation48_spill] sm:$0xff] }
 0x3af   : > { %4451 = vst [vmem:[%s6194_s21 + $0x10] sm:$0xff] %v4367_v37   ;;  %v6274_v4 = vadd.f32 %v6136_v23, %v2955_v7  ;;  %2930 = vmatmul.bf16.gmra.mxu3 %v5824_v57  ;;  %v2805_v0 = vadd.f32 %v6197_v33, %v6204_v38  ;;  %v2433_v55 = vadd.f32 %v6206_v25, %v6014_v14 }
 0x3b0   : > { %v3213_v43 = vadd.f32 2.0, %v3149_v32  ;;  %v3181_v16 = vmul.f32 %v3149_v32, %v6230_v48 }
 0x3b1   : > { %v3023_v15 = vmin.f32 %v6274_v4, 20.0  ;;  %v6304_v25 = vpop.f32.mrf.mxu0 }
 0x3b2   : > { %4668 = vrcp.f32 %v3213_v43  ;;  %v2891_v46 = vpop.f32.mrf.mxu3 }
 0x3b3   : > { %v4665_v49 = vpop.eup %4664  ;;  %v3064_v42 = vmul.f32 1.442695, %v3023_v15  ;;  %v2892_v59 = vadd.f32 %v2891_v46, %v2803_v40 }
 0x3b4   : > { %v4667_v1 = vpop.eup %4666  ;;  %v3118_v62 = vadd.f32 2.0, %v4665_v49 }
 0x3b5   : > { %4670 = vpow2.f32 %v3064_v42  ;;  %v2956_v57 = vadd.f32 %v2892_v59, %v2431_v21  ;;  %v3276_v6 = vmul.f32 %v4667_v1, %v3180_v24  ;;  %v2808_v42 = vadd.f32 %v6218_v63, %v6223_v31 }
 0x3b6   : > { %v3150_v12 = vmul.f32 %v4665_v49, %v3118_v62  ;;  %v6309_v1 = vpop.f32.mrf.mxu2  ;;  %v1508_v63 = vrot.slane %v1432_v18, 1  ;;  %v2810_v18 = vadd.f32 %v6242_v44, %v6245_v17 }
 0x3b7   : > { %v6288_v9 = vadd.f32 %v6136_v23, %v2956_v57  ;;  %v3340_v32 = vadd.f32 %v3308_v34, %v3276_v6  ;;  %v2436_v57 = vadd.f32 %v6225_v61, %v6023_v53  ;;  %v6313_v34 = vpop.f32.mrf.mxu1  ;;  %v473_v6 = vld [vmem:[%s4891_s28 + $0x20] sm:$0xff]  }
 0x3b8   : > { %v4669_v20 = vpop.eup %4668  ;;  %v3214_v48 = vadd.f32 2.0, %v3150_v12  ;;  %v3182_v31 = vmul.f32 %v3150_v12, %v6257_v11  ;;  %v3311_v53 = vunpack.c.h.bf16 %v473_v6  ;;  %v2438_v12 = vadd.f32 %v6250_v30, %v6031_v50 }
 0x3b9   : > { %v3277_v39 = vmul.f32 %v4669_v20, %v3181_v16  ;;  %v3024_v52 = vmin.f32 %v6288_v9, 20.0 }
 0x3ba   : > { %v2893_v37 = vpop.f32.mrf.mxu3 }
 0x3bb   : > { %v4671_v7 = vpop.eup %4670  ;;  %v3341_v43 = vadd.f32 %v3309_v10, %v3277_v39  ;;  %v3066_v40 = vmul.f32 1.442695, %v3024_v52  ;;  %v2894_v15 = vadd.f32 %v2893_v37, %v2805_v0  ;;  %v3310_v52 = vunpack.c.l.bf16 %v473_v6 }
 0x3bc   : > { %v3119_v46 = vadd.f32 2.0, %v4671_v7 }
 0x3bd   : > { %v4372_v49 = vpack.c.bf16 %v3341_v43, %v3340_v32  ;;  %4672 = vpow2.f32 %v3066_v40  ;;  %v2957_v21 = vadd.f32 %v2894_v15, %v2433_v55  ;;  %v1509_v32 = vor.u32 %v1508_v63, %v1429_v36 }
 0x3be   : > { %4674 = vrcp.f32 %v3214_v48  ;;  %v3151_v33 = vmul.f32 %v4671_v7, %v3119_v46  ;;  %v6330_v46 = vpop.f32.mrf.mxu0  ;;  %v6332_v36 = vpop.f32.mrf.mxu2 }
 0x3bf   : > { %4452 = vst [vmem:[%s6194_s21 + $0x18] sm:$0xff] %v4372_v49   ;;  %v6301_v38 = vadd.f32 %v6136_v23, %v2957_v21  ;;  %2935 = vmatmul.bf16.gmra.mxu3 %v6687_v26  ;;  %v1548_v17 = vsel %vm5337_vm5, %v1509_v32, 0 }
 0x3c0   : > { %v3215_v14 = vadd.f32 2.0, %v3151_v33  ;;  %v3183_v37 = vmul.f32 %v3151_v33, %v6274_v4 }
 0x3c1   : > { %v3025_v59 = vmin.f32 %v6301_v38, 20.0 }
 0x3c2   : > { %4676 = vrcp.f32 %v3215_v14  ;;  %v2896_v62 = vpop.f32.mrf.mxu3  ;;  %v6336_v14 = vpop.f32.mrf.mxu1 }
 0x3c3   : > { %v4673_v24 = vpop.eup %4672  ;;  %v3068_v16 = vmul.f32 1.442695, %v3025_v59  ;;  %v2897_v10 = vadd.f32 %v2896_v62, %v2808_v42 }
 0x3c4   : > { %v4675_v20 = vpop.eup %4674  ;;  %v3120_v0 = vadd.f32 2.0, %v4673_v24 }
 0x3c5   : > { %4678 = vpow2.f32 %v3068_v16  ;;  %v2958_v39 = vadd.f32 %v2897_v10, %v2436_v57  ;;  %v3278_v48 = vmul.f32 %v4675_v20, %v3182_v31  ;;  %v2441_v10 = vadd.f32 %v6270_v8, %v6037_v35  ;;  %v475_v20 = vld [vmem:[%s4891_s28 + $0x28] sm:$0xff]  }
 0x3c6   : > { %v3152_v55 = vmul.f32 %v4673_v24, %v3120_v0  ;;  %v2813_v24 = vadd.f32 %v6266_v13, %v6268_v5  ;;  %v6351_v13 = vpop.f32.mrf.mxu2  ;;  %v3312_v5 = vunpack.c.l.bf16 %v475_v20  ;;  %v3313_v8 = vunpack.c.h.bf16 %v475_v20 }
 0x3c7   : > { %v6321_v61 = vadd.f32 %v6136_v23, %v2958_v39  ;;  %v3342_v49 = vadd.f32 %v3310_v52, %v3278_v48  ;;  %v6348_v52 = vpop.f32.mrf.mxu0 }
 0x3c8   : > { %v4677_v7 = vpop.eup %4676  ;;  %v3216_v40 = vadd.f32 2.0, %v3152_v55  ;;  %v3184_v48 = vmul.f32 %v3152_v55, %v6288_v9 }
 0x3c9   : > { %v3279_v43 = vmul.f32 %v4677_v7, %v3183_v37  ;;  %v3026_v11 = vmin.f32 %v6321_v61, 20.0 }
 0x3ca   : > { %v2898_v15 = vpop.f32.mrf.mxu3  ;;  %v6353_v7 = vpop.f32.mrf.mxu1 }
 0x3cb   : > { %v4679_v4 = vpop.eup %4678  ;;  %v3343_v21 = vadd.f32 %v3311_v53, %v3279_v43  ;;  %v3070_v33 = vmul.f32 1.442695, %v3026_v11  ;;  %v2899_v19 = vadd.f32 %v2898_v15, %v2810_v18  ;;  %v2815_v11 = vadd.f32 %v6284_v51, %v6290_v47 }
 0x3cc   : > { %v3121_v26 = vadd.f32 2.0, %v4679_v4 }
 0x3cd   : > { %v4377_v50 = vpack.c.bf16 %v3343_v21, %v3342_v49  ;;  %4680 = vpow2.f32 %v3070_v33  ;;  %v2959_v30 = vadd.f32 %v2899_v19, %v2438_v12  ;;  %v2443_v12 = vadd.f32 %v6292_v22, %v6041_v41 }
 0x3ce   : > { %4682 = vrcp.f32 %v3216_v40  ;;  %v3153_v42 = vmul.f32 %v4679_v4, %v3121_v26  ;;  %v6370_v41 = vpop.f32.mrf.mxu2 }
 0x3cf   : > { %4453 = vst [vmem:[%s6194_s21 + $0x20] sm:$0xff] %v4377_v50   ;;  %v6340_v59 = vadd.f32 %v6136_v23, %v2959_v30  ;;  %2940 = vmatmul.bf16.gmra.mxu3 %v1548_v17  ;;  %v6364_v47 = vpop.f32.mrf.mxu0  ;;  %v2818_v30 = vadd.f32 %v6304_v25, %v6309_v1 }
 0x3d0   : > { %v3217_v62 = vadd.f32 2.0, %v3153_v42  ;;  %v3185_v35 = vmul.f32 %v3153_v42, %v6301_v38 }
 0x3d1   : > { %v3027_v57 = vmin.f32 %v6340_v59, 20.0 }
 0x3d2   : > { %4684 = vrcp.f32 %v3217_v62  ;;  %v2901_v6 = vpop.f32.mrf.mxu3  ;;  %v6372_v50 = vpop.f32.mrf.mxu1 }
 0x3d3   : > { %v4681_v16 = vpop.eup %4680  ;;  %v3072_v0 = vmul.f32 1.442695, %v3027_v57  ;;  %v2902_v63 = vadd.f32 %v2901_v6, %v2813_v24  ;;  %v2446_v57 = vadd.f32 %v6313_v34, %v6047_v27  ;;  %v477_v6 = vld [vmem:[%s4891_s28 + $0x30] sm:$0xff]   ;;  %v2820_v34 = vadd.f32 %v6330_v46, %v6332_v36 }
 0x3d4   : > { %v4683_v31 = vpop.eup %4682  ;;  %v3122_v39 = vadd.f32 2.0, %v4681_v16 }
 0x3d5   : > { %4686 = vpow2.f32 %v3072_v0  ;;  %v2960_v37 = vadd.f32 %v2902_v63, %v2441_v10  ;;  %v3280_v32 = vmul.f32 %v4683_v31, %v3184_v48 }
 0x3d6   : > { %v3154_v53 = vmul.f32 %v4681_v16, %v3122_v39  ;;  %v3314_v39 = vunpack.c.l.bf16 %v477_v6 }
 0x3d7   : > { %v6357_v18 = vadd.f32 %v6136_v23, %v2960_v37  ;;  %v3344_v49 = vadd.f32 %v3312_v5, %v3280_v32  ;;  %v3315_v37 = vunpack.c.h.bf16 %v477_v6  ;;  %v6385_v27 = vpop.f32.mrf.mxu0 }
 0x3d8   : > { %v4685_v43 = vpop.eup %4684  ;;  %v3218_v40 = vadd.f32 2.0, %v3154_v53  ;;  %v3186_v63 = vmul.f32 %v3154_v53, %v6321_v61  ;;  %v2448_v53 = vadd.f32 %v6336_v14, %v6051_v3 }
 0x3d9   : > { %v3281_v9 = vmul.f32 %v4685_v43, %v3185_v35  ;;  %v3028_v55 = vmin.f32 %v6357_v18, 20.0 }
 0x3da   : > { %v2903_v15 = vpop.f32.mrf.mxu3 }
 0x3db   : > { %v4687_v4 = vpop.eup %4686  ;;  %v3345_v38 = vadd.f32 %v3313_v8, %v3281_v9  ;;  %v3074_v21 = vmul.f32 1.442695, %v3028_v55  ;;  %v2904_v33 = vadd.f32 %v2903_v15, %v2815_v11  ;;  %v6392_v8 = vpop.f32.mrf.mxu2 }
 0x3dc   : > { %v3123_v19 = vadd.f32 2.0, %v4687_v4  ;;  %v6394_v9 = vpop.f32.mrf.mxu1 }
 0x3dd   : > { %v4382_v26 = vpack.c.bf16 %v3345_v38, %v3344_v49  ;;  %4688 = vpow2.f32 %v3074_v21  ;;  %v2961_v44 = vadd.f32 %v2904_v33, %v2443_v12  ;;  %v2823_v38 = vadd.f32 %v6348_v52, %v6351_v13 }
 0x3de   : > { %4690 = vrcp.f32 %v3218_v40  ;;  %v3155_v51 = vmul.f32 %v4687_v4, %v3123_v19 }
 0x3df   : > { %4454 = vst [vmem:[%s6194_s21 + $0x28] sm:$0xff] %v4382_v26   ;;  %v6368_v17 = vadd.f32 %v6136_v23, %v2961_v44  ;;  %v2451_v26 = vadd.f32 %v6353_v7, %v6057_v60  ;;  %v6405_v44 = vpop.f32.mrf.mxu0 }
 0x3e0   : > { %v3219_v22 = vadd.f32 2.0, %v3155_v51  ;;  %v3187_v1 = vmul.f32 %v3155_v51, %v6340_v59  ;;  %v479_v51 = vld [vmem:[%s4891_s28 + $0x38] sm:$0xff]  }
 0x3e1   : > { %v3029_v42 = vmin.f32 %v6368_v17, 20.0  ;;  %v3316_v13 = vunpack.c.l.bf16 %v479_v51 }
 0x3e2   : > { %4692 = vrcp.f32 %v3219_v22  ;;  %v2906_v62 = vpop.f32.mrf.mxu3 }
 0x3e3   : > { %v4689_v24 = vpop.eup %4688  ;;  %v3076_v16 = vmul.f32 1.442695, %v3029_v42  ;;  %v2907_v10 = vadd.f32 %v2906_v62, %v2818_v30  ;;  %v2740_v62 = vpop.f32.mrf.mxu2 }
 0x3e4   : > { %v4691_v20 = vpop.eup %4690  ;;  %v3124_v0 = vadd.f32 2.0, %v4689_v24 }
 0x3e5   : > { %4694 = vpow2.f32 %v3076_v16  ;;  %v2962_v31 = vadd.f32 %v2907_v10, %v2446_v57  ;;  %v3282_v25 = vmul.f32 %v4691_v20, %v3186_v63  ;;  %v2457_v57 = vpop.f32.mrf.mxu1  ;;  %v2825_v63 = vadd.f32 %v6364_v47, %v6370_v41 }
 0x3e6   : > { %v3156_v48 = vmul.f32 %v4689_v24, %v3124_v0  ;;  %v3317_v0 = vunpack.c.h.bf16 %v479_v51 }
 0x3e7   : > { %v6383_v5 = vadd.f32 %v6136_v23, %v2962_v31  ;;  %v3346_v55 = vadd.f32 %v3314_v39, %v3282_v25  ;;  %v6689_v25 = vld [vmem:[#allocation13_spill] sm:$0xff] }
 0x3e8   : > { %v4693_v32 = vpop.eup %4692  ;;  %v3220_v59 = vadd.f32 2.0, %v3156_v48  ;;  %v3188_v6 = vmul.f32 %v3156_v48, %v6357_v18  ;;  %v2453_v18 = vadd.f32 %v6372_v50, %v6689_v25 }
 0x3e9   : > { %v3283_v35 = vmul.f32 %v4693_v32, %v3187_v1  ;;  %v3030_v61 = vmin.f32 %v6383_v5, 20.0 }
 0x3ea   : > { %v2908_v43 = vpop.f32.mrf.mxu3 }
 0x3eb   : > { %v4695_v11 = vpop.eup %4694  ;;  %v3347_v12 = vadd.f32 %v3315_v37, %v3283_v35  ;;  %v3078_v40 = vmul.f32 1.442695, %v3030_v61  ;;  %v2909_v15 = vadd.f32 %v2908_v43, %v2820_v34  ;;  %v2743_v41 = vpop.f32.mrf.mxu2 }
 0x3ec   : > { %v3125_v4 = vadd.f32 2.0, %v4695_v11 }
 0x3ed   : > { %v4387_v46 = vpack.c.bf16 %v3347_v12, %v3346_v55  ;;  %4696 = vpow2.f32 %v3078_v40  ;;  %v2963_v36 = vadd.f32 %v2909_v15, %v2448_v53  ;;  %v2832_v53 = vpop.f32.mrf.mxu0  ;;  %v2828_v12 = vadd.f32 %v6385_v27, %v6392_v8 }
 0x3ee   : > { %4698 = vrcp.f32 %v3220_v59  ;;  %v3157_v49 = vmul.f32 %v4695_v11, %v3125_v4  ;;  %v2460_v11 = vpop.f32.mrf.mxu1 }
 0x3ef   : > { %4455 = vst [vmem:[%s6194_s21 + $0x30] sm:$0xff] %v4387_v46   ;;  %v6398_v3 = vadd.f32 %v6136_v23, %v2963_v36  ;;  %v6690_v46 = vld [vmem:[#allocation39_spill] sm:$0xff] }
 0x3f0   : > { %v3221_v14 = vadd.f32 2.0, %v3157_v49  ;;  %v3189_v20 = vmul.f32 %v3157_v49, %v6368_v17  ;;  %v2456_v36 = vadd.f32 %v6394_v9, %v6690_v46  ;;  %v481_v49 = vld [vmem:[%s4891_s28 + $0x40] sm:$0xff]  }
 0x3f1   : > { %v3031_v21 = vmin.f32 %v6398_v3, 20.0  ;;  %v3318_v51 = vunpack.c.l.bf16 %v481_v49 }
 0x3f2   : > { %4700 = vrcp.f32 %v3221_v14  ;;  %v2911_v33 = vpop.f32.mrf.mxu3 }
 0x3f3   : > { %v4697_v19 = vpop.eup %4696  ;;  %v3080_v22 = vmul.f32 1.442695, %v3031_v21  ;;  %v2912_v30 = vadd.f32 %v2911_v33, %v2823_v38 }
 0x3f4   : > { %v4699_v42 = vpop.eup %4698  ;;  %v3126_v24 = vadd.f32 2.0, %v4697_v19 }
 0x3f5   : > { %4702 = vpow2.f32 %v3080_v22  ;;  %v2964_v52 = vadd.f32 %v2912_v30, %v2451_v26  ;;  %v3284_v10 = vmul.f32 %v4699_v42, %v3188_v6  ;;  %v2834_v27 = vpop.f32.mrf.mxu0  ;;  %v3319_v42 = vunpack.c.h.bf16 %v481_v49  ;;  %v2745_v6 = vpop.f32.mrf.mxu2 }
 0x3f6   : > { %v3158_v16 = vmul.f32 %v4697_v19, %v3126_v24 }
 0x3f7   : > { %v6411_v60 = vadd.f32 %v6136_v23, %v2964_v52  ;;  %v3348_v32 = vadd.f32 %v3316_v13, %v3284_v10  ;;  %v2462_v52 = vpop.f32.mrf.mxu1  ;;  %v2830_v13 = vadd.f32 %v6405_v44, %v2740_v62 }
 0x3f8   : > { %v4701_v7 = vpop.eup %4700  ;;  %v3222_v48 = vadd.f32 2.0, %v3158_v16  ;;  %v3190_v19 = vmul.f32 %v3158_v16, %v6383_v5  ;;  %v2458_v16 = vadd.f32 %v2457_v57, %v6071_v2  ;;  %v2833_v57 = vadd.f32 %v2832_v53, %v2743_v41 }
 0x3f9   : > { %v3285_v31 = vmul.f32 %v4701_v7, %v3189_v20  ;;  %v3032_v39 = vmin.f32 %v6411_v60, 20.0 }
 0x3fa   : > { %v2913_v1 = vpop.f32.mrf.mxu3 }
 0x3fb   : > { %v4703_v37 = vpop.eup %4702  ;;  %v3349_v17 = vadd.f32 %v3317_v0, %v3285_v31  ;;  %v3082_v34 = vmul.f32 1.442695, %v3032_v39  ;;  %v2914_v35 = vadd.f32 %v2913_v1, %v2825_v63 }
 0x3fc   : > { %v3127_v61 = vadd.f32 2.0, %v4703_v37 }
 0x3fd   : > { %v4392_v59 = vpack.c.bf16 %v3349_v17, %v3348_v32  ;;  %4704 = vpow2.f32 %v3082_v34  ;;  %v2965_v47 = vadd.f32 %v2914_v35, %v2453_v18  ;;  %v2837_v2 = vpop.f32.mrf.mxu0  ;;  %v2748_v32 = vpop.f32.mrf.mxu2  ;;  %v2461_v35 = vadd.f32 %v2460_v11, %v6077_v29 }
 0x3fe   : > { %4706 = vrcp.f32 %v3222_v48  ;;  %v3159_v43 = vmul.f32 %v4703_v37, %v3127_v61  ;;  %v2835_v11 = vadd.f32 %v2834_v27, %v2745_v6 }
 0x3ff   : > { %4456 = vst [vmem:[%s6194_s21 + $0x38] sm:$0xff] %v4392_v59   ;;  %v6420_v50 = vadd.f32 %v6136_v23, %v2965_v47  ;;  %v2465_v61 = vpop.f32.mrf.mxu1  ;;  %v483_v59 = vld [vmem:[%s4891_s28 + $0x48] sm:$0xff]  }
 0x400   : > { %v3223_v55 = vadd.f32 2.0, %v3159_v43  ;;  %v3191_v30 = vmul.f32 %v3159_v43, %v6398_v3 }
 0x401   : > { %v3033_v40 = vmin.f32 %v6420_v50, 20.0 }
 0x402   : > { %4708 = vrcp.f32 %v3223_v55  ;;  %v2916_v15 = vpop.f32.mrf.mxu3 }
 0x403   : > { %v4705_v4 = vpop.eup %4704  ;;  %v3084_v14 = vmul.f32 1.442695, %v3033_v40  ;;  %v2917_v38 = vadd.f32 %v2916_v15, %v2828_v12 }
 0x404   : > { %v4707_v21 = vpop.eup %4706  ;;  %v3128_v33 = vadd.f32 2.0, %v4705_v4 }
 0x405   : > { %4710 = vpow2.f32 %v3084_v14  ;;  %v2966_v26 = vadd.f32 %v2917_v38, %v2456_v36  ;;  %v3286_v8 = vmul.f32 %v4707_v21, %v3190_v19  ;;  %v3321_v36 = vunpack.c.h.bf16 %v483_v59 }
 0x406   : > { %v3160_v22 = vmul.f32 %v4705_v4, %v3128_v33  ;;  %v3320_v4 = vunpack.c.l.bf16 %v483_v59  ;;  %v2463_v21 = vadd.f32 %v2462_v52, %v6083_v56  ;;  %v6454_v56 = vld [vmem:[%s6527_s6] ss:$0 sm:$0xff] }
 0x407   : > { %v6431_v24 = vadd.f32 %v6136_v23, %v2966_v26  ;;  %v3350_v63 = vadd.f32 %v3318_v51, %v3286_v8  ;;  %v2839_v26 = vpop.f32.mrf.mxu0 }
 0x408   : > { %v4709_v9 = vpop.eup %4708  ;;  %v3224_v20 = vadd.f32 2.0, %v3160_v22  ;;  %v3192_v40 = vmul.f32 %v3160_v22, %v6411_v60 }
 0x409   : > { %v3287_v10 = vmul.f32 %v4709_v9, %v3191_v30  ;;  %v3034_v5 = vmin.f32 %v6431_v24, 20.0  ;;  %v2750_v30 = vpop.f32.mrf.mxu2 }
 0x40a   : > { %v2918_v0 = vpop.f32.mrf.mxu3 }
 0x40b   : > { %v4711_v7 = vpop.eup %4710  ;;  %v3351_v3 = vadd.f32 %v3319_v42, %v3287_v10  ;;  %v3086_v31 = vmul.f32 1.442695, %v3034_v5  ;;  %v2919_v39 = vadd.f32 %v2918_v0, %v2830_v13  ;;  %v2838_v10 = vadd.f32 %v2837_v2, %v2748_v32 }
 0x40c   : > { %v3129_v25 = vadd.f32 2.0, %v4711_v7  ;;  %v2466_v0 = vadd.f32 %v2465_v61, %v6089_v28 }
 0x40d   : > { %v4397_v18 = vpack.c.bf16 %v3351_v3, %v3350_v63  ;;  %4712 = vpow2.f32 %v3086_v31  ;;  %v2967_v48 = vadd.f32 %v2919_v39, %v2458_v16 }
 0x40e   : > { %4714 = vrcp.f32 %v3224_v20  ;;  %v3161_v44 = vmul.f32 %v4711_v7, %v3129_v25  ;;  %v485_v7 = vld [vmem:[%s4891_s28 + $0x50] sm:$0xff]  }
 0x40f   : > { %4457 = vst [vmem:[%s6194_s21 + $0x40] sm:$0xff] %v4397_v18   ;;  %v6438_v62 = vadd.f32 %v6136_v23, %v2967_v48  ;;  %v2842_v25 = vpop.f32.mrf.mxu0 }
 0x410   : > { %v3225_v1 = vadd.f32 2.0, %v3161_v44  ;;  %v3193_v46 = vmul.f32 %v3161_v44, %v6420_v50 }
 0x411   : > { %v3035_v37 = vmin.f32 %v6438_v62, 20.0  ;;  %v2753_v44 = vpop.f32.mrf.mxu2 }
 0x412   : > { %4716 = vrcp.f32 %v3225_v1  ;;  %v2921_v17 = vpop.f32.mrf.mxu3  ;;  %v3322_v1 = vunpack.c.l.bf16 %v485_v7 }
 0x413   : > { %v4713_v34 = vpop.eup %4712  ;;  %v3088_v47 = vmul.f32 1.442695, %v3035_v37  ;;  %v2922_v43 = vadd.f32 %v2921_v17, %v2833_v57  ;;  %v3323_v17 = vunpack.c.h.bf16 %v485_v7 }
 0x414   : > { %v4715_v55 = vpop.eup %4714  ;;  %v3130_v12 = vadd.f32 2.0, %v4713_v34 }
 0x415   : > { %4718 = vpow2.f32 %v3088_v47  ;;  %v2968_v15 = vadd.f32 %v2922_v43, %v2461_v35  ;;  %v3288_v41 = vmul.f32 %v4715_v55, %v3192_v40  ;;  %v2840_v35 = vadd.f32 %v2839_v26, %v2750_v30  ;;  %v487_v26 = vld [vmem:[%s4891_s28 + $0x58] sm:$0xff]  }
 0x416   : > { %v3162_v53 = vmul.f32 %v4713_v34, %v3130_v12 }
 0x417   : > { %v6446_v49 = vadd.f32 %v6136_v23, %v2968_v15  ;;  %v3352_v51 = vadd.f32 %v3320_v4, %v3288_v41  ;;  %v2467_v23 = vpop.f32.mrf.mxu1 }
 0x418   : > { %v4717_v29 = vpop.eup %4716  ;;  %v3226_v33 = vadd.f32 2.0, %v3162_v53  ;;  %v3194_v18 = vmul.f32 %v3162_v53, %v6431_v24  ;;  %v2468_v24 = vadd.f32 %v2467_v23, %v6095_v58  ;;  %v3324_v23 = vunpack.c.l.bf16 %v487_v26 }
 0x419   : > { %v3289_v14 = vmul.f32 %v4717_v29, %v3193_v46  ;;  %v3036_v38 = vmin.f32 %v6446_v49, 20.0  ;;  %v2755_v58 = vpop.f32.mrf.mxu2 }
 0x41a   : > { %v2923_v60 = vpop.f32.mrf.mxu3 }
 0x41b   : > { %v4719_v19 = vpop.eup %4718  ;;  %v3353_v22 = vadd.f32 %v3321_v36, %v3289_v14  ;;  %v3090_v8 = vmul.f32 1.442695, %v3036_v38  ;;  %v2924_v50 = vadd.f32 %v2923_v60, %v2835_v11  ;;  %v2844_v36 = vpop.f32.mrf.mxu0  ;;  %v2843_v38 = vadd.f32 %v2842_v25, %v2753_v44 }
 0x41c   : > { %v3131_v42 = vadd.f32 2.0, %v4719_v19 }
 0x41d   : > { %v4402_v9 = vpack.c.bf16 %v3353_v22, %v3352_v51  ;;  %4720 = vpow2.f32 %v3090_v8  ;;  %v2969_v27 = vadd.f32 %v2924_v50, %v2463_v21 }
 0x41e   : > { %4722 = vrcp.f32 %v3226_v33  ;;  %v3163_v6 = vmul.f32 %v4719_v19, %v3131_v42 }
 0x41f   : > { %4458 = vst [vmem:[%s6194_s21 + $0x48] sm:$0xff] %v4402_v9   ;;  %v6457_v52 = vadd.f32 %v6454_v56, %v2969_v27  ;;  %v2470_v57 = vpop.f32.mrf.mxu1 }
 0x420   : > { %v3227_v13 = vadd.f32 2.0, %v3163_v6  ;;  %v3195_v32 = vmul.f32 %v3163_v6, %v6438_v62  ;;  %v2471_v19 = vadd.f32 %v2470_v57, %v6103_v45 }
 0x421   : > { %v3037_v5 = vmin.f32 %v6457_v52, 20.0 }
 0x422   : > { %4724 = vrcp.f32 %v3227_v13  ;;  %v2926_v16 = vpop.f32.mrf.mxu3  ;;  %v3325_v13 = vunpack.c.h.bf16 %v487_v26 }
 0x423   : > { %v4721_v20 = vpop.eup %4720  ;;  %v3092_v63 = vmul.f32 1.442695, %v3037_v5  ;;  %v2927_v3 = vadd.f32 %v2926_v16, %v2838_v10  ;;  %v2847_v45 = vpop.f32.mrf.mxu0  ;;  %v2845_v16 = vadd.f32 %v2844_v36, %v2755_v58 }
 0x424   : > { %v4723_v31 = vpop.eup %4722  ;;  %v3132_v39 = vadd.f32 2.0, %v4721_v20 }
 0x425   : > { %4726 = vpow2.f32 %v3092_v63  ;;  %v2970_v48 = vadd.f32 %v2927_v3, %v2466_v0  ;;  %v3290_v37 = vmul.f32 %v4723_v31, %v3194_v18 }
 0x426   : > { %v3164_v2 = vmul.f32 %v4721_v20, %v3132_v39 }
 0x427   : > { %v6465_v28 = vadd.f32 %v6454_v56, %v2970_v48  ;;  %v3354_v12 = vadd.f32 %v3322_v1, %v3290_v37  ;;  %v2472_v14 = vpop.f32.mrf.mxu1 }
 0x428   : > { %v4725_v34 = vpop.eup %4724  ;;  %v3228_v47 = vadd.f32 2.0, %v3164_v2  ;;  %v3196_v30 = vmul.f32 %v3164_v2, %v6446_v49  ;;  %v2473_v7 = vadd.f32 %v2472_v14, %v6107_v54  ;;  %v2758_v49 = vpop.f32.mrf.mxu2 }
 0x429   : > { %v3291_v61 = vmul.f32 %v4725_v34, %v3195_v32  ;;  %v3038_v59 = vmin.f32 %v6465_v28, 20.0  ;;  %v2848_v32 = vadd.f32 %v2847_v45, %v2758_v49 }
 0x42a   : > { %v2928_v43 = vpop.f32.mrf.mxu3 }
 0x42b   : > { %v4727_v55 = vpop.eup %4726  ;;  %v3355_v40 = vadd.f32 %v3323_v17, %v3291_v61  ;;  %v3094_v15 = vmul.f32 1.442695, %v3038_v59  ;;  %v2929_v4 = vadd.f32 %v2928_v43, %v2840_v35  ;;  %v6691_v61 = vld [vmem:[#allocation16_spill] sm:$0xff] }
 0x42c   : > { %v3133_v62 = vadd.f32 2.0, %v4727_v55 }
 0x42d   : > { %v4407_v53 = vpack.c.bf16 %v3355_v40, %v3354_v12  ;;  %4728 = vpow2.f32 %v3094_v15  ;;  %v2971_v41 = vadd.f32 %v2929_v4, %v2468_v24  ;;  %v489_v24 = vld [vmem:[%s4891_s28 + $0x60] sm:$0xff]   ;;  %v2849_v12 = vpop.f32.mrf.mxu0 }
 0x42e   : > { %4730 = vrcp.f32 %v3228_v47  ;;  %v3165_v46 = vmul.f32 %v4727_v55, %v3133_v62 }
 0x42f   : > { %4459 = vst [vmem:[%s6194_s21 + $0x50] sm:$0xff] %v4407_v53   ;;  %v6471_v29 = vadd.f32 %v6454_v56, %v2971_v41  ;;  %v2475_v39 = vpop.f32.mrf.mxu1  ;;  %v3326_v41 = vunpack.c.l.bf16 %v489_v24 }
 0x430   : > { %v3229_v11 = vadd.f32 2.0, %v3165_v46  ;;  %v3197_v6 = vmul.f32 %v3165_v46, %v6457_v52  ;;  %v2476_v59 = vadd.f32 %v2475_v39, %v6691_v61  ;;  %v2760_v40 = vpop.f32.mrf.mxu2 }
 0x431   : > { %v3039_v21 = vmin.f32 %v6471_v29, 20.0 }
 0x432   : > { %4732 = vrcp.f32 %v3229_v11  ;;  %v2931_v33 = vpop.f32.mrf.mxu3  ;;  %v3327_v11 = vunpack.c.h.bf16 %v489_v24 }
 0x433   : > { %v4729_v60 = vpop.eup %4728  ;;  %v3096_v51 = vmul.f32 1.442695, %v3039_v21  ;;  %v2932_v22 = vadd.f32 %v2931_v33, %v2843_v38  ;;  %v2850_v21 = vadd.f32 %v2849_v12, %v2760_v40 }
 0x434   : > { %v4731_v8 = vpop.eup %4730  ;;  %v3134_v50 = vadd.f32 2.0, %v4729_v60 }
 0x435   : > { %4734 = vpow2.f32 %v3096_v51  ;;  %v2972_v42 = vadd.f32 %v2932_v22, %v2471_v19  ;;  %v3292_v27 = vmul.f32 %v4731_v8, %v3196_v30  ;;  %v6692_v19 = vld [vmem:[#allocation5_spill] sm:$0xff] }
 0x436   : > { %v3166_v9 = vmul.f32 %v4729_v60, %v3134_v50 }
 0x437   : > { %v6479_v10 = vadd.f32 %v6454_v56, %v2972_v42  ;;  %v3356_v25 = vadd.f32 %v3324_v23, %v3292_v27  ;;  %v2477_v4 = vpop.f32.mrf.mxu1 }
 0x438   : > { %v4733_v5 = vpop.eup %4732  ;;  %v3230_v63 = vadd.f32 2.0, %v3166_v9  ;;  %v3198_v62 = vmul.f32 %v3166_v9, %v6465_v28  ;;  %v2478_v26 = vadd.f32 %v2477_v4, %v6692_v19  ;;  %v2763_v23 = vpop.f32.mrf.mxu2 }
 0x439   : > { %v3293_v20 = vmul.f32 %v4733_v5, %v3197_v6  ;;  %v3040_v0 = vmin.f32 %v6479_v10, 20.0  ;;  %v2852_v9 = vpop.f32.mrf.mxu0 }
 0x43a   : > { %v2933_v3 = vpop.f32.mrf.mxu3  ;;  %v2853_v45 = vadd.f32 %v2852_v9, %v2763_v23 }
 0x43b   : > { %v4735_v31 = vpop.eup %4734  ;;  %v3357_v52 = vadd.f32 %v3325_v13, %v3293_v20  ;;  %v3098_v18 = vmul.f32 1.442695, %v3040_v0  ;;  %v2934_v48 = vadd.f32 %v2933_v3, %v2845_v16 }
 0x43c   : > { %v3135_v44 = vadd.f32 2.0, %v4735_v31 }
 0x43d   : > { %v4412_v1 = vpack.c.bf16 %v3357_v52, %v3356_v25  ;;  %4736 = vpow2.f32 %v3098_v18  ;;  %v2973_v2 = vadd.f32 %v2934_v48, %v2473_v7 }
 0x43e   : > { %4738 = vrcp.f32 %v3230_v63  ;;  %v3167_v57 = vmul.f32 %v4735_v31, %v3135_v44  ;;  %v6693_v63 = vld [vmem:[#allocation12_spill] sm:$0xff]  ;;  %v491_v31 = vld [vmem:[%s4891_s28 + $0x68] sm:$0xff]  }
 0x43f   : > { %4460 = vst [vmem:[%s6194_s21 + $0x58] sm:$0xff] %v4412_v1   ;;  %v6485_v54 = vadd.f32 %v6454_v56, %v2973_v2  ;;  %v2480_v5 = vpop.f32.mrf.mxu1  ;;  %v3328_v1 = vunpack.c.l.bf16 %v491_v31 }
 0x440   : > { %v3231_v37 = vadd.f32 2.0, %v3167_v57  ;;  %v3199_v58 = vmul.f32 %v3167_v57, %v6471_v29  ;;  %v2481_v3 = vadd.f32 %v2480_v5, %v6693_v63  ;;  %v2765_v57 = vpop.f32.mrf.mxu2 }
 0x441   : > { %v3041_v17 = vmin.f32 %v6485_v54, 20.0 }
 0x442   : > { %4740 = vrcp.f32 %v3231_v37  ;;  %v2936_v34 = vpop.f32.mrf.mxu3  ;;  %v2854_v37 = vpop.f32.mrf.mxu0 }
 0x443   : > { %v4737_v35 = vpop.eup %4736  ;;  %v3100_v47 = vmul.f32 1.442695, %v3041_v17  ;;  %v2937_v43 = vadd.f32 %v2936_v34, %v2848_v32  ;;  %v3329_v34 = vunpack.c.h.bf16 %v491_v31 }
 0x444   : > { %v4739_v55 = vpop.eup %4738  ;;  %v3136_v15 = vadd.f32 2.0, %v4737_v35 }
 0x445   : > { %4742 = vpow2.f32 %v3100_v47  ;;  %v2974_v53 = vadd.f32 %v2937_v43, %v2476_v59  ;;  %v3294_v36 = vmul.f32 %v4739_v55, %v3198_v62  ;;  %v2855_v47 = vadd.f32 %v2854_v37, %v2765_v57  ;;  %v6694_v55 = vld [vmem:[#allocation18_spill] sm:$0xff] }
 0x446   : > { %v3168_v46 = vmul.f32 %v4737_v35, %v3136_v15 }
 0x447   : > { %v6493_v14 = vadd.f32 %v6454_v56, %v2974_v53  ;;  %v3358_v8 = vadd.f32 %v3326_v41, %v3294_v36  ;;  %v2482_v59 = vpop.f32.mrf.mxu1 }
 0x448   : > { %v4741_v38 = vpop.eup %4740  ;;  %v3232_v51 = vadd.f32 2.0, %v3168_v46  ;;  %v3200_v48 = vmul.f32 %v3168_v46, %v6479_v10  ;;  %v2483_v10 = vadd.f32 %v2482_v59, %v6694_v55 }
 0x449   : > { %v3295_v33 = vmul.f32 %v4741_v38, %v3199_v58  ;;  %v3042_v60 = vmin.f32 %v6493_v14, 20.0 }
 0x44a   : > { %v2938_v28 = vpop.f32.mrf.mxu3 }
 0x44b   : > { %v4743_v22 = vpop.eup %4742  ;;  %v3359_v50 = vadd.f32 %v3327_v11, %v3295_v33  ;;  %v3102_v30 = vmul.f32 1.442695, %v3042_v60  ;;  %v2939_v42 = vadd.f32 %v2938_v28, %v2850_v21 }
 0x44c   : > { %v3137_v29 = vadd.f32 2.0, %v4743_v22 }
 0x44d   : > { %v4417_v27 = vpack.c.bf16 %v3359_v50, %v3358_v8  ;;  %4744 = vpow2.f32 %v3102_v30  ;;  %v2975_v6 = vadd.f32 %v2939_v42, %v2478_v26  ;;  %v493_v26 = vld [vmem:[%s4891_s28 + $0x70] sm:$0xff]  }
 0x44e   : > { %4746 = vrcp.f32 %v3232_v51  ;;  %v3169_v13 = vmul.f32 %v4743_v22, %v3137_v29  ;;  %v3330_v50 = vunpack.c.l.bf16 %v493_v26  ;;  %v3331_v42 = vunpack.c.h.bf16 %v493_v26 }
 0x44f   : > { %4461 = vst [vmem:[%s6194_s21 + $0x60] sm:$0xff] %v4417_v27   ;;  %v3011_v16 = vadd.f32 %v6454_v56, %v2975_v6 }
 0x450   : > { %v3233_v20 = vadd.f32 2.0, %v3169_v13  ;;  %v3201_v17 = vmul.f32 %v3169_v13, %v6485_v54 }
 0x451   : > { %v3043_v0 = vmin.f32 %v3011_v16, 20.0 }
 0x452   : > { %4748 = vrcp.f32 %v3233_v20  ;;  %v2941_v7 = vpop.f32.mrf.mxu3 }
 0x453   : > { %v4745_v49 = vpop.eup %4744  ;;  %v3104_v39 = vmul.f32 1.442695, %v3043_v0  ;;  %v2942_v25 = vadd.f32 %v2941_v7, %v2853_v45  ;;  %v495_v0 = vld [vmem:[%s4891_s28 + $0x78] sm:$0xff]  }
 0x454   : > { %v4747_v52 = vpop.eup %4746  ;;  %v3138_v18 = vadd.f32 2.0, %v4745_v49 }
 0x455   : > { %4750 = vpow2.f32 %v3104_v39  ;;  %v2976_v44 = vadd.f32 %v2942_v25, %v2481_v3  ;;  %v3296_v32 = vmul.f32 %v4747_v52, %v3200_v48  ;;  %v3333_v3 = vunpack.c.h.bf16 %v495_v0 }
 0x456   : > { %v3170_v2 = vmul.f32 %v4745_v49, %v3138_v18  ;;  %v3332_v49 = vunpack.c.l.bf16 %v495_v0 }
 0x457   : > { %v3012_v35 = vadd.f32 %v6454_v56, %v2976_v44  ;;  %v3360_v4 = vadd.f32 %v3328_v1, %v3296_v32 }
 0x458   : > { %v4749_v61 = vpop.eup %4748  ;;  %v3234_v12 = vadd.f32 2.0, %v3170_v2  ;;  %v3202_v28 = vmul.f32 %v3170_v2, %v6493_v14 }
 0x459   : > { %v3297_v24 = vmul.f32 %v4749_v61, %v3201_v17  ;;  %v3044_v43 = vmin.f32 %v3012_v35, 20.0 }
 0x45a   : > { %v2943_v40 = vpop.f32.mrf.mxu3 }
 0x45b   : > { %v4751_v15 = vpop.eup %4750  ;;  %v3361_v62 = vadd.f32 %v3329_v34, %v3297_v24  ;;  %v3106_v53 = vmul.f32 1.442695, %v3044_v43  ;;  %v2944_v41 = vadd.f32 %v2943_v40, %v2855_v47 }
 0x45c   : > { %v3139_v54 = vadd.f32 2.0, %v4751_v15 }
 0x45d   : > { %v4422_v46 = vpack.c.bf16 %v3361_v62, %v3360_v4  ;;  %4752 = vpow2.f32 %v3106_v53  ;;  %v2977_v36 = vadd.f32 %v2944_v41, %v2483_v10 }
 0x45e   : > { %4754 = vrcp.f32 %v3234_v12  ;;  %v3171_v58 = vmul.f32 %v4751_v15, %v3139_v54 }
 0x45f   : > { %4462 = vst [vmem:[%s6194_s21 + $0x68] sm:$0xff] %v4422_v46   ;;  %v3013_v11 = vadd.f32 %v6454_v56, %v2977_v36 }
 0x460   : > { %v3235_v38 = vadd.f32 2.0, %v3171_v58  ;;  %v3203_v30 = vmul.f32 %v3171_v58, %v3011_v16 }
 0x461   : > { %v3045_v21 = vmin.f32 %v3013_v11, 20.0 }
 0x462   : > { %4756 = vrcp.f32 %v3235_v38 }
 0x463   : > { %v4753_v33 = vpop.eup %4752  ;;  %v3108_v60 = vmul.f32 1.442695, %v3045_v21 }
 0x464   : > { %v4755_v19 = vpop.eup %4754  ;;  %v3140_v51 = vadd.f32 2.0, %v4753_v33 }
 0x465   : > { %4758 = vpow2.f32 %v3108_v60  ;;  %v3298_v8 = vmul.f32 %v4755_v19, %v3202_v28 }
 0x466   : > { %v3172_v22 = vmul.f32 %v4753_v33, %v3140_v51 }
 0x467   : > { %v3362_v27 = vadd.f32 %v3330_v50, %v3298_v8 }
 0x468   : > { %v4757_v29 = vpop.eup %4756  ;;  %v3236_v23 = vadd.f32 2.0, %v3172_v22  ;;  %v3204_v7 = vmul.f32 %v3172_v22, %v3012_v35 }
 0x469   : > { %v3299_v56 = vmul.f32 %v4757_v29, %v3203_v30 }
 0x46a   : > { %4760 = vrcp.f32 %v3236_v23 }
 0x46b   : > { %v4759_v9 = vpop.eup %4758  ;;  %v3363_v6 = vadd.f32 %v3331_v42, %v3299_v56 }
 0x46c   : > { %v3141_v13 = vadd.f32 2.0, %v4759_v9 }
 0x46d   : > { %v4427_v5 = vpack.c.bf16 %v3363_v6, %v3362_v27 }
 0x46e   : > { %v3173_v45 = vmul.f32 %v4759_v9, %v3141_v13 }
 0x46f   : > { %4463 = vst [vmem:[%s6194_s21 + $0x70] sm:$0xff] %v4427_v5  }
 0x470   : > { %v3237_v14 = vadd.f32 2.0, %v3173_v45  ;;  %v4761_v20 = vpop.eup %4760  ;;  %v3205_v63 = vmul.f32 %v3173_v45, %v3013_v11 }
 0x471   : > { %v3300_v16 = vmul.f32 %v4761_v20, %v3204_v7 }
 0x472   : > { %4762 = vrcp.f32 %v3237_v14 }
 0x473   : > { %v3364_v25 = vadd.f32 %v3332_v49, %v3300_v16 }
 0x478   : > { %v4763_v31 = vpop.eup %4762 }
 0x479   : > { %v3301_v39 = vmul.f32 %v4763_v31, %v3205_v63 }
 0x47b   : > { %v3365_v52 = vadd.f32 %v3333_v3, %v3301_v39 }
 0x47d   : > { %v4432_v18 = vpack.c.bf16 %v3365_v52, %v3364_v25 }
 0x47f   : > { %4464 = vst [vmem:[%s6194_s21 + $0x78] sm:$0xff] %v4432_v18  }
 0x480 PF: > { %s17_s26 = sadd.s32 1, %s4796_s26   ;;  %s6695_s24 = smov %s4792_s25 }
 0x481   : > { %p14_p5 = scmp.ge.s32.totalorder %s17_s26, 4   ;;  %s6696_s25 = smov %s6698_s27 }
 0x483   :  { %16 = sbr.rel (!%p14_p5) target bundleno = 2 (0x2), region = 88 }

</bundles_post_ra>
